<compile_context>
chip_gen: v7x
topology: tpu7x:2x2x1
jax: 0.10.0
libtpu: 0.0.40
codegen_flags: <defaults>
</compile_context>

<pallas_src>
import functools

import jax
import jax.numpy as jnp
from jax.experimental import pallas as pl
from jax.experimental.pallas import tpu as pltpu

_BN_EPS = 1e-5
# (Cin, Cout) for the five DoubleConv blocks of UNET_MAE_SPARSE.
_CHANNELS = [(1, 64), (64, 128), (128, 256), (256, 512), (512, 1024)]


# ----------------------------------------------------------------------------
# Chip-dependent sizing (MXU width, VMEM limit, per-step VMEM budget)
# ----------------------------------------------------------------------------
@functools.lru_cache(maxsize=1)
def _chip_config():
    kind = ""
    try:
        kind = jax.devices()[0].device_kind.lower()
    except Exception:
        pass
    if ("v5 lite" in kind) or ("v5e" in kind) or ("v5lite" in kind):
        # v5e: 4x128x128 MXU (N=128 already fills it), 128 MiB physical VMEM.
        return {"mxu_n": 128, "vmem_limit": 100 * 2**20, "budget": 56 * 2**20}
    if "v6" in kind:
        # v6e: 2x256x256 MXU, 128 MiB physical VMEM.
        return {"mxu_n": 256, "vmem_limit": 100 * 2**20, "budget": 56 * 2**20}
    # v7x / unknown: 256-wide MXU but only 64 MiB physical VMEM -> conservative.
    return {"mxu_n": 256, "vmem_limit": 48 * 2**20, "budget": 24 * 2**20}


def _pick_cout_tile(cout, mxu_n):
    """Lane-dense Cout tile.  256 fills the 256-wide MXU of v6e/v7x; 128 on v5e."""
    if cout >= 256 and cout % 256 == 0 and mxu_n >= 256:
        return 256
    if cout % 128 == 0:
        return 128
    return cout  # e.g. Cout=64 stem block: full (lane-masked) stores.
    # TODO(synk): if block-1 (Cout=64) stores show up as a bottleneck, pad its
    # filters to 128 lanes for unmasked stores (trades 2x store bytes).


def _pick_batch_tile(B, H, W, cin, ct, budget, out_itemsize, want_split):
    """Largest batch tile whose estimated per-step VMEM footprint fits `budget`.

    Footprint counts the double-buffered bf16 input block, the live bf16
    im2col patch matrices, the f32 accumulator, the double-buffered bf16
    weight slab and the double-buffered outputs (skip + ~1/4-size pooled map).
    If `want_split`, keeps >= 2 batch steps so the grid never collapses to a
    single step (v7x megacore / pipeline overlap).
    """
    def footprint(bt):
        m = bt * H * W
        inp = 2 * bt * (H + 2) * (W + 2) * cin * 2       # 2x-buffered bf16 input
        pat = 2 * m * 3 * cin * 2                        # ~2 live bf16 patch mats
        acc = m * ct * 4                                 # f32 accumulator
        wgt = 2 * 3 * 3 * cin * ct * 2                   # 2x-buffered bf16 weights
        out = 2 * m * ct * (out_itemsize + max(out_itemsize // 4, 1))
        return inp + pat + acc + wgt + out

    best = 1
    for bt in range(1, B + 1):
        if B % bt:
            continue
        if want_split and bt > 1 and (B // bt) < 2:
            continue
        if footprint(bt) <= budget:
            best = bt
    return best


# ----------------------------------------------------------------------------
# Fused kernel: 3x3 conv (pad=1, stride=1) + folded BatchNorm + ReLU
#               (+ optional fused 2x2/2 max pool as a second output)
# ----------------------------------------------------------------------------
def _conv_compute(x_ref, w_ref, scale_ref, bias_ref):
    """One (Cout-tile, batch-tile) of conv+BN+ReLU.  Returns f32 NHWC."""
    bt, hp2, wp2, cin = x_ref.shape
    H, W = hp2 - 2, wp2 - 2
    ct = w_ref.shape[-1]

    x = x_ref[...].astype(jnp.bfloat16)                  # (bt, H+2, W+2, Cin)

    # Row-wise im2col: 3 matmuls with K = 3*Cin, accumulated in f32.  Avoids
    # the 9-way lane concat (3x fewer slice/concat relayout copies) while
    # still keeping a single f32 accumulator that never leaves VMEM.
    acc = None
    for dy in range(3):
        band = x[:, dy:dy + H, :, :]                     # (bt, H, W+2, Cin)
        patches = jnp.concatenate(
            [band[:, :, dx:dx + W, :].reshape(bt * H * W, cin) for dx in range(3)],
            axis=-1)                                     # (bt*H*W, 3*Cin) bf16
        part = jnp.dot(patches, w_ref[dy],               # bf16 x bf16 -> f32 acc
                       preferred_element_type=jnp.float32)
        acc = part if acc is None else acc + part

    y = acc * scale_ref[...] + bias_ref[...]             # folded BN (+ conv bias)
    y = jnp.maximum(y, 0.0)                              # ReLU
    return y.reshape(bt, H, W, ct)


def _conv_bn_relu_kernel(x_ref, w_ref, scale_ref, bias_ref, o_ref):
    y = _conv_compute(x_ref, w_ref, scale_ref, bias_ref)
    o_ref[...] = y.astype(o_ref.dtype)


def _conv_bn_relu_pool_kernel(x_ref, w_ref, scale_ref, bias_ref, o_ref, p_ref):
    y = _conv_compute(x_ref, w_ref, scale_ref, bias_ref)
    o_ref[...] = y.astype(o_ref.dtype)
    bt, H, W, ct = y.shape
    # Fused 2x2/2 max pool: reshape + pairwise max (no strided loads).
    t = y.reshape(bt, H // 2, 2, W, ct).max(axis=2)          # row pairs
    p = t.reshape(bt, H // 2, W // 2, 2, ct).max(axis=3)     # col pairs
    p_ref[...] = p.astype(p_ref.dtype)


def conv3x3_bn_relu(x_nhwc, w, scale, bias, *, fuse_pool=False,
                    out_dtype=jnp.float32, pool_dtype=jnp.bfloat16):
    """x_nhwc: (B,H,W,Cin); w: (3,3,Cin,Cout); scale/bias: (Cout,).

    Returns the conv+BN+ReLU map (out_dtype), or (map, 2x2-maxpooled map in
    pool_dtype) if fuse_pool.
    """
    B, H, W, Cin = x_nhwc.shape
    kh, kw, wcin, Cout = w.shape
    assert (kh, kw) == (3, 3) and wcin == Cin
    if fuse_pool:
        # TODO(synk): PyTorch MaxPool2d(2) floors odd dims; fused pool assumes even.
        assert H % 2 == 0 and W % 2 == 0

    cfg = _chip_config()
    ct = _pick_cout_tile(Cout, cfg["mxu_n"])
    n_co = Cout // ct
    bt = _pick_batch_tile(B, H, W, Cin, ct, cfg["budget"],
                          jnp.dtype(out_dtype).itemsize, want_split=(n_co < 2))
    n_b = B // bt

    # Single zero-pad pass (kept in HBM); NO overlapping-window duplication.
    xp = jnp.pad(x_nhwc.astype(jnp.bfloat16),
                 ((0, 0), (1, 1), (1, 1), (0, 0)))           # (B, H+2, W+2, Cin)

    w3 = w.reshape(3, 3 * Cin, Cout).astype(jnp.bfloat16)    # per-tap-row layout
    scale2 = scale.reshape(1, Cout).astype(jnp.float32)
    bias2 = bias.reshape(1, Cout).astype(jnp.float32)

    in_specs = [
        pl.BlockSpec((bt, H + 2, W + 2, Cin), lambda co, b: (b, 0, 0, 0)),
        pl.BlockSpec((3, 3 * Cin, ct), lambda co, b: (0, 0, co)),
        pl.BlockSpec((1, ct), lambda co, b: (0, co)),
        pl.BlockSpec((1, ct), lambda co, b: (0, co)),
    ]
    if fuse_pool:
        kernel = _conv_bn_relu_pool_kernel
        out_shape = (jax.ShapeDtypeStruct((B, H, W, Cout), out_dtype),
                     jax.ShapeDtypeStruct((B, H // 2, W // 2, Cout), pool_dtype))
        out_specs = (pl.BlockSpec((bt, H, W, ct), lambda co, b: (b, 0, 0, co)),
                     pl.BlockSpec((bt, H // 2, W // 2, ct),
                                  lambda co, b: (b, 0, 0, co)))
    else:
        kernel = _conv_bn_relu_kernel
        out_shape = jax.ShapeDtypeStruct((B, H, W, Cout), out_dtype)
        out_specs = pl.BlockSpec((bt, H, W, ct), lambda co, b: (b, 0, 0, co))

    return pl.pallas_call(
        kernel,
        out_shape=out_shape,
        grid_spec=pltpu.PrefetchScalarGridSpec(
            num_scalar_prefetch=0,
            # co outer, b inner: each weight slab is DMA'd exactly once; the
            # (much smaller, bf16) input block is re-fetched n_co times.
            grid=(n_co, n_b),
            in_specs=in_specs,
            out_specs=out_specs,
        ),
        compiler_params=pltpu.CompilerParams(
            dimension_semantics=("parallel", "parallel"),
            vmem_limit_bytes=cfg["vmem_limit"],
        ),
    )(xp, w3, scale2, bias2)


# ----------------------------------------------------------------------------
# Parameter construction (deterministic, synthetic) — BN folded into scale/bias
# ----------------------------------------------------------------------------
def _init_conv_bn(key, cin, cout):
    """Conv2d(cin,cout,3,pad=1,bias=True) + BatchNorm2d(cout), BN eval-folded."""
    k1, k2, k3, k4, k5, k6 = jax.random.split(key, 6)
    fan_in = 9.0 * cin
    w = jax.random.normal(k1, (3, 3, cin, cout), jnp.float32) / jnp.sqrt(fan_in)
    conv_b = 0.01 * jax.random.normal(k2, (cout,), jnp.float32)
    gamma = 1.0 + 0.1 * jax.random.normal(k3, (cout,), jnp.float32)
    beta = 0.1 * jax.random.normal(k4, (cout,), jnp.float32)
    mean = 0.1 * jax.random.normal(k5, (cout,), jnp.float32)
    var = jnp.abs(jax.random.normal(k6, (cout,), jnp.float32)) + 0.5

    inv = gamma / jnp.sqrt(var + _BN_EPS)
    scale = inv                               # applied to the (bias-less) conv out
    bias = (conv_b - mean) * inv + beta       # folded conv bias + BN shift
    return w, scale, bias


def init_params(key):
    params = []
    for cin, cout in _CHANNELS:
        key, ka, kb = jax.random.split(key, 3)
        conv1 = _init_conv_bn(ka, cin, cout)
        conv2 = _init_conv_bn(kb, cout, cout)
        if cin < 8:   # pad the 1-channel stem to 8 lanes with zero weights (exact)
            w, s, b = conv1
            w = jnp.pad(w, ((0, 0), (0, 0), (0, 8 - cin), (0, 0)))
            conv1 = (w, s, b)
        params.append((conv1, conv2))
    return params


# ----------------------------------------------------------------------------
# Model forward
# ----------------------------------------------------------------------------
def unet_mae_sparse_forward(inp_bchw, params, hierarchical=True):
    """inp_bchw: (B, 1, H, W) float32 (NCHW, as in PyTorch)."""
    x = jnp.transpose(inp_bchw, (0, 2, 3, 1))                        # -> NHWC
    cin = x.shape[-1]
    if cin < 8:
        x = jnp.pad(x, ((0, 0), (0, 0), (0, 0), (0, 8 - cin)))
    x = x.astype(jnp.bfloat16)                                       # bf16 activations

    feature_maps = []
    # four DownBlock_sparse stages: DoubleConv (+fused maxpool) -> (skip, down)
    for i in range(4):
        (w1, s1, b1), (w2, s2, b2) = params[i]
        h = conv3x3_bn_relu(x, w1, s1, b1, out_dtype=jnp.bfloat16)   # intermediate
        skip, x = conv3x3_bn_relu(h, w2, s2, b2, fuse_pool=True,
                                  out_dtype=jnp.float32,             # returned map
                                  pool_dtype=jnp.bfloat16)           # feeds next conv
        feature_maps.append(jnp.transpose(skip, (0, 3, 1, 2)))       # back to NCHW
    # bottleneck dense DoubleConv(512, 1024)
    (w1, s1, b1), (w2, s2, b2) = params[4]
    h = conv3x3_bn_relu(x, w1, s1, b1, out_dtype=jnp.bfloat16)
    y = conv3x3_bn_relu(h, w2, s2, b2, out_dtype=jnp.float32)
    feature_maps.append(jnp.transpose(y, (0, 3, 1, 2)))

    if hierarchical:
        return feature_maps
    return None   # matches the PyTorch forward, which falls through without return


# ----------------------------------------------------------------------------
# Pure-JAX reference (same bf16 operands / f32 accumulation) for validation
# ----------------------------------------------------------------------------
def _ref_conv_bn_relu(x, w, scale, bias):
    y = jax.lax.conv_general_dilated(
        x.astype(jnp.bfloat16), w.astype(jnp.bfloat16),
        window_strides=(1, 1), padding=((1, 1), (1, 1)),
        dimension_numbers=("NHWC", "HWIO", "NHWC"),
        preferred_element_type=jnp.float32)
    return jnp.maximum(y * scale.reshape(1, 1, 1, -1) + bias.reshape(1, 1, 1, -1), 0.0)


def _ref_maxpool2(x):
    B, H, W, C = x.shape
    return x.reshape(B, H // 2, 2, W // 2, 2, C).max(axis=(2, 4))


def _reference_forward(inp_bchw, params):
    x = jnp.transpose(inp_bchw, (0, 2, 3, 1))
    cin = x.shape[-1]
    if cin < 8:
        x = jnp.pad(x, ((0, 0), (0, 0), (0, 0), (0, 8 - cin)))
    x = x.astype(jnp.bfloat16)
    feats = []
    for i in range(4):
        (w1, s1, b1), (w2, s2, b2) = params[i]
        h = _ref_conv_bn_relu(x, w1, s1, b1).astype(jnp.bfloat16)
        y = _ref_conv_bn_relu(h, w2, s2, b2)                       # f32 skip map
        feats.append(jnp.transpose(y, (0, 3, 1, 2)))
        x = _ref_maxpool2(y).astype(jnp.bfloat16)
    (w1, s1, b1), (w2, s2, b2) = params[4]
    h = _ref_conv_bn_relu(x, w1, s1, b1).astype(jnp.bfloat16)
    y = _ref_conv_bn_relu(h, w2, s2, b2)
    feats.append(jnp.transpose(y, (0, 3, 1, 2)))
    return feats


# ----------------------------------------------------------------------------
if __name__ == "__main__":
    key = jax.random.PRNGKey(0)
    k_inp, k_par = jax.random.split(key)

    B, C, H, W = 2, 1, 32, 32   # small, divisible by the downsample ratio 16
    inp_bchw = jax.random.normal(k_inp, (B, C, H, W), jnp.float32)
    params = init_params(k_par)

    feats = unet_mae_sparse_forward(inp_bchw, params, hierarchical=True)
    feats = jax.block_until_ready(feats)

    expected = [(B, 64, 32, 32), (B, 128, 16, 16), (B, 256, 8, 8),
                (B, 512, 4, 4), (B, 1024, 2, 2)]
    got = [tuple(f.shape) for f in feats]
    assert got == expected, (got, expected)
    assert all(bool(jnp.all(jnp.isfinite(f))) for f in feats)

    # numerical sanity check against the pure-JAX reference (bf16 operands /
    # f32 accumulation on both sides; loose bound only screens structural bugs)
    refs = jax.block_until_ready(_reference_forward(inp_bchw, params))
    for i, (a, b) in enumerate(zip(feats, refs)):
        err = float(jnp.max(jnp.abs(a - b)) / (jnp.max(jnp.abs(b)) + 1e-6))
        assert err < 0.1, (i, err)

    print("KERNEL_OK")
</pallas_src>

<mosaic_0001>
module attributes {stable_mosaic.version = 11 : i64} {
  func.func @_conv_bn_relu_kernel(%arg0: i32, %arg1: i32, %arg2: memref<1x34x34x8xbf16, #tpu.memory_space<vmem>>, %arg3: memref<3x24x64xbf16, #tpu.memory_space<vmem>>, %arg4: memref<1x64xf32, #tpu.memory_space<vmem>>, %arg5: memref<1x64xf32, #tpu.memory_space<vmem>>, %arg6: memref<1x32x32x64xbf16, #tpu.memory_space<vmem>>) attributes {dimension_semantics = [#tpu.dimension_semantics<parallel>, #tpu.dimension_semantics<parallel>], iteration_bounds = array<i64: 1, 2>, scalar_prefetch = 0 : i64, scratch_operands = 0 : i64, tpu.core_type = #tpu.core_type<tc>, window_params = [{transform_indices = @transform_0, window_bounds = array<i64: 1, 34, 34, 8>}, {transform_indices = @transform_1, window_bounds = array<i64: 3, 24, 64>}, {transform_indices = @transform_2, window_bounds = array<i64: 1, 64>}, {transform_indices = @transform_3, window_bounds = array<i64: 1, 64>}, {transform_indices = @transform_4, window_bounds = array<i64: 1, 32, 32, 64>}]} {
    %c0 = arith.constant 0 : index
    %c0_0 = arith.constant 0 : index
    %c0_1 = arith.constant 0 : index
    %c0_2 = arith.constant 0 : index
    %0 = vector.load %arg2[%c0, %c0_0, %c0_1, %c0_2] : memref<1x34x34x8xbf16, #tpu.memory_space<vmem>>, vector<1x34x34x8xbf16>
    %1 = vector.extract_strided_slice %0 {offsets = [0, 0, 0, 0], sizes = [1, 32, 34, 8], strides = [1, 1, 1, 1]} : vector<1x34x34x8xbf16> to vector<1x32x34x8xbf16>
    %2 = vector.extract_strided_slice %1 {offsets = [0, 0, 0, 0], sizes = [1, 32, 32, 8], strides = [1, 1, 1, 1]} : vector<1x32x34x8xbf16> to vector<1x32x32x8xbf16>
    %3 = vector.shape_cast %2 : vector<1x32x32x8xbf16> to vector<1024x8xbf16>
    %4 = vector.extract_strided_slice %1 {offsets = [0, 0, 1, 0], sizes = [1, 32, 32, 8], strides = [1, 1, 1, 1]} : vector<1x32x34x8xbf16> to vector<1x32x32x8xbf16>
    %5 = vector.shape_cast %4 : vector<1x32x32x8xbf16> to vector<1024x8xbf16>
    %6 = vector.extract_strided_slice %1 {offsets = [0, 0, 2, 0], sizes = [1, 32, 32, 8], strides = [1, 1, 1, 1]} : vector<1x32x34x8xbf16> to vector<1x32x32x8xbf16>
    %7 = vector.shape_cast %6 : vector<1x32x32x8xbf16> to vector<1024x8xbf16>
    %8 = tpu.concatenate %3, %5, %7 in 1 : vector<1024x8xbf16>, vector<1024x8xbf16>, vector<1024x8xbf16> -> vector<1024x24xbf16>
    %c0_3 = arith.constant 0 : index
    %c0_4 = arith.constant 0 : index
    %c0_5 = arith.constant 0 : index
    %9 = vector.load %arg3[%c0_3, %c0_4, %c0_5] : memref<3x24x64xbf16, #tpu.memory_space<vmem>>, vector<1x24x64xbf16>
    %10 = vector.shape_cast %9 : vector<1x24x64xbf16> to vector<24x64xbf16>
    %cst = arith.constant dense<0.000000e+00> : vector<1024x64xf32>
    %11 = tpu.matmul %8, %10, %cst {dimension_numbers = #tpu.dot_dimension_numbers<[1], [0], [0], [1], [0, 0, 1, 1], [], []>} : vector<1024x24xbf16>, vector<24x64xbf16>, vector<1024x64xf32> -> vector<1024x64xf32>
    %12 = vector.extract_strided_slice %0 {offsets = [0, 1, 0, 0], sizes = [1, 32, 34, 8], strides = [1, 1, 1, 1]} : vector<1x34x34x8xbf16> to vector<1x32x34x8xbf16>
    %13 = vector.extract_strided_slice %12 {offsets = [0, 0, 0, 0], sizes = [1, 32, 32, 8], strides = [1, 1, 1, 1]} : vector<1x32x34x8xbf16> to vector<1x32x32x8xbf16>
    %14 = vector.shape_cast %13 : vector<1x32x32x8xbf16> to vector<1024x8xbf16>
    %15 = vector.extract_strided_slice %12 {offsets = [0, 0, 1, 0], sizes = [1, 32, 32, 8], strides = [1, 1, 1, 1]} : vector<1x32x34x8xbf16> to vector<1x32x32x8xbf16>
    %16 = vector.shape_cast %15 : vector<1x32x32x8xbf16> to vector<1024x8xbf16>
    %17 = vector.extract_strided_slice %12 {offsets = [0, 0, 2, 0], sizes = [1, 32, 32, 8], strides = [1, 1, 1, 1]} : vector<1x32x34x8xbf16> to vector<1x32x32x8xbf16>
    %18 = vector.shape_cast %17 : vector<1x32x32x8xbf16> to vector<1024x8xbf16>
    %19 = tpu.concatenate %14, %16, %18 in 1 : vector<1024x8xbf16>, vector<1024x8xbf16>, vector<1024x8xbf16> -> vector<1024x24xbf16>
    %c1 = arith.constant 1 : index
    %c0_6 = arith.constant 0 : index
    %c0_7 = arith.constant 0 : index
    %20 = vector.load %arg3[%c1, %c0_6, %c0_7] : memref<3x24x64xbf16, #tpu.memory_space<vmem>>, vector<1x24x64xbf16>
    %21 = vector.shape_cast %20 : vector<1x24x64xbf16> to vector<24x64xbf16>
    %cst_8 = arith.constant dense<0.000000e+00> : vector<1024x64xf32>
    %22 = tpu.matmul %19, %21, %cst_8 {dimension_numbers = #tpu.dot_dimension_numbers<[1], [0], [0], [1], [0, 0, 1, 1], [], []>} : vector<1024x24xbf16>, vector<24x64xbf16>, vector<1024x64xf32> -> vector<1024x64xf32>
    %23 = arith.addf %11, %22 : vector<1024x64xf32>
    %24 = vector.extract_strided_slice %0 {offsets = [0, 2, 0, 0], sizes = [1, 32, 34, 8], strides = [1, 1, 1, 1]} : vector<1x34x34x8xbf16> to vector<1x32x34x8xbf16>
    %25 = vector.extract_strided_slice %24 {offsets = [0, 0, 0, 0], sizes = [1, 32, 32, 8], strides = [1, 1, 1, 1]} : vector<1x32x34x8xbf16> to vector<1x32x32x8xbf16>
    %26 = vector.shape_cast %25 : vector<1x32x32x8xbf16> to vector<1024x8xbf16>
    %27 = vector.extract_strided_slice %24 {offsets = [0, 0, 1, 0], sizes = [1, 32, 32, 8], strides = [1, 1, 1, 1]} : vector<1x32x34x8xbf16> to vector<1x32x32x8xbf16>
    %28 = vector.shape_cast %27 : vector<1x32x32x8xbf16> to vector<1024x8xbf16>
    %29 = vector.extract_strided_slice %24 {offsets = [0, 0, 2, 0], sizes = [1, 32, 32, 8], strides = [1, 1, 1, 1]} : vector<1x32x34x8xbf16> to vector<1x32x32x8xbf16>
    %30 = vector.shape_cast %29 : vector<1x32x32x8xbf16> to vector<1024x8xbf16>
    %31 = tpu.concatenate %26, %28, %30 in 1 : vector<1024x8xbf16>, vector<1024x8xbf16>, vector<1024x8xbf16> -> vector<1024x24xbf16>
    %c2 = arith.constant 2 : index
    %c0_9 = arith.constant 0 : index
    %c0_10 = arith.constant 0 : index
    %32 = vector.load %arg3[%c2, %c0_9, %c0_10] : memref<3x24x64xbf16, #tpu.memory_space<vmem>>, vector<1x24x64xbf16>
    %33 = vector.shape_cast %32 : vector<1x24x64xbf16> to vector<24x64xbf16>
    %cst_11 = arith.constant dense<0.000000e+00> : vector<1024x64xf32>
    %34 = tpu.matmul %31, %33, %cst_11 {dimension_numbers = #tpu.dot_dimension_numbers<[1], [0], [0], [1], [0, 0, 1, 1], [], []>} : vector<1024x24xbf16>, vector<24x64xbf16>, vector<1024x64xf32> -> vector<1024x64xf32>
    %35 = arith.addf %23, %34 : vector<1024x64xf32>
    %c0_12 = arith.constant 0 : index
    %c0_13 = arith.constant 0 : index
    %36 = vector.load %arg4[%c0_12, %c0_13] : memref<1x64xf32, #tpu.memory_space<vmem>>, vector<1x64xf32>
    %37 = vector.broadcast %36 : vector<1x64xf32> to vector<1024x64xf32>
    %38 = arith.mulf %35, %37 : vector<1024x64xf32>
    %c0_14 = arith.constant 0 : index
    %c0_15 = arith.constant 0 : index
    %39 = vector.load %arg5[%c0_14, %c0_15] : memref<1x64xf32, #tpu.memory_space<vmem>>, vector<1x64xf32>
    %40 = vector.broadcast %39 : vector<1x64xf32> to vector<1024x64xf32>
    %41 = arith.addf %38, %40 : vector<1024x64xf32>
    %cst_16 = arith.constant 0.000000e+00 : f32
    %42 = vector.broadcast %cst_16 : f32 to vector<1024x64xf32>
    %43 = arith.maximumf %41, %42 : vector<1024x64xf32>
    %44 = vector.shape_cast %43 : vector<1024x64xf32> to vector<1x32x32x64xf32>
    %45 = arith.truncf %44 : vector<1x32x32x64xf32> to vector<1x32x32x64xbf16>
    %c0_17 = arith.constant 0 : index
    %c0_18 = arith.constant 0 : index
    %c0_19 = arith.constant 0 : index
    %c0_20 = arith.constant 0 : index
    %46 = vector.load %arg6[%c0_17, %c0_18, %c0_19, %c0_20] : memref<1x32x32x64xbf16, #tpu.memory_space<vmem>>, vector<1x32x32x64xbf16>
    tpu.vector_store %arg6[%c0_17, %c0_18, %c0_19, %c0_20], %45 {strides = array<i32>} : memref<1x32x32x64xbf16, #tpu.memory_space<vmem>>, vector<1x32x32x64xbf16>,
    return
  }
  func.func @transform_0(%arg0: i32, %arg1: i32) -> (i32, i32, i32, i32) {
    %c0_i32 = arith.constant 0 : i32
    %c0_i32_0 = arith.constant 0 : i32
    %c0_i32_1 = arith.constant 0 : i32
    %c0_i32_2 = arith.constant 0 : i32
    return %arg1, %c0_i32, %c0_i32_0, %c0_i32_1 : i32, i32, i32, i32
  }
  func.func @transform_1(%arg0: i32, %arg1: i32) -> (i32, i32, i32) {
    %c0_i32 = arith.constant 0 : i32
    %c0_i32_0 = arith.constant 0 : i32
    %c0_i32_1 = arith.constant 0 : i32
    return %c0_i32, %c0_i32_0, %arg0 : i32, i32, i32
  }
  func.func @transform_2(%arg0: i32, %arg1: i32) -> (i32, i32) {
    %c0_i32 = arith.constant 0 : i32
    %c0_i32_0 = arith.constant 0 : i32
    return %c0_i32, %arg0 : i32, i32
  }
  func.func @transform_3(%arg0: i32, %arg1: i32) -> (i32, i32) {
    %c0_i32 = arith.constant 0 : i32
    %c0_i32_0 = arith.constant 0 : i32
    return %c0_i32, %arg0 : i32, i32
  }
  func.func @transform_4(%arg0: i32, %arg1: i32) -> (i32, i32, i32, i32) {
    %c0_i32 = arith.constant 0 : i32
    %c0_i32_0 = arith.constant 0 : i32
    %c0_i32_1 = arith.constant 0 : i32
    return %arg1, %c0_i32, %c0_i32_0, %arg0 : i32, i32, i32, i32
  }
}

</mosaic_0001>

<bundles_post_ra>
// kernel: tpu_custom_call.1
= control target key start
LH: loop header
LB: loop body
LE: loop exit
PB: predicated region body
PF: predicated region fallthrough
CT: control target
= control target key end

     0   :  { %9 = vsyncpa [#allocation3], 0  ;;  %s12469_s0 = inlined_call_operand.vmem [shape: bf16[2,34,34,8], index: 0, kind: input, shape index: {}]   ;;  %s12470_s1 = inlined_call_operand.vmem [shape: bf16[3,24,64], index: 1, kind: input, shape index: {}]   ;;  %s12471_s2 = inlined_call_operand.vmem [shape: f32[1,64], index: 2, kind: input, shape index: {}]   ;;  %s12472_s3 = inlined_call_operand.vmem [shape: f32[1,64], index: 3, kind: input, shape index: {}]   ;;  %s12473_s4 = inlined_call_operand.hbm [shape: bf16[2,32,32,64], index: 4, kind: output, shape index: {}]  }
   0x1   :  { %11 = vsyncpa [#allocation3 + $0x1], 0  ;;  %s8817_s15 = smov 0   ;;  %s8819_s16 = smov 0  }
   0x2   :  { %s8821_s17 = smov 0   ;;  %s8823_s18 = smov 0  }
   0x3   :  { %s8825_s19 = smov 0   ;;  %s8827_s20 = smov 0  }
   0x4 LB: > { %s6879_s21 = sadd.s32 4294967295, %s8785_s20   ;;  %s6880_s22 = sadd.s32 4294967294, %s8785_s20   ;;  %s8785_s20 = sphi %s8827_s20, %s17_s20   ;;  %s8781_s19 = sphi %s8825_s19, %s12629_s19   ;;  %s8777_s18 = sphi %s8823_s18, %s12628_s18   ;;  %s8773_s17 = sphi %s8821_s17, %s12627_s17   ;;  %s8769_s16 = sphi %s8819_s16, %s12626_s16   ;;  %s8765_s15 = sphi %s8817_s15, %s12625_s15  }
   0x5   : > { %s26_s23 = sadd.s32 1, %s8781_s19  ;;  %s142_s24 = sadd.s32 1, %s8773_s17 }
   0x6   : > { %p27_p0 = scmp.ge.s32.totalorder %s26_s23, 2  ;;  %p152_p1 = scmp.ne.s32.totalorder %s8773_s17, %s8769_s16 }
   0x7   : > { %p153_p2 = scmp.eq.s32.totalorder %s6879_s21, 1  ;;  %p158_p3 = scmp.ne.s32.totalorder %s8769_s16, %s8765_s15 }
   0x8   : > { %s12631_s23 = smov (%p27_p0, %s26_s23), 0  ;;  %p159_p5 = scmp.eq.s32.totalorder %s6880_s22, 1 }
   0x9   : > { %p8857_p4 = por %p153_p2, %p152_p1  ;;  %s137_s26 = ssub.s32 %s8781_s19, %s12631_s23 }
   0xa   : > { %p6886_p6 = scmp.ge.s32.totalorder %s8785_s20, 1  ;;  %p140_p7 = scmp.eq.s32.totalorder %s137_s26, 0 }
   0xb   : > { %p8864_p8 = por %p159_p5, %p158_p3  ;;  %p204_p9 = scmp.lt.s32.totalorder %s8785_s20, 3 }
   0xc   : > { %s8870_s28 = scalar_select %p140_p7, %s8773_s17, %s142_s24  }
   0xd   : > { %p205_p10 = pnand %p6886_p6, %p204_p9 }
   0xf   : > { %208 = sbr.rel (%p205_p10) target bundleno = 930 (0x3a2), region = 36 }
  0x16   : > { %p240_p11 = scmp.lt.s32.totalorder %s8777_s18, 1  ;;  %vm1997_vm0 = vcmask 1042432   ;;  %vm1998_vm1 = vcmask 1046532   ;;  %vm426_vm3 = vsmask.f32 3328  ;;  %s8787_s8 = smov 16  }
  0x17   : > { %vm8879_vm2 = vmor %vm1997_vm0, %vm1998_vm1  ;;  %vm427_vm4 = vsmask.f32 7440  ;;  %s8788_s9 = smov 8   ;;  %vm3248_vm6 = vcmask 64512   ;;  %vm3441_vm7 = vcmask 130048   ;;  %vm3684_vm8 = vcmask 195584  }
  0x18   : > { %s241_s29 = scalar_select %p240_p11, %s8777_s18, 1  ;;  %vm8920_vm5 = vmor %vm426_vm3, %vm427_vm4  ;;  %vm3813_vm9 = vcmask 1043456   ;;  %vm6624_vm10 = vcmask 519168  }
  0x19   : > { %s7594_s5 = sshll.u32 %s8777_s18, 13 }
  0x1a   : > { %s8453_s30 = smul.u32 680, %s241_s29  ;;  %s12411_s12 = scalar_lea.hbm %s12473_s4, %s7594_s5 }
  0x1c   : > { %s8877_s7 = scalar_lea.vmem %s12469_s0, %s8453_s30 }
  0x1d   : > { %v8884_v1 = vld [vmem:[%s8877_s7 + $0x14] sm:$0xf]  ;;  %v8887_v2 = vld [vmem:[%s8877_s7 + $0x18] sm:$0xf]  ;;  %v263_v3 = vld [vmem:[%s8877_s7 + $0x1c] sm:$0xf] }
  0x1e   : > { %v6890_v4 = vrot.slane %v8884_v1, 9  ;;  %v2015_v5 = vrot.slane %v8887_v2, 5  ;;  %v2018_v6 = vrot.slane %v263_v3, 5  ;;  %v256_v7 = vld [vmem:[%s8877_s7] sm:$0xf]  ;;  %v493_v8 = vshll.u32 %v263_v3, 16 }
  0x1f   : > { %v257_v9 = vld [vmem:[%s8877_s7 + $0x4] sm:$0xf]  ;;  %v258_v10 = vld [vmem:[%s8877_s7 + $0x8] sm:$0xf]  ;;  %v6889_v11 = vrot.slane %v256_v7, 9  ;;  %v430_v12 = vshrl.u32 %v256_v7, 16 }
  0x20   : > { %v2016_v13 = vsel %vm8879_vm2, %v6890_v4, %v2015_v5  ;;  %v2017_v14 = vrot.slane %v2015_v5, 4  ;;  %v8897_v15 = vrot.slane %v2018_v6, 4  ;;  %v2002_v16 = vrot.slane %v257_v9, 5  ;;  %v8900_v17 = vld [vmem:[%s8877_s7 + $0xc] sm:$0xf] }
  0x21   : > { %v2005_v18 = vrot.slane %v258_v10, 5  ;;  %v8903_v19 = vld [vmem:[%s8877_s7 + $0x10] sm:$0x1]  ;;  %v449_v20 = vshll.u32 %v258_v10, 16  ;;  %v453_v21 = vshrl.u32 %v258_v10, 16  ;;  %v459_v22 = vshll.u32 %v8900_v17, 16 }
  0x22   : > { %v2019_v23 = vsel %vm8879_vm2, %v2017_v14, %v2018_v6  ;;  %v2003_v24 = vsel %vm8879_vm2, %v6889_v11, %v2002_v16  ;;  %v2004_v25 = vrot.slane %v2002_v16, 4  ;;  %v463_v26 = vshrl.u32 %v8900_v17, 16  ;;  %v264_v39 = vld [vmem:[%s8877_s7 + $0x20] sm:$0xf]  ;;  %v8926_v47 = vld [vmem:[%s8877_s7 + $0x24] sm:$0x1] }
  0x23   : > { %v7051_v27 = vcombine.low %v2016_v13, %v2019_v23  ;;  %v8911_v28 = vrot.slane %v2005_v18, 4  ;;  %v451_v29 = vrot.slane %v449_v20, 5  ;;  %v455_v30 = vrot.slane %v453_v21, 4  ;;  %v8946_v20 = vld [vmem:[%s8877_s7 + $0x30] sm:$0xf] }
  0x24   : > { %v2006_v31 = vsel %vm8879_vm2, %v2004_v25, %v2005_v18  ;;  %v461_v32 = vrot.slane %v459_v22, 5  ;;  %v465_v33 = vrot.slane %v463_v26, 4  ;;  %v469_v34 = vshll.u32 %v8903_v19, 16  ;;  %v8679_v40 = vld [vmem:[%s8877_s7 + $0x1cc] sm:$0xf] }
  0x25   : > { %3124 = vrot.lane.b32.xlu1 %v7051_v27, %s8787_s8  ;;  %v7049_v35 = vcombine.low %v2003_v24, %v2006_v31  ;;  %v456_v36 = vor.u32 %v455_v30, %v451_v29  ;;  %v432_v37 = vrot.slane %v430_v12, 4  ;;  %v433_v38 = vshll.u32 %v256_v7, 16  ;;  %v269_v31 = vld [vmem:[%s8877_s7 + $0x34] sm:$0xf] }
  0x26   : > { %v466_v41 = vor.u32 %v465_v33, %v461_v32  ;;  %v471_v42 = vrot.slane %v469_v34, 5  ;;  %v439_v43 = vshll.u32 %v257_v9, 16  ;;  %v443_v44 = vshrl.u32 %v257_v9, 16 }
  0x27   : > { %3120 = vrot.lane.b32.xlu0 %v7049_v35, %s8787_s8  ;;  %v457_v45 = vrot.slane %v456_v36, 4  ;;  %v435_v46 = vrot.slane %v433_v38, 5  ;;  %v8928_v48 = vrot.slane %v493_v8, 5  ;;  %v497_v49 = vshrl.u32 %v263_v3, 16 }
  0x28   : > { %v467_v50 = vrot.slane %v466_v41, 4  ;;  %v441_v51 = vrot.slane %v439_v43, 5  ;;  %v445_v52 = vrot.slane %v443_v44, 4  ;;  %v503_v53 = vshll.u32 %v264_v39, 16 }
  0x29   : > { %v462_v54 = vsel %vm8920_vm5, %v457_v45, %v461_v32  ;;  %v436_v55 = vor.u32 %v435_v46, %v432_v37  ;;  %v499_v56 = vrot.slane %v497_v49, 4  ;;  %v507_v57 = vshrl.u32 %v264_v39, 16  ;;  %v270_v37 = vld [vmem:[%s8877_s7 + $0x38] sm:$0x1]  ;;  %v267_v49 = vld [vmem:[%s8877_s7 + $0x2c] sm:$0xf] }
  0x2a   : > { %v472_v58 = vsel %vm8920_vm5, %v467_v50, %v471_v42  ;;  %v446_v59 = vor.u32 %v445_v52, %v441_v51  ;;  %v505_v60 = vrot.slane %v503_v53, 5  ;;  %v513_v61 = vshll.u32 %v8926_v47, 16 }
  0x2b   : > { %v6986_v62 = vcombine.low %v462_v54, %v472_v58  ;;  %v437_v63 = vrot.slane %v436_v55, 4  ;;  %v500_v3 = vor.u32 %v499_v56, %v8928_v48  ;;  %v509_v4 = vrot.slane %v507_v57, 4 }
  0x2c   : > { %v447_v5 = vrot.slane %v446_v59, 4  ;;  %v515_v6 = vrot.slane %v513_v61, 5  ;;  %v474_v7 = vshrl.u32 %v8884_v1, 16  ;;  %v477_v8 = vshll.u32 %v8884_v1, 16 }
  0x2d   : > { %2802 = vrot.lane.b32.xlu1 %v6986_v62, %s8788_s9  ;;  %v442_v9 = vsel %vm8920_vm5, %v437_v63, %v441_v51  ;;  %v501_v10 = vrot.slane %v500_v3, 4  ;;  %v510_v11 = vor.u32 %v509_v4, %v505_v60  ;;  %v483_v12 = vshll.u32 %v8887_v2, 16 }
  0x2e   : > { %v452_v13 = vsel %vm8920_vm5, %v447_v5, %v451_v29  ;;  %v476_v14 = vrot.slane %v474_v7, 4  ;;  %v479_v16 = vrot.slane %v477_v8, 5  ;;  %v487_v18 = vshrl.u32 %v8887_v2, 16 }
  0x2f   : > { %v6985_v1 = vcombine.low %v442_v9, %v452_v13  ;;  %v506_v21 = vsel %vm8920_vm5, %v501_v10, %v505_v60  ;;  %v511_v22 = vrot.slane %v510_v11, 4  ;;  %v485_v23 = vrot.slane %v483_v12, 5  ;;  %v8985_v12 = vld [vmem:[%s8877_s7 + $0x44] sm:$0xf] }
  0x30   : > { %v480_v24 = vor.u32 %v479_v16, %v476_v14  ;;  %v489_v25 = vrot.slane %v487_v18, 4  ;;  %v2021_v26 = vrot.slane %v264_v39, 5  ;;  %v2024_v27 = vrot.slane %v8926_v47, 5  ;;  %v266_v47 = vld [vmem:[%s8877_s7 + $0x28] sm:$0xf] }
  0x31   : > { %2800 = vrot.lane.b32.xlu0 %v6985_v1, %s8788_s9  ;;  %v516_v29 = vsel %vm8920_vm5, %v511_v22, %v515_v6  ;;  %v2008_v2 = vrot.slane %v8900_v17, 5  ;;  %v2011_v30 = vrot.slane %v8903_v19, 5  ;;  %v537_v32 = vshll.u32 %v8946_v20, 16 }
  0x32   : > { %v6988_v33 = vcombine.low %v506_v21, %v516_v29  ;;  %v481_v34 = vrot.slane %v480_v24, 4  ;;  %v490_v35 = vor.u32 %v489_v25, %v485_v23  ;;  %v2022_v36 = vsel %vm8879_vm2, %v8897_v15, %v2021_v26 }
  0x33   : > { %v2023_v38 = vrot.slane %v2021_v26, 4  ;;  %v2009_v17 = vsel %vm8879_vm2, %v8911_v28, %v2008_v2  ;;  %v2010_v39 = vrot.slane %v2008_v2, 4  ;;  %v8965_v19 = vrot.slane %v537_v32, 5 }
  0x34   : > { %2806 = vrot.lane.b32.xlu1 %v6988_v33, %s8788_s9  ;;  %v486_v41 = vsel %vm8920_vm5, %v481_v34, %v485_v23  ;;  %v491_v42 = vrot.slane %v490_v35, 4  ;;  %v541_v43 = vshrl.u32 %v8946_v20, 16  ;;  %v547_v44 = vshll.u32 %v269_v31, 16  ;;  %v274_v23 = vld [vmem:[%s8877_s7 + $0x48] sm:$0xf] }
  0x35   : > { %v2025_v15 = vsel %vm8879_vm2, %v2023_v38, %v2024_v27  ;;  %v2012_v45 = vsel %vm8879_vm2, %v2010_v39, %v2011_v30  ;;  %v551_v46 = vshrl.u32 %v269_v31, 16  ;;  %v557_v28 = vshll.u32 %v270_v37, 16  ;;  %v275_v27 = vld [vmem:[%s8877_s7 + $0x4c] sm:$0x1] }
  0x36   : > { %v496_v50 = vsel %vm8920_vm5, %v491_v42, %v8928_v48  ;;  %v7052_v51 = vcombine.low %v2022_v36, %v2025_v15  ;;  %v7050_v52 = vcombine.low %v2009_v17, %v2012_v45  ;;  %v543_v53 = vrot.slane %v541_v43, 4  ;;  %v272_v42 = vld [vmem:[%s8877_s7 + $0x40] sm:$0xf] }
  0x37   : > { %v6987_v54 = vcombine.low %v486_v41, %v496_v50  ;;  %v549_v55 = vrot.slane %v547_v44, 5  ;;  %v553_v56 = vrot.slane %v551_v46, 4  ;;  %v559_v57 = vrot.slane %v557_v28, 5 }
  0x38   : > { %3126 = vrot.lane.b32.xlu1 %v7052_v51, %s8787_s8  ;;  %v544_v58 = vor.u32 %v543_v53, %v8965_v19  ;;  %v518_v59 = vshrl.u32 %v266_v47, 16  ;;  %v521_v60 = vshll.u32 %v266_v47, 16  ;;  %v527_v61 = vshll.u32 %v267_v49, 16 }
  0x39   : > { %2804 = vrot.lane.b32.xlu0 %v6987_v54, %s8788_s9  ;;  %v554_v62 = vor.u32 %v553_v56, %v549_v55  ;;  %v531_v63 = vshrl.u32 %v267_v49, 16  ;;  %v2031_v48 = vrot.slane %v8946_v20, 5  ;;  %v2034_v3 = vrot.slane %v269_v31, 5 }
  0x3a   : > { %v545_v4 = vrot.slane %v544_v58, 4  ;;  %v520_v5 = vrot.slane %v518_v59, 4  ;;  %v523_v6 = vrot.slane %v521_v60, 5  ;;  %v529_v7 = vrot.slane %v527_v61, 5 }
  0x3b   : > { %v555_v8 = vrot.slane %v554_v62, 4  ;;  %v533_v9 = vrot.slane %v531_v63, 4  ;;  %v2033_v10 = vrot.slane %v2031_v48, 4  ;;  %v2036_v11 = vrot.slane %v2034_v3, 4 }
  0x3c   : > { %v550_v13 = vsel %vm8920_vm5, %v545_v4, %v549_v55  ;;  %v524_v14 = vor.u32 %v523_v6, %v520_v5  ;;  %v2037_v16 = vrot.slane %v270_v37, 5  ;;  %v6891_v18 = vrot.slane %v266_v47, 9  ;;  %v271_v37 = vld [vmem:[%s8877_s7 + $0x3c] sm:$0xf] }
  0x3d   : > { %3122 = vrot.lane.b32.xlu0 %v7050_v52, %s8787_s8  ;;  %v560_v20 = vsel %vm8920_vm5, %v555_v8, %v559_v57  ;;  %v534_v1 = vor.u32 %v533_v9, %v529_v7  ;;  %v2035_v21 = vsel %vm8879_vm2, %v2033_v10, %v2034_v3  ;;  %v2028_v22 = vrot.slane %v267_v49, 5  ;;  %v9019_v3 = vld [vmem:[%s8877_s7 + $0x58] sm:$0xf] }
  0x3e   : > { %v6990_v24 = vcombine.low %v550_v13, %v560_v20  ;;  %v525_v25 = vrot.slane %v524_v14, 4  ;;  %v2038_v26 = vsel %vm8879_vm2, %v2036_v11, %v2037_v16  ;;  %v581_v29 = vshll.u32 %v8985_v12, 16 }
  0x3f   : > { %v535_v2 = vrot.slane %v534_v1, 4  ;;  %v7054_v30 = vcombine.low %v2035_v21, %v2038_v26  ;;  %v2029_v31 = vsel %vm8879_vm2, %v6891_v18, %v2028_v22  ;;  %v2030_v32 = vrot.slane %v2028_v22, 4  ;;  %v280_v18 = vld [vmem:[%s8877_s7 + $0x60] sm:$0x1] }
  0x40   : > { %2810 = vrot.lane.b32.xlu1 %v6990_v24, %s8788_s9  ;;  %v530_v33 = vsel %vm8920_vm5, %v525_v25, %v529_v7  ;;  %v9004_v34 = vrot.slane %v581_v29, 5  ;;  %v585_v35 = vshrl.u32 %v8985_v12, 16  ;;  %v591_v36 = vshll.u32 %v274_v23, 16  ;;  %v276_v24 = vld [vmem:[%s8877_s7 + $0x50] sm:$0xf] }
  0x41   : > { %v540_v38 = vsel %vm8920_vm5, %v535_v2, %v8965_v19  ;;  %v2032_v17 = vsel %vm8879_vm2, %v2030_v32, %v2031_v48  ;;  %v595_v39 = vshrl.u32 %v274_v23, 16  ;;  %v601_v41 = vshll.u32 %v275_v27, 16  ;;  %v277_v2 = vld [vmem:[%s8877_s7 + $0x54] sm:$0xf] }
  0x42   : > { %v6989_v43 = vcombine.low %v530_v33, %v540_v38  ;;  %v7053_v44 = vcombine.low %v2029_v31, %v2032_v17  ;;  %v587_v15 = vrot.slane %v585_v35, 4  ;;  %v593_v45 = vrot.slane %v591_v36, 5 }
  0x43   : > { %v597_v46 = vrot.slane %v595_v39, 4  ;;  %v603_v28 = vrot.slane %v601_v41, 5  ;;  %v562_v47 = vshrl.u32 %v271_v37, 16  ;;  %v565_v49 = vshll.u32 %v271_v37, 16 }
  0x44   : > { %2808 = vrot.lane.b32.xlu0 %v6989_v43, %s8788_s9  ;;  %3130 = vrot.lane.b32.xlu1 %v7054_v30, %s8787_s8  ;;  %v588_v19 = vor.u32 %v587_v15, %v9004_v34  ;;  %v571_v50 = vshll.u32 %v272_v42, 16  ;;  %v575_v51 = vshrl.u32 %v272_v42, 16  ;;  %v2044_v52 = vrot.slane %v8985_v12, 5  ;;  %v279_v12 = vld [vmem:[%s8877_s7 + $0x5c] sm:$0xf] }
  0x45   : > { %v598_v53 = vor.u32 %v597_v46, %v593_v45  ;;  %v564_v54 = vrot.slane %v562_v47, 4  ;;  %v567_v55 = vrot.slane %v565_v49, 5  ;;  %v2047_v56 = vrot.slane %v274_v23, 5  ;;  %v9053_v49 = vld [vmem:[%s8877_s7 + $0x6c] sm:$0xf] }
  0x46   : > { %v589_v57 = vrot.slane %v588_v19, 4  ;;  %v573_v58 = vrot.slane %v571_v50, 5  ;;  %v577_v59 = vrot.slane %v575_v51, 4  ;;  %v2046_v60 = vrot.slane %v2044_v52, 4 }
  0x47   : > { %v599_v61 = vrot.slane %v598_v53, 4  ;;  %v568_v62 = vor.u32 %v567_v55, %v564_v54  ;;  %v2049_v63 = vrot.slane %v2047_v56, 4  ;;  %v2050_v48 = vrot.slane %v275_v27, 5  ;;  %v8515_v53 = vld [vmem:[%s12470_s1 + $0xc] sm:$0xff]   ;;  %v8516_v54 = vld [vmem:[%s12470_s1] sm:$0xff]  }
  0x48   : > { %3128 = vrot.lane.b32.xlu0 %v7053_v44, %s8787_s8  ;;  %v594_v4 = vsel %vm8920_vm5, %v589_v57, %v593_v45  ;;  %v578_v5 = vor.u32 %v577_v59, %v573_v58  ;;  %v2048_v6 = vsel %vm8879_vm2, %v2046_v60, %v2047_v56  ;;  %v6892_v7 = vrot.slane %v271_v37, 9  ;;  %7793 = vmatprep.subr.bf16.mxu1 %v8515_v53 }
  0x49   : > { %v604_v8 = vsel %vm8920_vm5, %v599_v61, %v603_v28  ;;  %v569_v9 = vrot.slane %v568_v62, 4  ;;  %v2051_v10 = vsel %vm8879_vm2, %v2049_v63, %v2050_v48  ;;  %v2041_v11 = vrot.slane %v272_v42, 5  ;;  %v284_v63 = vld [vmem:[%s8877_s7 + $0x70] sm:$0xf]  ;;  %7925 = vmatprep.subr.bf16.mxu0 %v8516_v54  ;;  %7794 = vmatpush3.bf16.msra.mxu1 %v8515_v53 }
  0x4a   : > { %v6992_v13 = vcombine.low %v594_v4, %v604_v8  ;;  %v579_v14 = vrot.slane %v578_v5, 4  ;;  %v7056_v16 = vcombine.low %v2048_v6, %v2051_v10  ;;  %v625_v20 = vshll.u32 %v9019_v3, 16  ;;  %v285_v5 = vld [vmem:[%s8877_s7 + $0x74] sm:$0x1]  ;;  %7926 = vmatpush3.bf16.msra.mxu0 %v8516_v54  ;;  %v289_v54 = vld [vmem:[%s8877_s7 + $0x84] sm:$0xf] }
  0x4b   : > { %v574_v1 = vsel %vm8920_vm5, %v569_v9, %v573_v58  ;;  %v2042_v21 = vsel %vm8879_vm2, %v6892_v7, %v2041_v11  ;;  %v2043_v22 = vrot.slane %v2041_v11, 4  ;;  %v629_v23 = vshrl.u32 %v9019_v3, 16 }
  0x4c   : > { %2814 = vrot.lane.b32.xlu1 %v6992_v13, %s8788_s9  ;;  %v584_v25 = vsel %vm8920_vm5, %v579_v14, %v9004_v34  ;;  %v9043_v26 = vrot.slane %v625_v20, 5  ;;  %v635_v27 = vshll.u32 %v279_v12, 16  ;;  %v639_v29 = vshrl.u32 %v279_v12, 16 }
  0x4d   : > { %v6991_v30 = vcombine.low %v574_v1, %v584_v25  ;;  %v2045_v31 = vsel %vm8879_vm2, %v2043_v22, %v2044_v52  ;;  %v631_v32 = vrot.slane %v629_v23, 4  ;;  %v645_v33 = vshll.u32 %v280_v18, 16  ;;  %v282_v22 = vld [vmem:[%s8877_s7 + $0x68] sm:$0xf] }
  0x4e   : > { %v7055_v35 = vcombine.low %v2042_v21, %v2045_v31  ;;  %v637_v36 = vrot.slane %v635_v27, 5  ;;  %v641_v37 = vrot.slane %v639_v29, 4  ;;  %v606_v38 = vshrl.u32 %v276_v24, 16 }
  0x4f   : > { %2812 = vrot.lane.b32.xlu0 %v6991_v30, %s8788_s9  ;;  %v632_v34 = vor.u32 %v631_v32, %v9043_v26  ;;  %v647_v17 = vrot.slane %v645_v33, 5  ;;  %v609_v39 = vshll.u32 %v276_v24, 16  ;;  %v615_v41 = vshll.u32 %v277_v2, 16 }
  0x50   : > { %3134 = vrot.lane.b32.xlu1 %v7056_v16, %s8787_s8  ;;  %v642_v42 = vor.u32 %v641_v37, %v637_v36  ;;  %v608_v43 = vrot.slane %v606_v38, 4  ;;  %v619_v44 = vshrl.u32 %v277_v2, 16  ;;  %v2057_v15 = vrot.slane %v9019_v3, 5  ;;  %v281_v16 = vld [vmem:[%s8877_s7 + $0x64] sm:$0xf] }
  0x51   : > { %v633_v45 = vrot.slane %v632_v34, 4  ;;  %v611_v46 = vrot.slane %v609_v39, 5  ;;  %v617_v28 = vrot.slane %v615_v41, 5  ;;  %v2060_v47 = vrot.slane %v279_v12, 5 }
  0x52   : > { %v643_v19 = vrot.slane %v642_v42, 4  ;;  %v621_v50 = vrot.slane %v619_v44, 4  ;;  %v2059_v51 = vrot.slane %v2057_v15, 4  ;;  %v2063_v52 = vrot.slane %v280_v18, 5 }
  0x53   : > { %3132 = vrot.lane.b32.xlu0 %v7055_v35, %s8787_s8  ;;  %v638_v55 = vsel %vm8920_vm5, %v633_v45, %v637_v36  ;;  %v612_v56 = vor.u32 %v611_v46, %v608_v43  ;;  %v2062_v57 = vrot.slane %v2060_v47, 4  ;;  %v6893_v58 = vrot.slane %v276_v24, 9  ;;  %v9093_v46 = vld [vmem:[%s8877_s7 + $0x80] sm:$0xf] }
  0x54   : > { %v648_v59 = vsel %vm8920_vm5, %v643_v19, %v647_v17  ;;  %v622_v60 = vor.u32 %v621_v50, %v617_v28  ;;  %v2061_v61 = vsel %vm8879_vm2, %v2059_v51, %v2060_v47  ;;  %v2054_v62 = vrot.slane %v277_v2, 5 }
  0x55   : > { %v6994_v48 = vcombine.low %v638_v55, %v648_v59  ;;  %v613_v3 = vrot.slane %v612_v56, 4  ;;  %v2064_v4 = vsel %vm8879_vm2, %v2062_v57, %v2063_v52  ;;  %v669_v6 = vshll.u32 %v9053_v49, 16 }
  0x56   : > { %v623_v7 = vrot.slane %v622_v60, 4  ;;  %v7058_v8 = vcombine.low %v2061_v61, %v2064_v4  ;;  %v2055_v9 = vsel %vm8879_vm2, %v6893_v58, %v2054_v62  ;;  %v2056_v10 = vrot.slane %v2054_v62, 4  ;;  %v290_v58 = vld [vmem:[%s8877_s7 + $0x88] sm:$0x1] }
  0x57   : > { %2818 = vrot.lane.b32.xlu1 %v6994_v48, %s8788_s9  ;;  %v618_v11 = vsel %vm8920_vm5, %v613_v3, %v617_v28  ;;  %v9078_v12 = vrot.slane %v669_v6, 5  ;;  %v673_v13 = vshrl.u32 %v9053_v49, 16  ;;  %v679_v14 = vshll.u32 %v284_v63, 16  ;;  %v286_v48 = vld [vmem:[%s8877_s7 + $0x78] sm:$0xf] }
  0x58   : > { %v628_v18 = vsel %vm8920_vm5, %v623_v7, %v9043_v26  ;;  %v2058_v20 = vsel %vm8879_vm2, %v2056_v10, %v2057_v15  ;;  %v683_v1 = vshrl.u32 %v284_v63, 16  ;;  %v689_v21 = vshll.u32 %v285_v5, 16  ;;  %v287_v7 = vld [vmem:[%s8877_s7 + $0x7c] sm:$0xf] }
  0x59   : > { %v6993_v23 = vcombine.low %v618_v11, %v628_v18  ;;  %v7057_v24 = vcombine.low %v2055_v9, %v2058_v20  ;;  %v675_v25 = vrot.slane %v673_v13, 4  ;;  %v681_v27 = vrot.slane %v679_v14, 5 }
  0x5a   : > { %v685_v29 = vrot.slane %v683_v1, 4  ;;  %v691_v2 = vrot.slane %v689_v21, 5  ;;  %v650_v30 = vshrl.u32 %v281_v16, 16  ;;  %v653_v31 = vshll.u32 %v281_v16, 16 }
  0x5b   : > { %2816 = vrot.lane.b32.xlu0 %v6993_v23, %s8788_s9  ;;  %3138 = vrot.lane.b32.xlu1 %v7058_v8, %s8787_s8  ;;  %v676_v26 = vor.u32 %v675_v25, %v9078_v12  ;;  %v659_v32 = vshll.u32 %v282_v22, 16  ;;  %v663_v33 = vshrl.u32 %v282_v22, 16  ;;  %v2070_v35 = vrot.slane %v9053_v49, 5 }
  0x5c   : > { %v686_v36 = vor.u32 %v685_v29, %v681_v27  ;;  %v652_v37 = vrot.slane %v650_v30, 4  ;;  %v655_v38 = vrot.slane %v653_v31, 5  ;;  %v2073_v34 = vrot.slane %v284_v63, 5 }
  0x5d   : > { %v677_v17 = vrot.slane %v676_v26, 4  ;;  %v661_v39 = vrot.slane %v659_v32, 5  ;;  %v665_v41 = vrot.slane %v663_v33, 4  ;;  %v2072_v42 = vrot.slane %v2070_v35, 4 }
  0x5e   : > { %v687_v43 = vrot.slane %v686_v36, 4  ;;  %v656_v44 = vor.u32 %v655_v38, %v652_v37  ;;  %v2075_v15 = vrot.slane %v2073_v34, 4  ;;  %v2076_v45 = vrot.slane %v285_v5, 5 }
  0x5f   : > { %3136 = vrot.lane.b32.xlu0 %v7057_v24, %s8787_s8  ;;  %v682_v28 = vsel %vm8920_vm5, %v677_v17, %v681_v27  ;;  %v666_v47 = vor.u32 %v665_v41, %v661_v39  ;;  %v2074_v49 = vsel %vm8879_vm2, %v2072_v42, %v2073_v34  ;;  %v6894_v19 = vrot.slane %v281_v16, 9 }
  0x60   : > { %v692_v50 = vsel %vm8920_vm5, %v687_v43, %v691_v2  ;;  %v657_v51 = vrot.slane %v656_v44, 4  ;;  %v2077_v52 = vsel %vm8879_vm2, %v2075_v15, %v2076_v45  ;;  %v2067_v53 = vrot.slane %v282_v22, 5  ;;  %v294_v43 = vld [vmem:[%s8877_s7 + $0x98] sm:$0xf] }
  0x61   : > { %v6996_v55 = vcombine.low %v682_v28, %v692_v50  ;;  %v667_v56 = vrot.slane %v666_v47, 4  ;;  %v7060_v57 = vcombine.low %v2074_v49, %v2077_v52  ;;  %v713_v59 = vshll.u32 %v9093_v46, 16 }
  0x62   : > { %v662_v60 = vsel %vm8920_vm5, %v657_v51, %v661_v39  ;;  %v2068_v61 = vsel %vm8879_vm2, %v6894_v19, %v2067_v53  ;;  %v2069_v62 = vrot.slane %v2067_v53, 4  ;;  %v717_v63 = vshrl.u32 %v9093_v46, 16 }
  0x63   : > { %2822 = vrot.lane.b32.xlu1 %v6996_v55, %s8788_s9  ;;  %v672_v3 = vsel %vm8920_vm5, %v667_v56, %v9078_v12  ;;  %v715_v4 = vrot.slane %v713_v59, 5  ;;  %v723_v5 = vshll.u32 %v289_v54, 16  ;;  %v727_v6 = vshrl.u32 %v289_v54, 16  ;;  %v291_v55 = vld [vmem:[%s8877_s7 + $0x8c] sm:$0xf] }
  0x64   : > { %v6995_v8 = vcombine.low %v662_v60, %v672_v3  ;;  %v2071_v9 = vsel %vm8879_vm2, %v2069_v62, %v2070_v35  ;;  %v719_v10 = vrot.slane %v717_v63, 4  ;;  %v733_v11 = vshll.u32 %v290_v58, 16  ;;  %v9124_v35 = vld [vmem:[%s8877_s7 + $0x94] sm:$0xf]  ;;  %v292_v60 = vld [vmem:[%s8877_s7 + $0x90] sm:$0xf] }
  0x65   : > { %v7059_v13 = vcombine.low %v2068_v61, %v2071_v9  ;;  %v725_v14 = vrot.slane %v723_v5, 5  ;;  %v729_v16 = vrot.slane %v727_v6, 4  ;;  %v694_v18 = vshrl.u32 %v286_v48, 16 }
  0x66   : > { %2820 = vrot.lane.b32.xlu0 %v6995_v8, %s8788_s9  ;;  %v720_v20 = vor.u32 %v719_v10, %v715_v4  ;;  %v735_v1 = vrot.slane %v733_v11, 5  ;;  %v697_v12 = vshll.u32 %v286_v48, 16  ;;  %v703_v21 = vshll.u32 %v287_v7, 16 }
  0x67   : > { %3142 = vrot.lane.b32.xlu1 %v7060_v57, %s8787_s8  ;;  %v730_v22 = vor.u32 %v729_v16, %v725_v14  ;;  %v696_v23 = vrot.slane %v694_v18, 4  ;;  %v707_v24 = vshrl.u32 %v287_v7, 16  ;;  %v2083_v25 = vrot.slane %v9093_v46, 5  ;;  %v295_v46 = vld [vmem:[%s8877_s7 + $0x9c] sm:$0x1] }
  0x68   : > { %v721_v27 = vrot.slane %v720_v20, 4  ;;  %v699_v29 = vrot.slane %v697_v12, 5  ;;  %v705_v2 = vrot.slane %v703_v21, 5  ;;  %v2086_v30 = vrot.slane %v289_v54, 5 }
  0x69   : > { %v731_v31 = vrot.slane %v730_v22, 4  ;;  %v709_v26 = vrot.slane %v707_v24, 4  ;;  %v2085_v32 = vrot.slane %v2083_v25, 4  ;;  %v2089_v33 = vrot.slane %v290_v58, 5 }
  0x6a   : > { %3140 = vrot.lane.b32.xlu0 %v7059_v13, %s8787_s8  ;;  %v726_v36 = vsel %vm8920_vm5, %v721_v27, %v725_v14  ;;  %v700_v37 = vor.u32 %v699_v29, %v696_v23  ;;  %v2088_v38 = vrot.slane %v2086_v30, 4  ;;  %v6895_v34 = vrot.slane %v286_v48, 9 }
  0x6b   : > { %v736_v17 = vsel %vm8920_vm5, %v731_v31, %v735_v1  ;;  %v710_v39 = vor.u32 %v709_v26, %v705_v2  ;;  %v2087_v41 = vsel %vm8879_vm2, %v2085_v32, %v2086_v30  ;;  %v2080_v42 = vrot.slane %v287_v7, 5 }
  0x6c   : > { %v6998_v44 = vcombine.low %v726_v36, %v736_v17  ;;  %v701_v15 = vrot.slane %v700_v37, 4  ;;  %v2090_v45 = vsel %vm8879_vm2, %v2088_v38, %v2089_v33  ;;  %v757_v28 = vshll.u32 %v9124_v35, 16 }
  0x6d   : > { %v711_v47 = vrot.slane %v710_v39, 4  ;;  %v7062_v49 = vcombine.low %v2087_v41, %v2090_v45  ;;  %v2081_v19 = vsel %vm8879_vm2, %v6895_v34, %v2080_v42  ;;  %v2082_v50 = vrot.slane %v2080_v42, 4  ;;  %v300_v34 = vld [vmem:[%s8877_s7 + $0xb0] sm:$0x1] }
  0x6e   : > { %2826 = vrot.lane.b32.xlu1 %v6998_v44, %s8788_s9  ;;  %v706_v51 = vsel %vm8920_vm5, %v701_v15, %v705_v2  ;;  %v9143_v52 = vrot.slane %v757_v28, 5  ;;  %v761_v53 = vshrl.u32 %v9124_v35, 16  ;;  %v767_v54 = vshll.u32 %v294_v43, 16  ;;  %v296_v44 = vld [vmem:[%s8877_s7 + $0xa0] sm:$0xf] }
  0x6f   : > { %v716_v56 = vsel %vm8920_vm5, %v711_v47, %v715_v4  ;;  %v2084_v57 = vsel %vm8879_vm2, %v2082_v50, %v2083_v25  ;;  %v771_v58 = vshrl.u32 %v294_v43, 16  ;;  %v777_v59 = vshll.u32 %v295_v46, 16  ;;  %v9157_v25 = vld [vmem:[%s8877_s7 + $0xa8] sm:$0xf]  ;;  %v297_v47 = vld [vmem:[%s8877_s7 + $0xa4] sm:$0xf] }
  0x70   : > { %v6997_v61 = vcombine.low %v706_v51, %v716_v56  ;;  %v7061_v62 = vcombine.low %v2081_v19, %v2084_v57  ;;  %v763_v63 = vrot.slane %v761_v53, 4  ;;  %v769_v48 = vrot.slane %v767_v54, 5 }
  0x71   : > { %v773_v3 = vrot.slane %v771_v58, 4  ;;  %v779_v5 = vrot.slane %v777_v59, 5  ;;  %v738_v6 = vshrl.u32 %v291_v55, 16  ;;  %v741_v7 = vshll.u32 %v291_v55, 16 }
  0x72   : > { %2824 = vrot.lane.b32.xlu0 %v6997_v61, %s8788_s9  ;;  %3146 = vrot.lane.b32.xlu1 %v7062_v49, %s8787_s8  ;;  %v764_v4 = vor.u32 %v763_v63, %v9143_v52  ;;  %v747_v8 = vshll.u32 %v292_v60, 16  ;;  %v751_v9 = vshrl.u32 %v292_v60, 16  ;;  %v2096_v10 = vrot.slane %v9124_v35, 5  ;;  %v299_v35 = vld [vmem:[%s8877_s7 + $0xac] sm:$0xf] }
  0x73   : > { %v774_v11 = vor.u32 %v773_v3, %v769_v48  ;;  %v740_v13 = vrot.slane %v738_v6, 4  ;;  %v743_v14 = vrot.slane %v741_v7, 5  ;;  %v2099_v16 = vrot.slane %v294_v43, 5 }
  0x74   : > { %v765_v18 = vrot.slane %v764_v4, 4  ;;  %v749_v20 = vrot.slane %v747_v8, 5  ;;  %v753_v1 = vrot.slane %v751_v9, 4  ;;  %v2098_v12 = vrot.slane %v2096_v10, 4 }
  0x75   : > { %v775_v21 = vrot.slane %v774_v11, 4  ;;  %v744_v22 = vor.u32 %v743_v14, %v740_v13  ;;  %v2101_v23 = vrot.slane %v2099_v16, 4  ;;  %v2102_v24 = vrot.slane %v295_v46, 5 }
  0x76   : > { %3144 = vrot.lane.b32.xlu0 %v7061_v62, %s8787_s8  ;;  %v770_v27 = vsel %vm8920_vm5, %v765_v18, %v769_v48  ;;  %v754_v29 = vor.u32 %v753_v1, %v749_v20  ;;  %v2100_v2 = vsel %vm8879_vm2, %v2098_v12, %v2099_v16  ;;  %v6896_v30 = vrot.slane %v291_v55, 9 }
  0x77   : > { %v780_v31 = vsel %vm8920_vm5, %v775_v21, %v779_v5  ;;  %v745_v26 = vrot.slane %v744_v22, 4  ;;  %v2103_v32 = vsel %vm8879_vm2, %v2101_v23, %v2102_v24  ;;  %v2093_v33 = vrot.slane %v292_v60, 5  ;;  %v304_v21 = vld [vmem:[%s8877_s7 + $0xc0] sm:$0xf] }
  0x78   : > { %v7000_v36 = vcombine.low %v770_v27, %v780_v31  ;;  %v755_v37 = vrot.slane %v754_v29, 4  ;;  %v7064_v38 = vcombine.low %v2100_v2, %v2103_v32  ;;  %v801_v17 = vshll.u32 %v9157_v25, 16 }
  0x79   : > { %v750_v39 = vsel %vm8920_vm5, %v745_v26, %v749_v20  ;;  %v2094_v41 = vsel %vm8879_vm2, %v6896_v30, %v2093_v33  ;;  %v2095_v42 = vrot.slane %v2093_v33, 4  ;;  %v805_v43 = vshrl.u32 %v9157_v25, 16 }
  0x7a   : > { %2830 = vrot.lane.b32.xlu1 %v7000_v36, %s8788_s9  ;;  %v760_v15 = vsel %vm8920_vm5, %v755_v37, %v9143_v52  ;;  %v803_v45 = vrot.slane %v801_v17, 5  ;;  %v811_v46 = vshll.u32 %v299_v35, 16  ;;  %v815_v28 = vshrl.u32 %v299_v35, 16  ;;  %v301_v36 = vld [vmem:[%s8877_s7 + $0xb4] sm:$0xf] }
  0x7b   : > { %v6999_v49 = vcombine.low %v750_v39, %v760_v15  ;;  %v2097_v19 = vsel %vm8879_vm2, %v2095_v42, %v2096_v10  ;;  %v807_v50 = vrot.slane %v805_v43, 4  ;;  %v821_v51 = vshll.u32 %v300_v34, 16  ;;  %v9188_v10 = vld [vmem:[%s8877_s7 + $0xbc] sm:$0xf]  ;;  %v302_v39 = vld [vmem:[%s8877_s7 + $0xb8] sm:$0xf] }
  0x7c   : > { %v7063_v53 = vcombine.low %v2094_v41, %v2097_v19  ;;  %v813_v54 = vrot.slane %v811_v46, 5  ;;  %v817_v55 = vrot.slane %v815_v28, 4  ;;  %v782_v56 = vshrl.u32 %v296_v44, 16 }
  0x7d   : > { %2828 = vrot.lane.b32.xlu0 %v6999_v49, %s8788_s9  ;;  %v808_v57 = vor.u32 %v807_v50, %v803_v45  ;;  %v823_v58 = vrot.slane %v821_v51, 5  ;;  %v785_v52 = vshll.u32 %v296_v44, 16  ;;  %v791_v59 = vshll.u32 %v297_v47, 16 }
  0x7e   : > { %3150 = vrot.lane.b32.xlu1 %v7064_v38, %s8787_s8  ;;  %v818_v60 = vor.u32 %v817_v55, %v813_v54  ;;  %v784_v61 = vrot.slane %v782_v56, 4  ;;  %v795_v62 = vshrl.u32 %v297_v47, 16  ;;  %v2109_v63 = vrot.slane %v9157_v25, 5  ;;  %v305_v25 = vld [vmem:[%s8877_s7 + $0xc4] sm:$0x1] }
  0x7f   : > { %v809_v48 = vrot.slane %v808_v57, 4  ;;  %v787_v3 = vrot.slane %v785_v52, 5  ;;  %v793_v5 = vrot.slane %v791_v59, 5  ;;  %v2112_v6 = vrot.slane %v299_v35, 5 }
  0x80   : > { %v819_v7 = vrot.slane %v818_v60, 4  ;;  %v797_v4 = vrot.slane %v795_v62, 4  ;;  %v2111_v8 = vrot.slane %v2109_v63, 4  ;;  %v2115_v9 = vrot.slane %v300_v34, 5 }
  0x81   : > { %3148 = vrot.lane.b32.xlu0 %v7063_v53, %s8787_s8  ;;  %v814_v11 = vsel %vm8920_vm5, %v809_v48, %v813_v54  ;;  %v788_v13 = vor.u32 %v787_v3, %v784_v61  ;;  %v2114_v14 = vrot.slane %v2112_v6, 4  ;;  %v6897_v16 = vrot.slane %v296_v44, 9 }
  0x82   : > { %v824_v18 = vsel %vm8920_vm5, %v819_v7, %v823_v58  ;;  %v798_v20 = vor.u32 %v797_v4, %v793_v5  ;;  %v2113_v1 = vsel %vm8879_vm2, %v2111_v8, %v2112_v6  ;;  %v2106_v12 = vrot.slane %v297_v47, 5 }
  0x83   : > { %v7002_v22 = vcombine.low %v814_v11, %v824_v18  ;;  %v789_v23 = vrot.slane %v788_v13, 4  ;;  %v2116_v24 = vsel %vm8879_vm2, %v2114_v14, %v2115_v9  ;;  %v845_v27 = vshll.u32 %v9188_v10, 16 }
  0x84   : > { %v799_v29 = vrot.slane %v798_v20, 4  ;;  %v7066_v2 = vcombine.low %v2113_v1, %v2116_v24  ;;  %v2107_v30 = vsel %vm8879_vm2, %v6897_v16, %v2106_v12  ;;  %v2108_v31 = vrot.slane %v2106_v12, 4  ;;  %v310_v16 = vld [vmem:[%s8877_s7 + $0xd8] sm:$0x1] }
  0x85   : > { %2834 = vrot.lane.b32.xlu1 %v7002_v22, %s8788_s9  ;;  %v794_v26 = vsel %vm8920_vm5, %v789_v23, %v793_v5  ;;  %v9207_v32 = vrot.slane %v845_v27, 5  ;;  %v849_v33 = vshrl.u32 %v9188_v10, 16  ;;  %v855_v35 = vshll.u32 %v304_v21, 16  ;;  %v306_v22 = vld [vmem:[%s8877_s7 + $0xc8] sm:$0xf] }
  0x86   : > { %v804_v37 = vsel %vm8920_vm5, %v799_v29, %v803_v45  ;;  %v2110_v38 = vsel %vm8879_vm2, %v2108_v31, %v2109_v63  ;;  %v859_v34 = vshrl.u32 %v304_v21, 16  ;;  %v865_v17 = vshll.u32 %v305_v25, 16  ;;  %v9221_v63 = vld [vmem:[%s8877_s7 + $0xd0] sm:$0xf]  ;;  %v307_v29 = vld [vmem:[%s8877_s7 + $0xcc] sm:$0xf] }
  0x87   : > { %v7001_v41 = vcombine.low %v794_v26, %v804_v37  ;;  %v7065_v42 = vcombine.low %v2107_v30, %v2110_v38  ;;  %v851_v43 = vrot.slane %v849_v33, 4  ;;  %v857_v44 = vrot.slane %v855_v35, 5 }
  0x88   : > { %v861_v15 = vrot.slane %v859_v34, 4  ;;  %v867_v46 = vrot.slane %v865_v17, 5  ;;  %v826_v28 = vshrl.u32 %v301_v36, 16  ;;  %v829_v47 = vshll.u32 %v301_v36, 16 }
  0x89   : > { %2832 = vrot.lane.b32.xlu0 %v7001_v41, %s8788_s9  ;;  %3154 = vrot.lane.b32.xlu1 %v7066_v2, %s8787_s8  ;;  %v852_v45 = vor.u32 %v851_v43, %v9207_v32  ;;  %v835_v49 = vshll.u32 %v302_v39, 16  ;;  %v839_v19 = vshrl.u32 %v302_v39, 16  ;;  %v2122_v50 = vrot.slane %v9188_v10, 5  ;;  %v309_v10 = vld [vmem:[%s8877_s7 + $0xd4] sm:$0xf] }
  0x8a   : > { %v862_v51 = vor.u32 %v861_v15, %v857_v44  ;;  %v828_v53 = vrot.slane %v826_v28, 4  ;;  %v831_v54 = vrot.slane %v829_v47, 5  ;;  %v2125_v55 = vrot.slane %v304_v21, 5 }
  0x8b   : > { %v853_v56 = vrot.slane %v852_v45, 4  ;;  %v837_v57 = vrot.slane %v835_v49, 5  ;;  %v841_v58 = vrot.slane %v839_v19, 4  ;;  %v2124_v52 = vrot.slane %v2122_v50, 4 }
  0x8c   : > { %v863_v59 = vrot.slane %v862_v51, 4  ;;  %v832_v60 = vor.u32 %v831_v54, %v828_v53  ;;  %v2127_v61 = vrot.slane %v2125_v55, 4  ;;  %v2128_v62 = vrot.slane %v305_v25, 5 }
  0x8d   : > { %3152 = vrot.lane.b32.xlu0 %v7065_v42, %s8787_s8  ;;  %v858_v48 = vsel %vm8920_vm5, %v853_v56, %v857_v44  ;;  %v842_v3 = vor.u32 %v841_v58, %v837_v57  ;;  %v2126_v5 = vsel %vm8879_vm2, %v2124_v52, %v2125_v55  ;;  %v6898_v6 = vrot.slane %v301_v36, 9 }
  0x8e   : > { %v868_v7 = vsel %vm8920_vm5, %v863_v59, %v867_v46  ;;  %v833_v4 = vrot.slane %v832_v60, 4  ;;  %v2129_v8 = vsel %vm8879_vm2, %v2127_v61, %v2128_v62  ;;  %v2119_v9 = vrot.slane %v302_v39, 5  ;;  %v314_v59 = vld [vmem:[%s8877_s7 + $0xe8] sm:$0xf] }
  0x8f   : > { %v7004_v11 = vcombine.low %v858_v48, %v868_v7  ;;  %v843_v13 = vrot.slane %v842_v3, 4  ;;  %v7068_v14 = vcombine.low %v2126_v5, %v2129_v8  ;;  %v889_v18 = vshll.u32 %v9221_v63, 16 }
  0x90   : > { %v838_v20 = vsel %vm8920_vm5, %v833_v4, %v837_v57  ;;  %v2120_v1 = vsel %vm8879_vm2, %v6898_v6, %v2119_v9  ;;  %v2121_v12 = vrot.slane %v2119_v9, 4  ;;  %v893_v21 = vshrl.u32 %v9221_v63, 16 }
  0x91   : > { %2838 = vrot.lane.b32.xlu1 %v7004_v11, %s8788_s9  ;;  %v848_v23 = vsel %vm8920_vm5, %v843_v13, %v9207_v32  ;;  %v891_v24 = vrot.slane %v889_v18, 5  ;;  %v899_v25 = vshll.u32 %v309_v10, 16  ;;  %v903_v27 = vshrl.u32 %v309_v10, 16  ;;  %v311_v11 = vld [vmem:[%s8877_s7 + $0xdc] sm:$0xf] }
  0x92   : > { %v7003_v2 = vcombine.low %v838_v20, %v848_v23  ;;  %v2123_v30 = vsel %vm8879_vm2, %v2121_v12, %v2122_v50  ;;  %v895_v31 = vrot.slane %v893_v21, 4  ;;  %v909_v26 = vshll.u32 %v310_v16, 16  ;;  %v9252_v50 = vld [vmem:[%s8877_s7 + $0xe4] sm:$0xf]  ;;  %v312_v20 = vld [vmem:[%s8877_s7 + $0xe0] sm:$0xf] }
  0x93   : > { %v7067_v33 = vcombine.low %v2120_v1, %v2123_v30  ;;  %v901_v35 = vrot.slane %v899_v25, 5  ;;  %v905_v36 = vrot.slane %v903_v27, 4  ;;  %v870_v37 = vshrl.u32 %v306_v22, 16 }
  0x94   : > { %2836 = vrot.lane.b32.xlu0 %v7003_v2, %s8788_s9  ;;  %v896_v38 = vor.u32 %v895_v31, %v891_v24  ;;  %v911_v34 = vrot.slane %v909_v26, 5  ;;  %v873_v32 = vshll.u32 %v306_v22, 16  ;;  %v879_v17 = vshll.u32 %v307_v29, 16 }
  0x95   : > { %3158 = vrot.lane.b32.xlu1 %v7068_v14, %s8787_s8  ;;  %v906_v39 = vor.u32 %v905_v36, %v901_v35  ;;  %v872_v41 = vrot.slane %v870_v37, 4  ;;  %v883_v42 = vshrl.u32 %v307_v29, 16  ;;  %v2135_v43 = vrot.slane %v9221_v63, 5  ;;  %v315_v63 = vld [vmem:[%s8877_s7 + $0xec] sm:$0x1] }
  0x96   : > { %v897_v44 = vrot.slane %v896_v38, 4  ;;  %v875_v15 = vrot.slane %v873_v32, 5  ;;  %v881_v46 = vrot.slane %v879_v17, 5  ;;  %v2138_v28 = vrot.slane %v309_v10, 5 }
  0x97   : > { %v907_v47 = vrot.slane %v906_v39, 4  ;;  %v885_v45 = vrot.slane %v883_v42, 4  ;;  %v2137_v49 = vrot.slane %v2135_v43, 4  ;;  %v2141_v19 = vrot.slane %v310_v16, 5 }
  0x98   : > { %3156 = vrot.lane.b32.xlu0 %v7067_v33, %s8787_s8  ;;  %v902_v51 = vsel %vm8920_vm5, %v897_v44, %v901_v35  ;;  %v876_v53 = vor.u32 %v875_v15, %v872_v41  ;;  %v2140_v54 = vrot.slane %v2138_v28, 4  ;;  %v6899_v55 = vrot.slane %v306_v22, 9 }
  0x99   : > { %v912_v56 = vsel %vm8920_vm5, %v907_v47, %v911_v34  ;;  %v886_v57 = vor.u32 %v885_v45, %v881_v46  ;;  %v2139_v58 = vsel %vm8879_vm2, %v2137_v49, %v2138_v28  ;;  %v2132_v52 = vrot.slane %v307_v29, 5 }
  0x9a   : > { %v7006_v60 = vcombine.low %v902_v51, %v912_v56  ;;  %v877_v61 = vrot.slane %v876_v53, 4  ;;  %v2142_v62 = vsel %vm8879_vm2, %v2140_v54, %v2141_v19  ;;  %v933_v48 = vshll.u32 %v9252_v50, 16 }
  0x9b   : > { %v887_v3 = vrot.slane %v886_v57, 4  ;;  %v7070_v5 = vcombine.low %v2139_v58, %v2142_v62  ;;  %v2133_v6 = vsel %vm8879_vm2, %v6899_v55, %v2132_v52  ;;  %v2134_v7 = vrot.slane %v2132_v52, 4  ;;  %v320_v55 = vld [vmem:[%s8877_s7 + $0x100] sm:$0x1]  ;;  %v9299_v57 = vpop.permute.xlu1 %3124  ;;  %v9307_v62 = vpop.permute.xlu0 %3120 }
  0x9c   : > { %2842 = vrot.lane.b32.xlu1 %v7006_v60, %s8788_s9  ;;  %v882_v4 = vsel %vm8920_vm5, %v877_v61, %v881_v46  ;;  %v9271_v8 = vrot.slane %v933_v48, 5  ;;  %v937_v9 = vshrl.u32 %v9252_v50, 16  ;;  %v943_v10 = vshll.u32 %v314_v59, 16  ;;  %v316_v61 = vld [vmem:[%s8877_s7 + $0xf0] sm:$0xf] }
  0x9d   : > { %v892_v13 = vsel %vm8920_vm5, %v887_v3, %v891_v24  ;;  %v2136_v14 = vsel %vm8879_vm2, %v2134_v7, %v2135_v43  ;;  %v947_v16 = vshrl.u32 %v314_v59, 16  ;;  %v953_v18 = vshll.u32 %v315_v63, 16  ;;  %v9285_v43 = vld [vmem:[%s8877_s7 + $0xf8] sm:$0xf] }
  0x9e   : > { %v7005_v1 = vcombine.low %v882_v4, %v892_v13  ;;  %v7069_v12 = vcombine.low %v2133_v6, %v2136_v14  ;;  %v939_v21 = vrot.slane %v937_v9, 4  ;;  %v945_v22 = vrot.slane %v943_v10, 5  ;;  %v317_v6 = vld [vmem:[%s8877_s7 + $0xf4] sm:$0xf] }
  0x9f   : > { %v949_v23 = vrot.slane %v947_v16, 4  ;;  %v955_v25 = vrot.slane %v953_v18, 5  ;;  %v914_v27 = vshrl.u32 %v311_v11, 16  ;;  %v917_v29 = vshll.u32 %v311_v11, 16 }
  0xa0   : > { %2840 = vrot.lane.b32.xlu0 %v7005_v1, %s8788_s9  ;;  %3162 = vrot.lane.b32.xlu1 %v7070_v5, %s8787_s8  ;;  %v940_v24 = vor.u32 %v939_v21, %v9271_v8  ;;  %v923_v2 = vshll.u32 %v312_v20, 16  ;;  %v927_v30 = vshrl.u32 %v312_v20, 16  ;;  %v2148_v31 = vrot.slane %v9252_v50, 5  ;;  %v319_v50 = vld [vmem:[%s8877_s7 + $0xfc] sm:$0xf] }
  0xa1   : > { %v950_v26 = vor.u32 %v949_v23, %v945_v22  ;;  %v916_v33 = vrot.slane %v914_v27, 4  ;;  %v919_v35 = vrot.slane %v917_v29, 5  ;;  %v2151_v36 = vrot.slane %v314_v59, 5 }
  0xa2   : > { %v941_v37 = vrot.slane %v940_v24, 4  ;;  %v925_v38 = vrot.slane %v923_v2, 5  ;;  %v929_v34 = vrot.slane %v927_v30, 4  ;;  %v2150_v32 = vrot.slane %v2148_v31, 4 }
  0xa3   : > { %v951_v17 = vrot.slane %v950_v26, 4  ;;  %v920_v39 = vor.u32 %v919_v35, %v916_v33  ;;  %v2153_v41 = vrot.slane %v2151_v36, 4  ;;  %v2154_v42 = vrot.slane %v315_v63, 5  ;;  %v9324_v30 = vpop.permute.xlu0 %2800 }
  0xa4   : > { %3160 = vrot.lane.b32.xlu0 %v7069_v12, %s8787_s8  ;;  %v946_v44 = vsel %vm8920_vm5, %v941_v37, %v945_v22  ;;  %v930_v15 = vor.u32 %v929_v34, %v925_v38  ;;  %v2152_v46 = vsel %vm8879_vm2, %v2150_v32, %v2151_v36  ;;  %v6900_v28 = vrot.slane %v311_v11, 9  ;;  %v9327_v36 = vld [vmem:[%s8877_s7 + $0x10c] sm:$0xf] }
  0xa5   : > { %v956_v47 = vsel %vm8920_vm5, %v951_v17, %v955_v25  ;;  %v921_v45 = vrot.slane %v920_v39, 4  ;;  %v2155_v49 = vsel %vm8879_vm2, %v2153_v41, %v2154_v42  ;;  %v2145_v19 = vrot.slane %v312_v20, 5  ;;  %v9322_v25 = vpop.permute.xlu1 %2802 }
  0xa6   : > { %v7008_v51 = vcombine.low %v946_v44, %v956_v47  ;;  %v931_v53 = vrot.slane %v930_v15, 4  ;;  %v7072_v54 = vcombine.low %v2152_v46, %v2155_v49  ;;  %v977_v56 = vshll.u32 %v9285_v43, 16 }
  0xa7   : > { %v926_v58 = vsel %vm8920_vm5, %v921_v45, %v925_v38  ;;  %v2146_v52 = vsel %vm8879_vm2, %v6900_v28, %v2145_v19  ;;  %v2147_v59 = vrot.slane %v2145_v19, 4  ;;  %v981_v60 = vshrl.u32 %v9285_v43, 16  ;;  %v325_v28 = vld [vmem:[%s8877_s7 + $0x114] sm:$0x1] }
  0xa8   : > { %2846 = vrot.lane.b32.xlu1 %v7008_v51, %s8788_s9  ;;  %v936_v63 = vsel %vm8920_vm5, %v931_v53, %v9271_v8  ;;  %v9313_v48 = vrot.slane %v977_v56, 5  ;;  %v987_v3 = vshll.u32 %v319_v50, 16  ;;  %v991_v5 = vshrl.u32 %v319_v50, 16 }
  0xa9   : > { %v7007_v7 = vcombine.low %v926_v58, %v936_v63  ;;  %v2149_v4 = vsel %vm8879_vm2, %v2147_v59, %v2148_v31  ;;  %v983_v9 = vrot.slane %v981_v60, 4  ;;  %v997_v10 = vshll.u32 %v320_v55, 16  ;;  %v9343_v51 = vpop.permute.xlu1 %2806  ;;  %v321_v58 = vld [vmem:[%s8877_s7 + $0x104] sm:$0xf] }
  0xaa   : > { %v7071_v11 = vcombine.low %v2146_v52, %v2149_v4  ;;  %v989_v13 = vrot.slane %v987_v3, 5  ;;  %v993_v14 = vrot.slane %v991_v5, 4  ;;  %v958_v16 = vshrl.u32 %v316_v61, 16  ;;  %v322_v3 = vld [vmem:[%s8877_s7 + $0x108] sm:$0xf] }
  0xab   : > { %2844 = vrot.lane.b32.xlu0 %v7007_v7, %s8788_s9  ;;  %v984_v18 = vor.u32 %v983_v9, %v9313_v48  ;;  %v999_v8 = vrot.slane %v997_v10, 5  ;;  %v961_v20 = vshll.u32 %v316_v61, 16  ;;  %v967_v1 = vshll.u32 %v317_v6, 16  ;;  %v9352_v52 = vpop.permute.xlu0 %2804 }
  0xac   : > { %3166 = vrot.lane.b32.xlu1 %v7072_v54, %s8787_s8  ;;  %v994_v12 = vor.u32 %v993_v14, %v989_v13  ;;  %v960_v21 = vrot.slane %v958_v16, 4  ;;  %v971_v22 = vshrl.u32 %v317_v6, 16  ;;  %v2161_v23 = vrot.slane %v9285_v43, 5  ;;  %v324_v43 = vld [vmem:[%s8877_s7 + $0x110] sm:$0xf] }
  0xad   : > { %v985_v27 = vrot.slane %v984_v18, 4  ;;  %v963_v29 = vrot.slane %v961_v20, 5  ;;  %v969_v24 = vrot.slane %v967_v1, 5  ;;  %v2164_v2 = vrot.slane %v319_v50, 5 }
  0xae   : > { %v995_v31 = vrot.slane %v994_v12, 4  ;;  %v973_v26 = vrot.slane %v971_v22, 4  ;;  %v2163_v33 = vrot.slane %v2161_v23, 4  ;;  %v2167_v35 = vrot.slane %v320_v55, 5 }
  0xaf   : > { %3164 = vrot.lane.b32.xlu0 %v7071_v11, %s8787_s8  ;;  %v990_v37 = vsel %vm8920_vm5, %v985_v27, %v989_v13  ;;  %v964_v38 = vor.u32 %v963_v29, %v960_v21  ;;  %v2166_v34 = vrot.slane %v2164_v2, 4  ;;  %v6901_v32 = vrot.slane %v316_v61, 9  ;;  %v9364_v21 = vpop.permute.xlu1 %3126 }
  0xb0   : > { %v1000_v17 = vsel %vm8920_vm5, %v995_v31, %v999_v8  ;;  %v974_v39 = vor.u32 %v973_v26, %v969_v24  ;;  %v2165_v41 = vsel %vm8879_vm2, %v2163_v33, %v2164_v2  ;;  %v2158_v42 = vrot.slane %v317_v6, 5 }
  0xb1   : > { %v7010_v44 = vcombine.low %v990_v37, %v1000_v17  ;;  %v965_v15 = vrot.slane %v964_v38, 4  ;;  %v2168_v46 = vsel %vm8879_vm2, %v2166_v34, %v2167_v35  ;;  %v1021_v47 = vshll.u32 %v9327_v36, 16  ;;  %v9369_v35 = vld [vmem:[%s8877_s7 + $0x120] sm:$0xf] }
  0xb2   : > { %v975_v45 = vrot.slane %v974_v39, 4  ;;  %v7074_v49 = vcombine.low %v2165_v41, %v2168_v46  ;;  %v2159_v19 = vsel %vm8879_vm2, %v6901_v32, %v2158_v42  ;;  %v2160_v50 = vrot.slane %v2158_v42, 4  ;;  %v329_v42 = vld [vmem:[%s8877_s7 + $0x124] sm:$0xf]  ;;  %v330_v46 = vld [vmem:[%s8877_s7 + $0x128] sm:$0x1] }
  0xb3   : > { %2850 = vrot.lane.b32.xlu1 %v7010_v44, %s8788_s9  ;;  %v970_v53 = vsel %vm8920_vm5, %v965_v15, %v969_v24  ;;  %v9348_v54 = vrot.slane %v1021_v47, 5  ;;  %v1025_v55 = vshrl.u32 %v9327_v36, 16  ;;  %v1031_v56 = vshll.u32 %v324_v43, 16  ;;  %v9366_v24 = vpop.permute.xlu0 %3122 }
  0xb4   : > { %v980_v59 = vsel %vm8920_vm5, %v975_v45, %v9313_v48  ;;  %v2162_v60 = vsel %vm8879_vm2, %v2160_v50, %v2161_v23  ;;  %v1035_v61 = vshrl.u32 %v324_v43, 16  ;;  %v1041_v63 = vshll.u32 %v325_v28, 16  ;;  %v326_v50 = vld [vmem:[%s8877_s7 + $0x118] sm:$0xf] }
  0xb5   : > { %v7009_v5 = vcombine.low %v970_v53, %v980_v59  ;;  %v7073_v6 = vcombine.low %v2159_v19, %v2162_v60  ;;  %v1027_v7 = vrot.slane %v1025_v55, 4  ;;  %v1033_v4 = vrot.slane %v1031_v56, 5  ;;  %v9389_v53 = vpop.permute.xlu1 %2810  ;;  %v327_v60 = vld [vmem:[%s8877_s7 + $0x11c] sm:$0xf] }
  0xb6   : > { %v1037_v9 = vrot.slane %v1035_v61, 4  ;;  %v1043_v10 = vrot.slane %v1041_v63, 5  ;;  %v1002_v11 = vshrl.u32 %v321_v58, 16  ;;  %v1005_v13 = vshll.u32 %v321_v58, 16 }
  0xb7   : > { %2848 = vrot.lane.b32.xlu0 %v7009_v5, %s8788_s9  ;;  %3170 = vrot.lane.b32.xlu1 %v7074_v49, %s8787_s8  ;;  %v1028_v48 = vor.u32 %v1027_v7, %v9348_v54  ;;  %v1011_v14 = vshll.u32 %v322_v3, 16  ;;  %v1015_v16 = vshrl.u32 %v322_v3, 16  ;;  %v2174_v18 = vrot.slane %v9327_v36, 5  ;;  %v9398_v61 = vpop.permute.xlu0 %2808 }
  0xb8   : > { %v1038_v8 = vor.u32 %v1037_v9, %v1033_v4  ;;  %v1004_v20 = vrot.slane %v1002_v11, 4  ;;  %v1007_v1 = vrot.slane %v1005_v13, 5  ;;  %v2177_v12 = vrot.slane %v324_v43, 5 }
  0xb9   : > { %v1029_v22 = vrot.slane %v1028_v48, 4  ;;  %v1013_v23 = vrot.slane %v1011_v14, 5  ;;  %v1017_v27 = vrot.slane %v1015_v16, 4  ;;  %v2176_v29 = vrot.slane %v2174_v18, 4 }
  0xba   : > { %v1039_v2 = vrot.slane %v1038_v8, 4  ;;  %v1008_v31 = vor.u32 %v1007_v1, %v1004_v20  ;;  %v2179_v26 = vrot.slane %v2177_v12, 4  ;;  %v2180_v33 = vrot.slane %v325_v28, 5 }
  0xbb   : > { %3168 = vrot.lane.b32.xlu0 %v7073_v6, %s8787_s8  ;;  %v1034_v36 = vsel %vm8920_vm5, %v1029_v22, %v1033_v4  ;;  %v1018_v37 = vor.u32 %v1017_v27, %v1013_v23  ;;  %v2178_v38 = vsel %vm8879_vm2, %v2176_v29, %v2177_v12  ;;  %v6902_v34 = vrot.slane %v321_v58, 9 }
  0xbc   : > { %v1044_v32 = vsel %vm8920_vm5, %v1039_v2, %v1043_v10  ;;  %v1009_v17 = vrot.slane %v1008_v31, 4  ;;  %v2181_v39 = vsel %vm8879_vm2, %v2179_v26, %v2180_v33  ;;  %v2171_v41 = vrot.slane %v322_v3, 5  ;;  %v9408_v26 = vpop.permute.xlu0 %3128 }
  0xbd   : > { %v7012_v43 = vcombine.low %v1034_v36, %v1044_v32  ;;  %v1019_v44 = vrot.slane %v1018_v37, 4  ;;  %v7076_v15 = vcombine.low %v2178_v38, %v2181_v39  ;;  %v1065_v28 = vshll.u32 %v9369_v35, 16  ;;  %v9418_v39 = vld [vmem:[%s8877_s7 + $0x134] sm:$0xf] }
  0xbe   : > { %v1014_v47 = vsel %vm8920_vm5, %v1009_v17, %v1013_v23  ;;  %v2172_v45 = vsel %vm8879_vm2, %v6902_v34, %v2171_v41  ;;  %v2173_v49 = vrot.slane %v2171_v41, 4  ;;  %v1069_v19 = vshrl.u32 %v9369_v35, 16  ;;  %v9406_v23 = vpop.permute.xlu1 %3130 }
  0xbf   : > { %2854 = vrot.lane.b32.xlu1 %v7012_v43, %s8788_s9  ;;  %v1024_v55 = vsel %vm8920_vm5, %v1019_v44, %v9348_v54  ;;  %v9395_v56 = vrot.slane %v1065_v28, 5  ;;  %v1075_v58 = vshll.u32 %v329_v42, 16  ;;  %v1079_v59 = vshrl.u32 %v329_v42, 16  ;;  %v8585_v44 = vld [vmem:[%s8877_s7 + $0x8] sm:$0xf] }
  0xc0   : > { %v7011_v63 = vcombine.low %v1014_v47, %v1024_v55  ;;  %v2175_v3 = vsel %vm8879_vm2, %v2173_v49, %v2174_v18  ;;  %v1071_v5 = vrot.slane %v1069_v19, 4  ;;  %v1085_v6 = vshll.u32 %v330_v46, 16  ;;  %v8588_v55 = vld [vmem:[%s8877_s7 + $0x4] sm:$0xf] }
  0xc1   : > { %v7075_v7 = vcombine.low %v2172_v45, %v2175_v3  ;;  %v1077_v4 = vrot.slane %v1075_v58, 5  ;;  %v1081_v9 = vrot.slane %v1079_v59, 4  ;;  %v1046_v10 = vshrl.u32 %v326_v50, 16  ;;  %v9432_v59 = vld [vmem:[%s8877_s7 + $0x138] sm:$0xf] }
  0xc2   : > { %2852 = vrot.lane.b32.xlu0 %v7011_v63, %s8788_s9  ;;  %v1072_v54 = vor.u32 %v1071_v5, %v9395_v56  ;;  %v1087_v11 = vrot.slane %v1085_v6, 5  ;;  %v1049_v13 = vshll.u32 %v326_v50, 16  ;;  %v1055_v48 = vshll.u32 %v327_v60, 16  ;;  %v9438_v3 = vpop.permute.xlu1 %2814 }
  0xc3   : > { %3174 = vrot.lane.b32.xlu1 %v7076_v15, %s8787_s8  ;;  %v1082_v14 = vor.u32 %v1081_v9, %v1077_v4  ;;  %v1048_v16 = vrot.slane %v1046_v10, 4  ;;  %v1059_v8 = vshrl.u32 %v327_v60, 16  ;;  %v2187_v18 = vrot.slane %v9369_v35, 5  ;;  %v8586_v15 = vld [vmem:[%s8877_s7 + $0xc] sm:$0xf] }
  0xc4   : > { %v1073_v20 = vrot.slane %v1072_v54, 4  ;;  %v1051_v1 = vrot.slane %v1049_v13, 5  ;;  %v1057_v12 = vrot.slane %v1055_v48, 5  ;;  %v2190_v22 = vrot.slane %v329_v42, 5  ;;  %v9451_v9 = vld [vmem:[%s8877_s7 + $0x12c] sm:$0xf]  ;;  %v9456_v54 = vpop.permute.xlu0 %2812 }
  0xc5   : > { %v1083_v27 = vrot.slane %v1082_v14, 4  ;;  %v1061_v29 = vrot.slane %v1059_v8, 4  ;;  %v2189_v2 = vrot.slane %v2187_v18, 4  ;;  %v2193_v31 = vrot.slane %v330_v46, 5  ;;  %v9454_v10 = vld [vmem:[%s8877_s7 + $0x130] sm:$0xf] }
  0xc6   : > { %3172 = vrot.lane.b32.xlu0 %v7075_v7, %s8787_s8  ;;  %v1078_v33 = vsel %vm8920_vm5, %v1073_v20, %v1077_v4  ;;  %v1052_v35 = vor.u32 %v1051_v1, %v1048_v16  ;;  %v2192_v36 = vrot.slane %v2190_v22, 4  ;;  %v6903_v37 = vrot.slane %v326_v50, 9  ;;  %v8587_v50 = vld [vmem:[%s8877_s7] sm:$0xf] }
  0xc7   : > { %v1088_v38 = vsel %vm8920_vm5, %v1083_v27, %v1087_v11  ;;  %v1062_v34 = vor.u32 %v1061_v29, %v1057_v12  ;;  %v2191_v32 = vsel %vm8879_vm2, %v2189_v2, %v2190_v22  ;;  %v2184_v17 = vrot.slane %v327_v60, 5  ;;  %v9435_v60 = vld [vmem:[%s8877_s7 + $0x13c] sm:$0x1]  ;;  %v8519_v2 = vld [vmem:[%s12470_s1 + $0x14] ss:$0 sps:$4 sm:$0xff]  }
  0xc8   : > { %v7014_v41 = vcombine.low %v1078_v33, %v1088_v38  ;;  %v1053_v42 = vrot.slane %v1052_v35, 4  ;;  %v2194_v43 = vsel %vm8879_vm2, %v2192_v36, %v2193_v31  ;;  %v6922_v46 = vcombine.low %v8585_v44, %v8586_v15  ;;  %v9477_v38 = vpop.permute.xlu1 %3134  ;;  %v8589_v44 = vld [vmem:[%s8877_s7 + $0x1c] sm:$0xf]  ;;  %v8590_v15 = vld [vmem:[%s8877_s7 + $0x20] sm:$0xf]  ;;  %8449 = vmatprep.subr.msk.bf16.mxu1 %vm3813_vm9, %v8519_v2 }
  0xc9   : > { %v1063_v28 = vrot.slane %v1062_v34, 4  ;;  %v7078_v47 = vcombine.low %v2191_v32, %v2194_v43  ;;  %v2185_v45 = vsel %vm8879_vm2, %v6903_v37, %v2184_v17  ;;  %v2186_v49 = vrot.slane %v2184_v17, 4  ;;  %v9475_v37 = vld [vmem:[%s12470_s1 + $0x8] ss:$0 sps:$4 sm:$0xff]   ;;  %v9479_v17 = vpop.permute.xlu0 %3132 }
  0xca   : > { %2858 = vrot.lane.b32.xlu1 %v7014_v41, %s8788_s9  ;;  %v1058_v19 = vsel %vm8920_vm5, %v1053_v42, %v1057_v12  ;;  %v6921_v58 = vcombine.low %v8587_v50, %v8588_v55  ;;  %v1109_v63 = vshll.u32 %v9418_v39, 16  ;;  %v9447_v7 = vsel %vm3248_vm6, %v6922_v46, %v9322_v25  ;;  %8450 = vmatprep.subr.msk.bf16.mxu0 %vm3813_vm9, %v9475_v37 }
  0xcb   : > { %v1068_v5 = vsel %vm8920_vm5, %v1063_v28, %v9395_v56  ;;  %v2188_v6 = vsel %vm8879_vm2, %v2186_v49, %v2187_v18  ;;  %v1113_v4 = vshrl.u32 %v9418_v39, 16  ;;  %v1119_v16 = vshll.u32 %v9432_v59, 16  ;;  %v8592_v49 = vld [vmem:[%s8877_s7 + $0x18] sm:$0xf] }
  0xcc   : > { %v7013_v11 = vcombine.low %v1058_v19, %v1068_v5  ;;  %v7077_v13 = vcombine.low %v2185_v45, %v2188_v6  ;;  %v3251_v56 = vsel %vm3248_vm6, %v6921_v58, %v9324_v30  ;;  %v1111_v48 = vrot.slane %v1109_v63, 5  ;;  %v8591_v45 = vld [vmem:[%s8877_s7 + $0x14] sm:$0xf] }
  0xcd   : > { %v1115_v14 = vrot.slane %v1113_v4, 4  ;;  %v1123_v25 = vshrl.u32 %v9432_v59, 16  ;;  %v1129_v8 = vshll.u32 %v9435_v60, 16  ;;  %v1090_v18 = vshrl.u32 %v9451_v9, 16 }
  0xce   : > { %2856 = vrot.lane.b32.xlu0 %v7013_v11, %s8788_s9  ;;  %3178 = vrot.lane.b32.xlu1 %v7078_v47, %s8787_s8  ;;  %v1093_v20 = vshll.u32 %v9451_v9, 16  ;;  %v1099_v1 = vshll.u32 %v9454_v10, 16  ;;  %v1103_v30 = vshrl.u32 %v9454_v10, 16  ;;  %v1121_v22 = vrot.slane %v1119_v16, 5 }
  0xcf   : > { %v1116_v12 = vor.u32 %v1115_v14, %v1111_v48  ;;  %v1125_v27 = vrot.slane %v1123_v25, 4  ;;  %v1131_v29 = vrot.slane %v1129_v8, 5  ;;  %v1092_v31 = vrot.slane %v1090_v18, 4  ;;  %v9515_v25 = vld [vmem:[%s8877_s7 + $0x148] sm:$0xf]  ;;  %v9517_v8 = vpop.permute.xlu0 %2816 }
  0xd0   : > { %v1095_v33 = vrot.slane %v1093_v20, 5  ;;  %v1101_v35 = vrot.slane %v1099_v1, 5  ;;  %v1105_v36 = vrot.slane %v1103_v30, 4  ;;  %v3443_v43 = vsel %vm3441_vm7, %v3251_v56, %v9307_v62  ;;  %v9507_v56 = vpop.permute.xlu1 %2818  ;;  %v9530_v20 = vld [vmem:[%s8877_s7 + $0x14c] sm:$0xf] }
  0xd1   : > { %v1117_v34 = vrot.slane %v1116_v12, 4  ;;  %v1126_v32 = vor.u32 %v1125_v27, %v1121_v22  ;;  %v6924_v46 = vcombine.low %v8589_v44, %v8590_v15  ;;  %7929 = vmatprep.mubr.msk.bf16.mxu0 %vm3684_vm8, %v3443_v43  ;;  %v6923_v19 = vcombine.low %v8591_v45, %v8592_v49  ;;  %v9533_v1 = vld [vmem:[%s8877_s7 + $0x150] sm:$0x1]  ;;  %v9545_v27 = vld [vmem:[%s8877_s7 + $0x140] sm:$0xf] }
  0xd2   : > { %3176 = vrot.lane.b32.xlu0 %v7077_v13, %s8787_s8  ;;  %v1096_v41 = vor.u32 %v1095_v33, %v1092_v31  ;;  %v1106_v42 = vor.u32 %v1105_v36, %v1101_v35  ;;  %v2200_v62 = vrot.slane %v9418_v39, 5  ;;  %v2203_v6 = vrot.slane %v9432_v59, 5  ;;  %v8538_v15 = vld [vmem:[%s12470_s1 + $0x20] ss:$0 sps:$4 sm:$0xff]  }
  0xd3   : > { %v1122_v28 = vsel %vm8920_vm5, %v1117_v34, %v1121_v22  ;;  %v1127_v47 = vrot.slane %v1126_v32, 4  ;;  %v3260_v58 = vsel %vm3248_vm6, %v6924_v46, %v9343_v51  ;;  %v3257_v5 = vsel %vm3248_vm6, %v6923_v19, %v9352_v52  ;;  %v9578_v49 = vpop.permute.xlu0 %3136 }
  0xd4   : > { %v1097_v50 = vrot.slane %v1096_v41, 4  ;;  %v1107_v55 = vrot.slane %v1106_v42, 4  ;;  %v2206_v4 = vrot.slane %v9435_v60, 5  ;;  %v2202_v39 = vrot.slane %v2200_v62, 4  ;;  %v8521_v60 = vld [vmem:[%s12470_s1 + $0x18] sm:$0xff]   ;;  %v9571_v44 = vpop.permute.xlu1 %3138 }
  0xd5   : > { %v1132_v63 = vsel %vm8920_vm5, %v1127_v47, %v1131_v29  ;;  %v2205_v16 = vrot.slane %v2203_v6, 4  ;;  %v6904_v52 = vrot.slane %v9451_v9, 9  ;;  %v2197_v59 = vrot.slane %v9454_v10, 5 }
  0xd6   : > { %v7016_v11 = vcombine.low %v1122_v28, %v1132_v63  ;;  %v1102_v51 = vsel %vm8920_vm5, %v1097_v50, %v1101_v35  ;;  %v1112_v13 = vsel %vm8920_vm5, %v1107_v55, %v1111_v48  ;;  %v2204_v48 = vsel %vm8879_vm2, %v2202_v39, %v2203_v6  ;;  %v8595_v6 = vld [vmem:[%s8877_s7 + $0x34] sm:$0xf] }
  0xd7   : > { %v7015_v14 = vcombine.low %v1102_v51, %v1112_v13  ;;  %v3815_v18 = vsel %vm3813_vm9, %v8519_v2, 0  ;;  %v3447_v9 = vsel %vm3441_vm7, %v3257_v5, %v9299_v57  ;;  %v9527_v10 = vsel %vm3813_vm9, %v9475_v37, 0  ;;  %v8594_v5 = vld [vmem:[%s8877_s7 + $0x30] sm:$0xf]  ;;  %v8597_v51 = vld [vmem:[%s8877_s7 + $0x2c] sm:$0xf] }
  0xd8   : > { %2862 = vrot.lane.b32.xlu1 %v7016_v11, %s8788_s9  ;;  %v2207_v30 = vsel %vm8879_vm2, %v2205_v16, %v2206_v4  ;;  %v2198_v12 = vsel %vm8879_vm2, %v6904_v52, %v2197_v59  ;;  %v2199_v22 = vrot.slane %v2197_v59, 4  ;;  %7796 = vmatpush3.bf16.msra.mxu1 %v3815_v18  ;;  %v9542_v57 = vsel %vm3441_vm7, %v3260_v58, %v9364_v21  ;;  %v8593_v21 = vld [vmem:[%s12470_s1] sm:$0xff]   ;;  %v8596_v11 = vld [vmem:[%s8877_s7 + $0x28] sm:$0xf] }
  0xd9   : > { %2860 = vrot.lane.b32.xlu0 %v7015_v14, %s8788_s9  ;;  %v7080_v29 = vcombine.low %v2204_v48, %v2207_v30  ;;  %7797 = vmatprep.mubr.msk.bf16.mxu1 %vm3684_vm8, %v3447_v9  ;;  %v3445_v2 = vsel %vm3441_vm7, %v9447_v7, %v9366_v24  ;;  %v1153_v31 = vshll.u32 %v9515_v25, 16  ;;  %v1157_v33 = vshrl.u32 %v9515_v25, 16  ;;  %v9563_v24 = vld [vmem:[%s8877_s7 + $0x144] sm:$0xf] }
  0xda   : > { %7928 = vmatpush3.bf16.msra.mxu0 %v9527_v10  ;;  %v2201_v35 = vsel %vm8879_vm2, %v2199_v22, %v2200_v62  ;;  %8189 = vmatprep.subr.bf16.mxu1 %v8593_v21  ;;  %v1163_v36 = vshll.u32 %v9530_v20, 16  ;;  %v1167_v34 = vshrl.u32 %v9530_v20, 16  ;;  %v1173_v32 = vshll.u32 %v9533_v1, 16 }
  0xdb   : > { %8057 = vmatprep.subr.bf16.mxu0 %v8521_v60  ;;  %v7079_v7 = vcombine.low %v2198_v12, %v2201_v35  ;;  %v9566_v41 = vrot.slane %v1153_v31, 5  ;;  %v1159_v42 = vrot.slane %v1157_v33, 4  ;;  %v1134_v43 = vshrl.u32 %v9545_v27, 16  ;;  %7798 = vmatmul.mubr.msk.bf16.vlgmr.msra.gmra.mrb[0].mxu1 %vm3684_vm8, %v9542_v57  ;;  %v9601_v12 = vpop.permute.xlu1 %2822 }
  0xdc   : > { %3182 = vrot.lane.b32.xlu1 %v7080_v29, %s8787_s8  ;;  %v1165_v46 = vrot.slane %v1163_v36, 5  ;;  %v1169_v28 = vrot.slane %v1167_v34, 4  ;;  %v1175_v47 = vrot.slane %v1173_v32, 5  ;;  %v1137_v45 = vshll.u32 %v9545_v27, 16  ;;  %8191 = vmatpush3.bf16.msra.mxu1 %v8593_v21  ;;  %v9626_v34 = vld [vmem:[%s8877_s7 + $0x160] sm:$0xf] }
  0xdd   : > { %7930 = vmatmul.mubr.msk.bf16.vlgmr.msra.gmra.mrb[0].mxu0 %vm3684_vm8, %v3445_v2  ;;  %3180 = vrot.lane.b32.xlu0 %v7079_v7, %s8787_s8  ;;  %v1160_v19 = vor.u32 %v1159_v42, %v9566_v41  ;;  %v1136_v50 = vrot.slane %v1134_v43, 4  ;;  %v1143_v55 = vshll.u32 %v9563_v24, 16  ;;  %v1147_v58 = vshrl.u32 %v9563_v24, 16  ;;  %v9610_v2 = vpop.permute.xlu0 %2820  ;;  %v9642_v42 = vld [vmem:[%s8877_s7 + $0x154] sm:$0xf] }
  0xde   : > { %7933 = vmatprep.mubr.msk.bf16.mxu0 %vm3684_vm8, %v3447_v9  ;;  %v1170_v62 = vor.u32 %v1169_v28, %v1165_v46  ;;  %v1139_v63 = vrot.slane %v1137_v45, 5  ;;  %8058 = vmatpush3.bf16.msra.mxu0 %v8521_v60  ;;  %v6926_v4 = vcombine.low %v8594_v5, %v8595_v6  ;;  %v6925_v13 = vcombine.low %v8596_v11, %v8597_v51 }
  0xdf   : > { %8451 = vmatprep.subr.msk.bf16.mxu1 %vm3813_vm9, %v9475_v37  ;;  %v1161_v39 = vrot.slane %v1160_v19, 4  ;;  %v1145_v14 = vrot.slane %v1143_v55, 5  ;;  %v1149_v16 = vrot.slane %v1147_v58, 4  ;;  %v2213_v52 = vrot.slane %v9515_v25, 5  ;;  %8452 = vmatprep.subr.msk.bf16.mxu0 %vm3813_vm9, %v8538_v15  ;;  %v9657_v19 = vld [vmem:[%s8877_s7 + $0x158] sm:$0xf] }
  0xe0   : > { %v1171_v59 = vrot.slane %v1170_v62, 4  ;;  %v1140_v48 = vor.u32 %v1139_v63, %v1136_v50  ;;  %v3266_v60 = vsel %vm3248_vm6, %v6926_v4, %v9389_v53  ;;  %v3263_v18 = vsel %vm3248_vm6, %v6925_v13, %v9398_v61  ;;  %8192 = vmatpush3.bf16.msra.mxu1 %v9527_v10  ;;  %v9608_v10 = vld [vmem:[%s8877_s7 + $0x15c] sm:$0xf]  ;;  %v9659_v50 = vpop.permute.xlu1 %3142 }
  0xe1   : > { %v1166_v37 = vsel %vm8920_vm5, %v1161_v39, %v1165_v46  ;;  %v1150_v9 = vor.u32 %v1149_v16, %v1145_v14  ;;  %v2215_v30 = vrot.slane %v2213_v52, 4  ;;  %v2216_v25 = vrot.slane %v9530_v20, 5  ;;  %v9667_v5 = vpop.permute.xlu0 %3140 }
  0xe2   : > { %v1176_v22 = vsel %vm8920_vm5, %v1171_v59, %v1175_v47  ;;  %v1141_v29 = vrot.slane %v1140_v48, 4  ;;  %v2219_v53 = vrot.slane %v9533_v1, 5  ;;  %v6905_v61 = vrot.slane %v9545_v27, 9 }
  0xe3   : > { %v7018_v31 = vcombine.low %v1166_v37, %v1176_v22  ;;  %v1151_v33 = vrot.slane %v1150_v9, 4  ;;  %v2217_v20 = vsel %vm8879_vm2, %v2215_v30, %v2216_v25  ;;  %v2218_v35 = vrot.slane %v2216_v25, 4  ;;  %v8600_v25 = vld [vmem:[%s8877_s7 + $0x3c] sm:$0xf]  ;;  %v8601_v22 = vld [vmem:[%s8877_s7 + $0x40] sm:$0xf] }
  0xe4   : > { %v1146_v21 = vsel %vm8920_vm5, %v1141_v29, %v1145_v14  ;;  %v2210_v36 = vrot.slane %v9563_v24, 5  ;;  %v9619_v1 = vsel %vm3441_vm7, %v3266_v60, %v9406_v23  ;;  %v9623_v27 = vsel %vm3441_vm7, %v3263_v18, %v9408_v26  ;;  %v9637_v23 = vld [vmem:[%s8877_s7 + $0x164] sm:$0x1]  ;;  %v8599_v18 = vld [vmem:[%s8877_s7 + $0x48] sm:$0xf] }
  0xe5   : > { %7934 = vmatmul.mubr.msk.bf16.gmra.mrb[4].mxu0 %vm3684_vm8, %v9542_v57  ;;  %2866 = vrot.lane.b32.xlu1 %v7018_v31, %s8788_s9  ;;  %v1156_v32 = vsel %vm8920_vm5, %v1151_v33, %v9566_v41  ;;  %v2220_v24 = vsel %vm8879_vm2, %v2218_v35, %v2219_v53  ;;  %v1197_v26 = vshll.u32 %v9608_v10, 16  ;;  %v1201_v7 = vshrl.u32 %v9608_v10, 16  ;;  %v8598_v60 = vld [vmem:[%s8877_s7 + $0x44] sm:$0xf]  ;;  %v9685_v35 = vpop.permute.xlu1 %2826 }
  0xe6   : > { %7801 = vmatprep.mubr.msk.bf16.mxu1 %vm3684_vm8, %v9623_v27  ;;  %v7017_v57 = vcombine.low %v1146_v21, %v1156_v32  ;;  %v7082_v43 = vcombine.low %v2217_v20, %v2220_v24  ;;  %v2211_v41 = vsel %vm8879_vm2, %v6905_v61, %v2210_v36  ;;  %v2212_v15 = vrot.slane %v2210_v36, 4  ;;  %7937 = vmatprep.mubr.msk.bf16.mxu0 %vm3684_vm8, %v9623_v27  ;;  %v9690_v24 = vpop.permute.xlu0 %2824 }
  0xe7   : > { %7802 = vmatmul.mubr.msk.bf16.gmra.mrb[4].mxu1 %vm3684_vm8, %v9619_v1  ;;  %v9652_v46 = vrot.slane %v1197_v26, 5  ;;  %v1203_v28 = vrot.slane %v1201_v7, 4  ;;  %v1207_v47 = vshll.u32 %v9626_v34, 16  ;;  %v1211_v45 = vshrl.u32 %v9626_v34, 16 }
  0xe8   : > { %2864 = vrot.lane.b32.xlu0 %v7017_v57, %s8788_s9  ;;  %v2214_v55 = vsel %vm8879_vm2, %v2212_v15, %v2213_v52  ;;  %v1217_v58 = vshll.u32 %v9637_v23, 16  ;;  %v1178_v62 = vshrl.u32 %v9642_v42, 16  ;;  %v1181_v63 = vshll.u32 %v9642_v42, 16 }
  0xe9   : > { %3186 = vrot.lane.b32.xlu1 %v7082_v43, %s8787_s8  ;;  %v7081_v6 = vcombine.low %v2211_v41, %v2214_v55  ;;  %v1204_v4 = vor.u32 %v1203_v28, %v9652_v46  ;;  %v1209_v11 = vrot.slane %v1207_v47, 5  ;;  %v1213_v51 = vrot.slane %v1211_v45, 4  ;;  %v9697_v43 = vld [vmem:[%s8877_s7 + $0x170] sm:$0xf]  ;;  %v9700_v41 = vld [vmem:[%s8877_s7 + $0x174] sm:$0xf] }
  0xea   : > { %v1219_v13 = vrot.slane %v1217_v58, 5  ;;  %v1180_v39 = vrot.slane %v1178_v62, 4  ;;  %v1183_v14 = vrot.slane %v1181_v63, 5  ;;  %v1187_v16 = vshll.u32 %v9657_v19, 16  ;;  %v9716_v55 = vld [vmem:[%s8877_s7 + $0x168] sm:$0xf] }
  0xeb   : > { %v1205_v52 = vrot.slane %v1204_v4, 4  ;;  %v1214_v59 = vor.u32 %v1213_v51, %v1209_v11  ;;  %v1191_v48 = vshrl.u32 %v9657_v19, 16  ;;  %v6928_v37 = vcombine.low %v8598_v60, %v8599_v18  ;;  %v9722_v62 = vld [vmem:[%s8877_s7 + $0x178] sm:$0x1]  ;;  %v9735_v51 = vld [vmem:[%s8877_s7 + $0x16c] sm:$0xf] }
  0xec   : > { %3184 = vrot.lane.b32.xlu0 %v7081_v6, %s8787_s8  ;;  %v1184_v9 = vor.u32 %v1183_v14, %v1180_v39  ;;  %v1189_v30 = vrot.slane %v1187_v16, 5  ;;  %v6927_v29 = vcombine.low %v8600_v25, %v8601_v22  ;;  %v2226_v53 = vrot.slane %v9608_v10, 5 }
  0xed   : > { %7938 = vmatmul.mubr.msk.bf16.gmra.mrb[8].mxu0 %vm3684_vm8, %v9619_v1  ;;  %v1210_v61 = vsel %vm8920_vm5, %v1205_v52, %v1209_v11  ;;  %v1215_v31 = vrot.slane %v1214_v59, 4  ;;  %v1193_v33 = vrot.slane %v1191_v48, 4  ;;  %v3272_v20 = vsel %vm3248_vm6, %v6928_v37, %v9438_v3  ;;  %v9747_v52 = vpop.permute.xlu0 %3144 }
  0xee   : > { %v1185_v21 = vrot.slane %v1184_v9, 4  ;;  %v3269_v36 = vsel %vm3248_vm6, %v6927_v29, %v9456_v54  ;;  %v2228_v10 = vrot.slane %v2226_v53, 4  ;;  %v2229_v32 = vrot.slane %v9626_v34, 5 }
  0xef   : > { %v1220_v26 = vsel %vm8920_vm5, %v1215_v31, %v1219_v13  ;;  %v1194_v7 = vor.u32 %v1193_v33, %v1189_v30  ;;  %v2232_v57 = vrot.slane %v9637_v23, 5  ;;  %v6906_v3 = vrot.slane %v9642_v42, 9  ;;  %v9741_v13 = vpop.permute.xlu1 %3146 }
  0xf0   : > { %v7020_v54 = vcombine.low %v1210_v61, %v1220_v26  ;;  %v1190_v34 = vsel %vm8920_vm5, %v1185_v21, %v1189_v30  ;;  %v2230_v15 = vsel %vm8879_vm2, %v2228_v10, %v2229_v32  ;;  %v2231_v28 = vrot.slane %v2229_v32, 4  ;;  %v8602_v21 = vld [vmem:[%s8877_s7 + $0x58] sm:$0xf] }
  0xf1   : > { %v1195_v47 = vrot.slane %v1194_v7, 4  ;;  %v2223_v45 = vrot.slane %v9657_v19, 5  ;;  %v9709_v23 = vsel %vm3441_vm7, %v3272_v20, %v9477_v38  ;;  %v9713_v42 = vsel %vm3441_vm7, %v3269_v36, %v9479_v17  ;;  %v8603_v36 = vld [vmem:[%s8877_s7 + $0x5c] sm:$0xf]  ;;  %v8604_v7 = vld [vmem:[%s8877_s7 + $0x50] sm:$0xf] }
  0xf2   : > { %2870 = vrot.lane.b32.xlu1 %v7020_v54, %s8788_s9  ;;  %v2233_v58 = vsel %vm8879_vm2, %v2231_v28, %v2232_v57  ;;  %v1241_v63 = vshll.u32 %v9697_v43, 16  ;;  %v1245_v19 = vshrl.u32 %v9697_v43, 16  ;;  %v1251_v38 = vshll.u32 %v9700_v41, 16  ;;  %7805 = vmatprep.mubr.msk.bf16.mxu1 %vm3684_vm8, %v9713_v42  ;;  %v8605_v57 = vld [vmem:[%s8877_s7 + $0x54] sm:$0xf] }
  0xf3   : > { %v1200_v17 = vsel %vm8920_vm5, %v1195_v47, %v9652_v46  ;;  %v7084_v6 = vcombine.low %v2230_v15, %v2233_v58  ;;  %v2224_v4 = vsel %vm8879_vm2, %v6906_v3, %v2223_v45  ;;  %v2225_v11 = vrot.slane %v2223_v45, 4  ;;  %7806 = vmatmul.mubr.msk.bf16.gmra.mrb[8].mxu1 %vm3684_vm8, %v9709_v23  ;;  %7941 = vmatprep.mubr.msk.bf16.mxu0 %vm3684_vm8, %v9713_v42  ;;  %v9773_v58 = vpop.permute.xlu0 %2828 }
  0xf4   : > { %v7019_v39 = vcombine.low %v1190_v34, %v1200_v17  ;;  %v9743_v14 = vrot.slane %v1241_v63, 5  ;;  %v1247_v16 = vrot.slane %v1245_v19, 4  ;;  %v1253_v46 = vrot.slane %v1251_v38, 5  ;;  %v9765_v34 = vpop.permute.xlu1 %2830 }
  0xf5   : > { %7942 = vmatmul.mubr.msk.bf16.gmra.mrb[12].mxu0 %vm3684_vm8, %v9709_v23  ;;  %v2227_v59 = vsel %vm8879_vm2, %v2225_v11, %v2226_v53  ;;  %v1255_v48 = vshrl.u32 %v9700_v41, 16  ;;  %v1261_v60 = vshll.u32 %v9722_v62, 16  ;;  %v1222_v18 = vshrl.u32 %v9716_v55, 16 }
  0xf6   : > { %2868 = vrot.lane.b32.xlu0 %v7019_v39, %s8788_s9  ;;  %3190 = vrot.lane.b32.xlu1 %v7084_v6, %s8787_s8  ;;  %v7083_v37 = vcombine.low %v2224_v4, %v2227_v59  ;;  %v1248_v9 = vor.u32 %v1247_v16, %v9743_v14  ;;  %v1225_v30 = vshll.u32 %v9716_v55, 16  ;;  %v1231_v25 = vshll.u32 %v9735_v51, 16 }
  0xf7   : > { %v1257_v22 = vrot.slane %v1255_v48, 4  ;;  %v1263_v29 = vrot.slane %v1261_v60, 5  ;;  %v1224_v53 = vrot.slane %v1222_v18, 4  ;;  %v1235_v61 = vshrl.u32 %v9735_v51, 16  ;;  %v9796_v48 = vld [vmem:[%s8877_s7 + $0x188] sm:$0xf] }
  0xf8   : > { %v1249_v31 = vrot.slane %v1248_v9, 4  ;;  %v1227_v33 = vrot.slane %v1225_v30, 5  ;;  %v1233_v20 = vrot.slane %v1231_v25, 5  ;;  %v6930_v10 = vcombine.low %v8602_v21, %v8603_v36  ;;  %v9799_v60 = vld [vmem:[%s8877_s7 + $0x18c] sm:$0x1]  ;;  %v9809_v25 = vpop.permute.xlu1 %3150 }
  0xf9   : > { %v1258_v32 = vor.u32 %v1257_v22, %v1253_v46  ;;  %v1237_v26 = vrot.slane %v1235_v61, 4  ;;  %v6929_v3 = vcombine.low %v8604_v7, %v8605_v57  ;;  %v2239_v54 = vrot.slane %v9697_v43, 5  ;;  %v9807_v30 = vld [vmem:[%s8877_s7 + $0x17c] sm:$0xf]  ;;  %v9826_v21 = vld [vmem:[%s8877_s7 + $0x180] sm:$0xf] }
  0xfa   : > { %3188 = vrot.lane.b32.xlu0 %v7083_v37, %s8787_s8  ;;  %v1254_v15 = vsel %vm8920_vm5, %v1249_v31, %v1253_v46  ;;  %v1228_v28 = vor.u32 %v1227_v33, %v1224_v53  ;;  %v3278_v47 = vsel %vm3248_vm6, %v6930_v10, %v9507_v56  ;;  %v2242_v45 = vrot.slane %v9700_v41, 5  ;;  %v9785_v46 = vld [vmem:[%s8877_s7 + $0x184] sm:$0xf]  ;;  %v9818_v53 = vpop.permute.xlu0 %3148 }
  0xfb   : > { %v1259_v63 = vrot.slane %v1258_v32, 4  ;;  %v1238_v19 = vor.u32 %v1237_v26, %v1233_v20  ;;  %v3275_v43 = vsel %vm3248_vm6, %v6929_v3, %v9517_v8  ;;  %v2241_v38 = vrot.slane %v2239_v54, 4 }
  0xfc   : > { %v1229_v17 = vrot.slane %v1228_v28, 4  ;;  %v2244_v6 = vrot.slane %v2242_v45, 4  ;;  %v2245_v4 = vrot.slane %v9722_v62, 5  ;;  %v6907_v11 = vrot.slane %v9716_v55, 9 }
  0xfd   : > { %v1264_v56 = vsel %vm8920_vm5, %v1259_v63, %v1263_v29  ;;  %v1239_v41 = vrot.slane %v1238_v19, 4  ;;  %v2243_v39 = vsel %vm8879_vm2, %v2241_v38, %v2242_v45  ;;  %v2236_v16 = vrot.slane %v9735_v51, 5  ;;  %v8606_v19 = vld [vmem:[%s8877_s7 + $0x6c] sm:$0xf] }
  0xfe   : > { %v7022_v8 = vcombine.low %v1254_v15, %v1264_v56  ;;  %v1234_v59 = vsel %vm8920_vm5, %v1229_v17, %v1233_v20  ;;  %v2246_v62 = vsel %vm8879_vm2, %v2244_v6, %v2245_v4  ;;  %v9793_v55 = vsel %vm3441_vm7, %v3278_v47, %v9571_v44  ;;  %v8608_v17 = vld [vmem:[%s8877_s7 + $0x64] sm:$0xf]  ;;  %v8609_v6 = vld [vmem:[%s8877_s7 + $0x68] sm:$0xf] }
  0xff   : > { %v1244_v51 = vsel %vm8920_vm5, %v1239_v41, %v9743_v14  ;;  %v7086_v18 = vcombine.low %v2243_v39, %v2246_v62  ;;  %v2237_v37 = vsel %vm8879_vm2, %v6907_v11, %v2236_v16  ;;  %v2238_v9 = vrot.slane %v2236_v16, 4  ;;  %v9846_v11 = vpop.permute.xlu1 %2834 }
 0x100   : > { %2874 = vrot.lane.b32.xlu1 %v7022_v8, %s8788_s9  ;;  %v7021_v44 = vcombine.low %v1234_v59, %v1244_v51  ;;  %v9814_v22 = vsel %vm3441_vm7, %v3275_v43, %v9578_v49  ;;  %v1285_v29 = vshll.u32 %v9785_v46, 16  ;;  %v1289_v14 = vshrl.u32 %v9785_v46, 16  ;;  %v8607_v43 = vld [vmem:[%s8877_s7 + $0x70] sm:$0xf]  ;;  %v9850_v8 = vpop.permute.xlu0 %2832 }
 0x101   : > { %v2240_v61 = vsel %vm8879_vm2, %v2238_v9, %v2239_v54  ;;  %v1295_v31 = vshll.u32 %v9796_v48, 16  ;;  %v1299_v33 = vshrl.u32 %v9796_v48, 16  ;;  %v1305_v20 = vshll.u32 %v9799_v60, 16  ;;  %7809 = vmatprep.mubr.msk.bf16.mxu1 %vm3684_vm8, %v9814_v22  ;;  %7945 = vmatprep.mubr.msk.bf16.mxu0 %vm3684_vm8, %v9814_v22 }
 0x102   : > { %2872 = vrot.lane.b32.xlu0 %v7021_v44, %s8788_s9  ;;  %v7085_v49 = vcombine.low %v2237_v37, %v2240_v61  ;;  %v1287_v36 = vrot.slane %v1285_v29, 5  ;;  %v1291_v10 = vrot.slane %v1289_v14, 4  ;;  %v1266_v32 = vshrl.u32 %v9807_v30, 16  ;;  %7810 = vmatmul.mubr.msk.bf16.gmra.mrb[12].mxu1 %vm3684_vm8, %v9793_v55 }
 0x103   : > { %v1297_v26 = vrot.slane %v1295_v31, 5  ;;  %v1301_v7 = vrot.slane %v1299_v33, 4  ;;  %v1307_v57 = vrot.slane %v1305_v20, 5  ;;  %v1269_v3 = vshll.u32 %v9807_v30, 16  ;;  %7946 = vmatmul.mubr.msk.bf16.gmra.mrb[16].mxu0 %vm3684_vm8, %v9793_v55  ;;  %v9864_v31 = vld [vmem:[%s8877_s7 + $0x198] sm:$0xf] }
 0x104   : > { %3194 = vrot.lane.b32.xlu1 %v7086_v18, %s8787_s8  ;;  %v1292_v54 = vor.u32 %v1291_v10, %v1287_v36  ;;  %v1268_v15 = vrot.slane %v1266_v32, 4  ;;  %v1275_v28 = vshll.u32 %v9826_v21, 16  ;;  %v1279_v47 = vshrl.u32 %v9826_v21, 16  ;;  %v9880_v32 = vld [vmem:[%s8877_s7 + $0x19c] sm:$0xf] }
 0x105   : > { %v1302_v45 = vor.u32 %v1301_v7, %v1297_v26  ;;  %v1271_v63 = vrot.slane %v1269_v3, 5  ;;  %v6932_v38 = vcombine.low %v8606_v19, %v8607_v43  ;;  %v6931_v4 = vcombine.low %v8608_v17, %v8609_v6  ;;  %v9895_v3 = vld [vmem:[%s8877_s7 + $0x190] sm:$0xf] }
 0x106   : > { %3192 = vrot.lane.b32.xlu0 %v7085_v49, %s8787_s8  ;;  %v1293_v56 = vrot.slane %v1292_v54, 4  ;;  %v1277_v41 = vrot.slane %v1275_v28, 5  ;;  %v1281_v39 = vrot.slane %v1279_v47, 4  ;;  %v2252_v16 = vrot.slane %v9785_v46, 5  ;;  %v9899_v54 = vpop.permute.xlu0 %3152 }
 0x107   : > { %v1303_v59 = vrot.slane %v1302_v45, 4  ;;  %v1272_v62 = vor.u32 %v1271_v63, %v1268_v15  ;;  %v3284_v51 = vsel %vm3248_vm6, %v6932_v38, %v9601_v12  ;;  %v3281_v18 = vsel %vm3248_vm6, %v6931_v4, %v9610_v2  ;;  %v9912_v38 = vld [vmem:[%s8877_s7 + $0x194] sm:$0xf] }
 0x108   : > { %v1298_v37 = vsel %vm8920_vm5, %v1293_v56, %v1297_v26  ;;  %v1282_v9 = vor.u32 %v1281_v39, %v1277_v41  ;;  %v2254_v44 = vrot.slane %v2252_v16, 4  ;;  %v2255_v29 = vrot.slane %v9796_v48, 5  ;;  %v9882_v26 = vpop.permute.xlu1 %3154 }
 0x109   : > { %v1308_v46 = vsel %vm8920_vm5, %v1303_v59, %v1307_v57  ;;  %v1273_v14 = vrot.slane %v1272_v62, 4  ;;  %v2258_v61 = vrot.slane %v9799_v60, 5  ;;  %v6908_v12 = vrot.slane %v9807_v30, 9  ;;  %v9890_v57 = vld [vmem:[%s8877_s7 + $0x1a0] sm:$0x1] }
 0x10a   : > { %v7024_v2 = vcombine.low %v1298_v37, %v1308_v46  ;;  %v1283_v33 = vrot.slane %v1282_v9, 4  ;;  %v2256_v20 = vsel %vm8879_vm2, %v2254_v44, %v2255_v29  ;;  %v2257_v49 = vrot.slane %v2255_v29, 4 }
 0x10b   : > { %v1278_v48 = vsel %vm8920_vm5, %v1273_v14, %v1277_v41  ;;  %v2249_v10 = vrot.slane %v9826_v21, 5  ;;  %v9873_v60 = vsel %vm3441_vm7, %v3284_v51, %v9659_v50  ;;  %v9877_v30 = vsel %vm3441_vm7, %v3281_v18, %v9667_v5  ;;  %v8610_v14 = vld [vmem:[%s8877_s7 + $0x80] sm:$0xf] }
 0x10c   : > { %2878 = vrot.lane.b32.xlu1 %v7024_v2, %s8788_s9  ;;  %v1288_v7 = vsel %vm8920_vm5, %v1283_v33, %v1287_v36  ;;  %v2259_v21 = vsel %vm8879_vm2, %v2257_v49, %v2258_v61  ;;  %v1329_v50 = vshll.u32 %v9864_v31, 16  ;;  %v1333_v5 = vshrl.u32 %v9864_v31, 16  ;;  %7813 = vmatprep.mubr.msk.bf16.mxu1 %vm3684_vm8, %v9877_v30  ;;  %v9925_v9 = vpop.permute.xlu1 %2838  ;;  %v8611_v61 = vld [vmem:[%s8877_s7 + $0x84] sm:$0xf]  ;;  %v9930_v2 = vpop.permute.xlu0 %2836  ;;  %v8612_v49 = vld [vmem:[%s8877_s7 + $0x78] sm:$0xf] }
 0x10d   : > { %v7023_v15 = vcombine.low %v1278_v48, %v1288_v7  ;;  %v7088_v28 = vcombine.low %v2256_v20, %v2259_v21  ;;  %v2250_v36 = vsel %vm8879_vm2, %v6908_v12, %v2249_v10  ;;  %v2251_v47 = vrot.slane %v2249_v10, 4  ;;  %7814 = vmatmul.mubr.msk.bf16.gmra.mrb[16].mxu1 %vm3684_vm8, %v9873_v60  ;;  %7949 = vmatprep.mubr.msk.bf16.mxu0 %vm3684_vm8, %v9877_v30  ;;  %v8613_v48 = vld [vmem:[%s8877_s7 + $0x7c] sm:$0xf] }
 0x10e   : > { %v9907_v45 = vrot.slane %v1329_v50, 5  ;;  %v1335_v63 = vrot.slane %v1333_v5, 4  ;;  %v1339_v19 = vshll.u32 %v9880_v32, 16  ;;  %v1343_v43 = vshrl.u32 %v9880_v32, 16  ;;  %7950 = vmatmul.mubr.msk.bf16.gmra.mrb[20].mxu0 %vm3684_vm8, %v9873_v60 }
 0x10f   : > { %2876 = vrot.lane.b32.xlu0 %v7023_v15, %s8788_s9  ;;  %v2253_v17 = vsel %vm8879_vm2, %v2251_v47, %v2252_v16  ;;  %v1349_v6 = vshll.u32 %v9890_v57, 16  ;;  %v1310_v4 = vshrl.u32 %v9895_v3, 16  ;;  %v1313_v56 = vshll.u32 %v9895_v3, 16 }
 0x110   : > { %3198 = vrot.lane.b32.xlu1 %v7088_v28, %s8787_s8  ;;  %v7087_v41 = vcombine.low %v2250_v36, %v2253_v17  ;;  %v1336_v39 = vor.u32 %v1335_v63, %v9907_v45  ;;  %v1341_v59 = vrot.slane %v1339_v19, 5  ;;  %v1345_v62 = vrot.slane %v1343_v43, 4 }
 0x111   : > { %v1351_v51 = vrot.slane %v1349_v6, 5  ;;  %v1312_v18 = vrot.slane %v1310_v4, 4  ;;  %v1315_v16 = vrot.slane %v1313_v56, 5  ;;  %v1319_v37 = vshll.u32 %v9912_v38, 16  ;;  %v9948_v6 = vld [vmem:[%s8877_s7 + $0x1ac] sm:$0xf] }
 0x112   : > { %v1337_v44 = vrot.slane %v1336_v39, 4  ;;  %v1346_v29 = vor.u32 %v1345_v62, %v1341_v59  ;;  %v1323_v46 = vshrl.u32 %v9912_v38, 16  ;;  %v6934_v12 = vcombine.low %v8610_v14, %v8611_v61  ;;  %v9969_v62 = vld [vmem:[%s8877_s7 + $0x1a4] sm:$0xf]  ;;  %v9990_v14 = vld [vmem:[%s8877_s7 + $0x1a8] sm:$0xf] }
 0x113   : > { %3196 = vrot.lane.b32.xlu0 %v7087_v41, %s8787_s8  ;;  %v1316_v33 = vor.u32 %v1315_v16, %v1312_v18  ;;  %v1321_v20 = vrot.slane %v1319_v37, 5  ;;  %v6933_v10 = vcombine.low %v8612_v49, %v8613_v48  ;;  %v2265_v7 = vrot.slane %v9864_v31, 5  ;;  %v9957_v41 = vpop.permute.xlu1 %3158  ;;  %v9977_v16 = vld [vmem:[%s8877_s7 + $0x1b4] sm:$0x1] }
 0x114   : > { %v1342_v21 = vsel %vm8920_vm5, %v1337_v44, %v1341_v59  ;;  %v1347_v50 = vrot.slane %v1346_v29, 4  ;;  %v1325_v5 = vrot.slane %v1323_v46, 4  ;;  %v3290_v15 = vsel %vm3248_vm6, %v6934_v12, %v9685_v35  ;;  %v9951_v35 = vld [vmem:[%s8877_s7 + $0x1b0] sm:$0xf] }
 0x115   : > { %v1317_v28 = vrot.slane %v1316_v33, 4  ;;  %v3287_v36 = vsel %vm3248_vm6, %v6933_v10, %v9690_v24  ;;  %v2267_v47 = vrot.slane %v2265_v7, 4  ;;  %v2268_v63 = vrot.slane %v9880_v32, 5 }
 0x116   : > { %v1352_v19 = vsel %vm8920_vm5, %v1347_v50, %v1351_v51  ;;  %v1326_v31 = vor.u32 %v1325_v5, %v1321_v20  ;;  %v2271_v43 = vrot.slane %v9890_v57, 5  ;;  %v6909_v17 = vrot.slane %v9895_v3, 9  ;;  %v9971_v51 = vpop.permute.xlu0 %3156 }
 0x117   : > { %v7026_v4 = vcombine.low %v1342_v21, %v1352_v19  ;;  %v1322_v24 = vsel %vm8920_vm5, %v1317_v28, %v1321_v20  ;;  %v2269_v32 = vsel %vm8879_vm2, %v2267_v47, %v2268_v63  ;;  %v2270_v56 = vrot.slane %v2268_v63, 4 }
 0x118   : > { %v1327_v39 = vrot.slane %v1326_v31, 4  ;;  %v2262_v57 = vrot.slane %v9912_v38, 5  ;;  %v9962_v3 = vsel %vm3441_vm7, %v3290_v15, %v9741_v13  ;;  %v9966_v59 = vsel %vm3441_vm7, %v3287_v36, %v9747_v52  ;;  %v10010_v15 = vpop.permute.xlu1 %2842 }
 0x119   : > { %2882 = vrot.lane.b32.xlu1 %v7026_v4, %s8788_s9  ;;  %v2272_v18 = vsel %vm8879_vm2, %v2270_v56, %v2271_v43  ;;  %v1373_v38 = vshll.u32 %v9948_v6, 16  ;;  %v1377_v13 = vshrl.u32 %v9948_v6, 16  ;;  %v1383_v37 = vshll.u32 %v9951_v35, 16  ;;  %7817 = vmatprep.mubr.msk.bf16.mxu1 %vm3684_vm8, %v9966_v59  ;;  %v8614_v4 = vld [vmem:[%s8877_s7 + $0x94] sm:$0xf] }
 0x11a   : > { %v1332_v52 = vsel %vm8920_vm5, %v1327_v39, %v9907_v45  ;;  %v7090_v44 = vcombine.low %v2269_v32, %v2272_v18  ;;  %v2263_v29 = vsel %vm8879_vm2, %v6909_v17, %v2262_v57  ;;  %v2264_v46 = vrot.slane %v2262_v57, 4  ;;  %7818 = vmatmul.mubr.msk.bf16.gmra.mrb[20].mxu1 %vm3684_vm8, %v9962_v3  ;;  %7953 = vmatprep.mubr.msk.bf16.mxu0 %vm3684_vm8, %v9966_v59  ;;  %v10013_v19 = vpop.permute.xlu0 %2840  ;;  %v8616_v57 = vld [vmem:[%s8877_s7 + $0x8c] sm:$0xf]  ;;  %v8617_v18 = vld [vmem:[%s8877_s7 + $0x90] sm:$0xf] }
 0x11b   : > { %v7025_v61 = vcombine.low %v1322_v24, %v1332_v52  ;;  %v9996_v12 = vrot.slane %v1373_v38, 5  ;;  %v1379_v33 = vrot.slane %v1377_v13, 4  ;;  %v1385_v20 = vrot.slane %v1383_v37, 5  ;;  %7954 = vmatmul.mubr.msk.bf16.gmra.mrb[24].mxu0 %vm3684_vm8, %v9962_v3  ;;  %v8615_v24 = vld [vmem:[%s8877_s7 + $0x98] sm:$0xf] }
 0x11c   : > { %v2266_v45 = vsel %vm8879_vm2, %v2264_v46, %v2265_v7  ;;  %v1387_v49 = vshrl.u32 %v9951_v35, 16  ;;  %v1393_v48 = vshll.u32 %v9977_v16, 16  ;;  %v1354_v10 = vshrl.u32 %v9969_v62, 16 }
 0x11d   : > { %2880 = vrot.lane.b32.xlu0 %v7025_v61, %s8788_s9  ;;  %3202 = vrot.lane.b32.xlu1 %v7090_v44, %s8787_s8  ;;  %v7089_v21 = vcombine.low %v2263_v29, %v2266_v45  ;;  %v1380_v50 = vor.u32 %v1379_v33, %v9996_v12  ;;  %v1357_v5 = vshll.u32 %v9969_v62, 16  ;;  %v1363_v7 = vshll.u32 %v9990_v14, 16 }
 0x11e   : > { %v1389_v28 = vrot.slane %v1387_v49, 4  ;;  %v1395_v36 = vrot.slane %v1393_v48, 5  ;;  %v1356_v47 = vrot.slane %v1354_v10, 4  ;;  %v1367_v63 = vshrl.u32 %v9990_v14, 16  ;;  %v10030_v10 = vpop.permute.xlu1 %3162 }
 0x11f   : > { %v1381_v31 = vrot.slane %v1380_v50, 4  ;;  %v1359_v43 = vrot.slane %v1357_v5, 5  ;;  %v1365_v17 = vrot.slane %v1363_v7, 5  ;;  %v6936_v32 = vcombine.low %v8614_v4, %v8615_v24  ;;  %v10038_v50 = vld [vmem:[%s8877_s7 + $0x1c0] sm:$0xf]  ;;  %v10040_v5 = vpop.permute.xlu0 %3160 }
 0x120   : > { %v1390_v56 = vor.u32 %v1389_v28, %v1385_v20  ;;  %v1369_v39 = vrot.slane %v1367_v63, 4  ;;  %v6935_v38 = vcombine.low %v8616_v57, %v8617_v18  ;;  %v2278_v13 = vrot.slane %v9948_v6, 5  ;;  %v10077_v18 = vld [vmem:[%s8877_s7 + $0x1bc] sm:$0xf] }
 0x121   : > { %3200 = vrot.lane.b32.xlu0 %v7089_v21, %s8787_s8  ;;  %v1386_v37 = vsel %vm8920_vm5, %v1381_v31, %v1385_v20  ;;  %v1360_v52 = vor.u32 %v1359_v43, %v1356_v47  ;;  %v3296_v44 = vsel %vm3248_vm6, %v6936_v32, %v9765_v34  ;;  %v2281_v29 = vrot.slane %v9951_v35, 5  ;;  %v10054_v47 = vld [vmem:[%s8877_s7 + $0x1c8] sm:$0x1] }
 0x122   : > { %v1391_v46 = vrot.slane %v1390_v56, 4  ;;  %v1370_v61 = vor.u32 %v1369_v39, %v1365_v17  ;;  %v3293_v33 = vsel %vm3248_vm6, %v6935_v38, %v9773_v58  ;;  %v2280_v45 = vrot.slane %v2278_v13, 4 }
 0x123   : > { %v1361_v6 = vrot.slane %v1360_v52, 4  ;;  %v2283_v49 = vrot.slane %v2281_v29, 4  ;;  %v2284_v48 = vrot.slane %v9977_v16, 5  ;;  %v6910_v20 = vrot.slane %v9969_v62, 9  ;;  %v10087_v52 = vpop.permute.xlu1 %2846 }
 0x124   : > { %v1396_v34 = vsel %vm8920_vm5, %v1391_v46, %v1395_v36  ;;  %v1371_v35 = vrot.slane %v1370_v61, 4  ;;  %v2282_v21 = vsel %vm8879_vm2, %v2280_v45, %v2281_v29  ;;  %v2275_v58 = vrot.slane %v9990_v14, 5  ;;  %v10051_v36 = vld [vmem:[%s8877_s7 + $0x1c4] sm:$0xf] }
 0x125   : > { %v7028_v7 = vcombine.low %v1386_v37, %v1396_v34  ;;  %v1366_v62 = vsel %vm8920_vm5, %v1361_v6, %v1365_v17  ;;  %v2285_v16 = vsel %vm8879_vm2, %v2283_v49, %v2284_v48  ;;  %v10048_v28 = vsel %vm3441_vm7, %v3296_v44, %v9809_v25  ;;  %v10062_v17 = vld [vmem:[%s8877_s7 + $0x1b8] sm:$0xf] }
 0x126   : > { %v1376_v14 = vsel %vm8920_vm5, %v1371_v35, %v9996_v12  ;;  %v7092_v63 = vcombine.low %v2282_v21, %v2285_v16  ;;  %v2276_v31 = vsel %vm8879_vm2, %v6910_v20, %v2275_v58  ;;  %v2277_v43 = vrot.slane %v2275_v58, 4  ;;  %v8618_v35 = vld [vmem:[%s8877_s7 + $0xa8] sm:$0xf]  ;;  %v8619_v21 = vld [vmem:[%s8877_s7 + $0xac] sm:$0xf] }
 0x127   : > { %2886 = vrot.lane.b32.xlu1 %v7028_v7, %s8788_s9  ;;  %v7027_v25 = vcombine.low %v1366_v62, %v1376_v14  ;;  %v10067_v4 = vsel %vm3441_vm7, %v3293_v33, %v9818_v53  ;;  %v1417_v24 = vshll.u32 %v10038_v50, 16  ;;  %v1421_v32 = vshrl.u32 %v10038_v50, 16  ;;  %v10092_v33 = vpop.permute.xlu0 %2844  ;;  %v8620_v7 = vld [vmem:[%s8877_s7 + $0xa0] sm:$0xf]  ;;  %v8621_v62 = vld [vmem:[%s8877_s7 + $0xa4] sm:$0xf] }
 0x128   : > { %v2279_v12 = vsel %vm8879_vm2, %v2277_v43, %v2278_v13  ;;  %v1427_v56 = vshll.u32 %v10051_v36, 16  ;;  %v1431_v39 = vshrl.u32 %v10051_v36, 16  ;;  %v1437_v57 = vshll.u32 %v10054_v47, 16  ;;  %7821 = vmatprep.mubr.msk.bf16.mxu1 %vm3684_vm8, %v10067_v4  ;;  %7957 = vmatprep.mubr.msk.bf16.mxu0 %vm3684_vm8, %v10067_v4 }
 0x129   : > { %2884 = vrot.lane.b32.xlu0 %v7027_v25, %s8788_s9  ;;  %v7091_v53 = vcombine.low %v2276_v31, %v2279_v12  ;;  %v1419_v38 = vrot.slane %v1417_v24, 5  ;;  %v1423_v37 = vrot.slane %v1421_v32, 4  ;;  %v1398_v13 = vshrl.u32 %v10062_v17, 16  ;;  %7822 = vmatmul.mubr.msk.bf16.gmra.mrb[24].mxu1 %vm3684_vm8, %v10048_v28 }
 0x12a   : > { %v1429_v44 = vrot.slane %v1427_v56, 5  ;;  %v1433_v29 = vrot.slane %v1431_v39, 4  ;;  %v1439_v46 = vrot.slane %v1437_v57, 5  ;;  %v1401_v61 = vshll.u32 %v10062_v17, 16  ;;  %7958 = vmatmul.mubr.msk.bf16.gmra.mrb[28].mxu0 %vm3684_vm8, %v10048_v28 }
 0x12b   : > { %3206 = vrot.lane.b32.xlu1 %v7092_v63, %s8787_s8  ;;  %v1424_v45 = vor.u32 %v1423_v37, %v1419_v38  ;;  %v1400_v6 = vrot.slane %v1398_v13, 4  ;;  %v1407_v49 = vshll.u32 %v10077_v18, 16  ;;  %v1411_v48 = vshrl.u32 %v10077_v18, 16  ;;  %v10110_v37 = vpop.permute.xlu1 %3166 }
 0x12c   : > { %v1434_v20 = vor.u32 %v1433_v29, %v1429_v44  ;;  %v1403_v34 = vrot.slane %v1401_v61, 5  ;;  %v6938_v58 = vcombine.low %v8618_v35, %v8619_v21  ;;  %v6937_v16 = vcombine.low %v8620_v7, %v8621_v62  ;;  %v10119_v61 = vpop.permute.xlu0 %3164  ;;  %v10148_v21 = vld [vmem:[%s8877_s7 + $0x1cc] sm:$0xf] }
 0x12d   : > { %3204 = vrot.lane.b32.xlu0 %v7091_v53, %s8787_s8  ;;  %v1425_v14 = vrot.slane %v1424_v45, 4  ;;  %v1409_v31 = vrot.slane %v1407_v49, 5  ;;  %v1413_v63 = vrot.slane %v1411_v48, 4  ;;  %v2291_v43 = vrot.slane %v10038_v50, 5  ;;  %v10135_v48 = vld [vmem:[%s8877_s7 + $0x1d8] sm:$0xf] }
 0x12e   : > { %v1435_v25 = vrot.slane %v1434_v20, 4  ;;  %v1404_v24 = vor.u32 %v1403_v34, %v1400_v6  ;;  %v3302_v32 = vsel %vm3248_vm6, %v6938_v58, %v9846_v11  ;;  %v3299_v12 = vsel %vm3248_vm6, %v6937_v16, %v9850_v8  ;;  %v10117_v8 = vld [vmem:[%s8877_s7 + $0x1d4] sm:$0xf] }
 0x12f   : > { %v1430_v56 = vsel %vm8920_vm5, %v1425_v14, %v1429_v44  ;;  %v1414_v39 = vor.u32 %v1413_v63, %v1409_v31  ;;  %v2293_v57 = vrot.slane %v2291_v43, 4  ;;  %v2294_v53 = vrot.slane %v10051_v36, 5  ;;  %v10163_v63 = vld [vmem:[%s8877_s7 + $0x1d0] sm:$0xf] }
 0x130   : > { %v1440_v50 = vsel %vm8920_vm5, %v1435_v25, %v1439_v46  ;;  %v1405_v13 = vrot.slane %v1404_v24, 4  ;;  %v2297_v29 = vrot.slane %v10054_v47, 5  ;;  %v6911_v11 = vrot.slane %v10062_v17, 9  ;;  %v10167_v25 = vpop.permute.xlu1 %2850 }
 0x131   : > { %v7030_v44 = vcombine.low %v1430_v56, %v1440_v50  ;;  %v1415_v45 = vrot.slane %v1414_v39, 4  ;;  %v2295_v36 = vsel %vm8879_vm2, %v2293_v57, %v2294_v53  ;;  %v2296_v6 = vrot.slane %v2294_v53, 4  ;;  %v10175_v39 = vpop.permute.xlu0 %2848 }
 0x132   : > { %v1410_v46 = vsel %vm8920_vm5, %v1405_v13, %v1409_v31  ;;  %v2288_v49 = vrot.slane %v10077_v18, 5  ;;  %v10128_v47 = vsel %vm3441_vm7, %v3302_v32, %v9882_v26  ;;  %v10132_v17 = vsel %vm3441_vm7, %v3299_v12, %v9899_v54  ;;  %v10143_v18 = vld [vmem:[%s8877_s7 + $0x1dc] sm:$0x1] }
 0x133   : > { %2890 = vrot.lane.b32.xlu1 %v7030_v44, %s8788_s9  ;;  %v1420_v20 = vsel %vm8920_vm5, %v1415_v45, %v1419_v38  ;;  %v2298_v34 = vsel %vm8879_vm2, %v2296_v6, %v2297_v29  ;;  %v1461_v26 = vshll.u32 %v10117_v8, 16  ;;  %v1465_v35 = vshrl.u32 %v10117_v8, 16  ;;  %7825 = vmatprep.mubr.msk.bf16.mxu1 %vm3684_vm8, %v10132_v17 }
 0x134   : > { %v7029_v54 = vcombine.low %v1410_v46, %v1420_v20  ;;  %v7094_v58 = vcombine.low %v2295_v36, %v2298_v34  ;;  %v2289_v38 = vsel %vm8879_vm2, %v6911_v11, %v2288_v49  ;;  %v2290_v7 = vrot.slane %v2288_v49, 4  ;;  %7826 = vmatmul.mubr.msk.bf16.gmra.mrb[28].mxu1 %vm3684_vm8, %v10128_v47  ;;  %7961 = vmatprep.mubr.msk.bf16.mxu0 %vm3684_vm8, %v10132_v17  ;;  %v8622_v46 = vld [vmem:[%s8877_s7 + $0xbc] sm:$0xf]  ;;  %v8623_v49 = vld [vmem:[%s8877_s7 + $0xc0] sm:$0xf] }
 0x135   : > { %v10158_v62 = vrot.slane %v1461_v26, 5  ;;  %v1467_v16 = vrot.slane %v1465_v35, 4  ;;  %v1471_v14 = vshll.u32 %v10135_v48, 16  ;;  %v1475_v31 = vshrl.u32 %v10135_v48, 16  ;;  %7962 = vmatmul.mubr.msk.bf16.gmra.mrb[32].mxu0 %vm3684_vm8, %v10128_v47  ;;  %v8624_v35 = vld [vmem:[%s8877_s7 + $0xb4] sm:$0xf] }
 0x136   : > { %2888 = vrot.lane.b32.xlu0 %v7029_v54, %s8788_s9  ;;  %v2292_v24 = vsel %vm8879_vm2, %v2290_v7, %v2291_v43  ;;  %v1481_v32 = vshll.u32 %v10143_v18, 16  ;;  %v1442_v12 = vshrl.u32 %v10148_v21, 16  ;;  %v1445_v56 = vshll.u32 %v10148_v21, 16  ;;  %v8625_v54 = vld [vmem:[%s8877_s7 + $0xb8] sm:$0xf] }
 0x137   : > { %3210 = vrot.lane.b32.xlu1 %v7094_v58, %s8787_s8  ;;  %v7093_v57 = vcombine.low %v2289_v38, %v2292_v24  ;;  %v1468_v53 = vor.u32 %v1467_v16, %v10158_v62  ;;  %v1473_v50 = vrot.slane %v1471_v14, 5  ;;  %v1477_v13 = vrot.slane %v1475_v31, 4  ;;  %v10191_v24 = vpop.permute.xlu1 %3170 }
 0x138   : > { %v1483_v43 = vrot.slane %v1481_v32, 5  ;;  %v1444_v29 = vrot.slane %v1442_v12, 4  ;;  %v1447_v11 = vrot.slane %v1445_v56, 5  ;;  %v1451_v44 = vshll.u32 %v10163_v63, 16 }
 0x139   : > { %v1469_v45 = vrot.slane %v1468_v53, 4  ;;  %v1478_v36 = vor.u32 %v1477_v13, %v1473_v50  ;;  %v1455_v6 = vshrl.u32 %v10163_v63, 16  ;;  %v6940_v20 = vcombine.low %v8622_v46, %v8623_v49  ;;  %v10196_v53 = vpop.permute.xlu0 %3168  ;;  %v10225_v46 = vld [vmem:[%s8877_s7 + $0x1f0] sm:$0x1] }
 0x13a   : > { %3208 = vrot.lane.b32.xlu0 %v7093_v57, %s8787_s8  ;;  %v1448_v34 = vor.u32 %v1447_v11, %v1444_v29  ;;  %v1453_v26 = vrot.slane %v1451_v44, 5  ;;  %v6939_v58 = vcombine.low %v8624_v35, %v8625_v54  ;;  %v2304_v38 = vrot.slane %v10117_v8, 5  ;;  %v10203_v29 = vld [vmem:[%s8877_s7 + $0x1e8] sm:$0xf]  ;;  %v10206_v11 = vld [vmem:[%s8877_s7 + $0x1ec] sm:$0xf] }
 0x13b   : > { %v1474_v7 = vsel %vm8920_vm5, %v1469_v45, %v1473_v50  ;;  %v1479_v16 = vrot.slane %v1478_v36, 4  ;;  %v1457_v14 = vrot.slane %v1455_v6, 4  ;;  %v3308_v31 = vsel %vm3248_vm6, %v6940_v20, %v9925_v9  ;;  %v10238_v35 = vld [vmem:[%s8877_s7 + $0x1e0] sm:$0xf]  ;;  %v10244_v54 = vpop.permute.xlu1 %2854 }
 0x13c   : > { %v1449_v32 = vrot.slane %v1448_v34, 4  ;;  %v3305_v12 = vsel %vm3248_vm6, %v6939_v58, %v9930_v2  ;;  %v2306_v56 = vrot.slane %v2304_v38, 4  ;;  %v2307_v57 = vrot.slane %v10135_v48, 5 }
 0x13d   : > { %v1484_v8 = vsel %vm8920_vm5, %v1479_v16, %v1483_v43  ;;  %v1458_v50 = vor.u32 %v1457_v14, %v1453_v26  ;;  %v2310_v13 = vrot.slane %v10143_v18, 5  ;;  %v6912_v9 = vrot.slane %v10148_v21, 9  ;;  %v377_v14 = vld [vmem:[%s8877_s7 + $0x1e4] sm:$0xf] }
 0x13e   : > { %v7032_v44 = vcombine.low %v1474_v7, %v1484_v8  ;;  %v1454_v2 = vsel %vm8920_vm5, %v1449_v32, %v1453_v26  ;;  %v2308_v48 = vsel %vm8879_vm2, %v2306_v56, %v2307_v57  ;;  %v2309_v45 = vrot.slane %v2307_v57, 4 }
 0x13f   : > { %v1459_v43 = vrot.slane %v1458_v50, 4  ;;  %v2301_v36 = vrot.slane %v10163_v63, 5  ;;  %v10215_v18 = vsel %vm3441_vm7, %v3308_v31, %v9957_v41  ;;  %v10219_v21 = vsel %vm3441_vm7, %v3305_v12, %v9971_v51  ;;  %v10251_v31 = vpop.permute.xlu0 %2852 }
 0x140   : > { %12504 = vst [vmem:[#allocation5_spill] sm:$0xff] %v10215_v18  ;;  %12505 = vst [vmem:[#allocation6_spill] sm:$0xff] %v10219_v21  ;;  %2894 = vrot.lane.b32.xlu1 %v7032_v44, %s8788_s9  ;;  %v2311_v6 = vsel %vm8879_vm2, %v2309_v45, %v2310_v13  ;;  %v1505_v49 = vshll.u32 %v10203_v29, 16  ;;  %v1509_v63 = vshrl.u32 %v10203_v29, 16  ;;  %v1515_v20 = vshll.u32 %v10206_v11, 16  ;;  %7829 = vmatprep.mubr.msk.bf16.mxu1 %vm3684_vm8, %v10219_v21 }
 0x141   : > { %v1464_v41 = vsel %vm8920_vm5, %v1459_v43, %v10158_v62  ;;  %v7096_v51 = vcombine.low %v2308_v48, %v2311_v6  ;;  %v2302_v34 = vsel %vm8879_vm2, %v6912_v9, %v2301_v36  ;;  %v2303_v26 = vrot.slane %v2301_v36, 4  ;;  %7830 = vmatmul.mubr.msk.bf16.gmra.mrb[32].mxu1 %vm3684_vm8, %v10215_v18  ;;  %7965 = vmatprep.mubr.msk.bf16.mxu0 %vm3684_vm8, %v10219_v21  ;;  %v8626_v6 = vld [vmem:[%s12470_s1 + $0x20] ss:$0 sps:$4 sm:$0xff]  }
 0x142   : > { %v7031_v58 = vcombine.low %v1454_v2, %v1464_v41  ;;  %v10246_v7 = vrot.slane %v1505_v49, 5  ;;  %v1511_v16 = vrot.slane %v1509_v63, 4  ;;  %v1517_v62 = vrot.slane %v1515_v20, 5  ;;  %7966 = vmatmul.mubr.msk.bf16.gmra.mrb[36].mxu0 %vm3684_vm8, %v10215_v18  ;;  %v8627_v41 = vld [vmem:[%s8877_s7 + $0xd0] sm:$0xf] }
 0x143   : > { %v2305_v32 = vsel %vm8879_vm2, %v2303_v26, %v2304_v38  ;;  %v1519_v12 = vshrl.u32 %v10206_v11, 16  ;;  %v1525_v56 = vshll.u32 %v10225_v46, 16  ;;  %v2323_v57 = vrot.slane %v10225_v46, 5  ;;  %v10269_v26 = vpop.permute.xlu1 %3174 }
 0x144   : > { %2892 = vrot.lane.b32.xlu0 %v7031_v58, %s8788_s9  ;;  %3214 = vrot.lane.b32.xlu1 %v7096_v51, %s8787_s8  ;;  %v7095_v8 = vcombine.low %v2302_v34, %v2305_v32  ;;  %v1512_v50 = vor.u32 %v1511_v16, %v10246_v7  ;;  %v1486_v13 = vshrl.u32 %v10238_v35, 16  ;;  %v1489_v9 = vshll.u32 %v10238_v35, 16  ;;  %v8628_v51 = vld [vmem:[%s8877_s7 + $0xd4] sm:$0xf]  ;;  %v8629_v32 = vld [vmem:[%s8877_s7 + $0xc8] sm:$0xf] }
 0x145   : > { %v1521_v38 = vrot.slane %v1519_v12, 4  ;;  %v1527_v44 = vrot.slane %v1525_v56, 5  ;;  %v1495_v2 = vshll.u32 %v377_v14, 16  ;;  %v1499_v48 = vshrl.u32 %v377_v14, 16  ;;  %v8630_v12 = vld [vmem:[%s8877_s7 + $0xcc] sm:$0xf] }
 0x146   : > { %v1513_v45 = vrot.slane %v1512_v50, 4  ;;  %v1488_v43 = vrot.slane %v1486_v13, 4  ;;  %v1491_v36 = vrot.slane %v1489_v9, 5  ;;  %v5039_v46 = vsel %vm3813_vm9, %v8626_v6, 0  ;;  %v10277_v13 = vpop.permute.xlu0 %3172 }
 0x147   : > { %v1522_v49 = vor.u32 %v1521_v38, %v1517_v62  ;;  %v1497_v63 = vrot.slane %v1495_v2, 5  ;;  %v1501_v20 = vrot.slane %v1499_v48, 4  ;;  %8060 = vmatpush3.bf16.msra.mxu0 %v5039_v46  ;;  %v6942_v34 = vcombine.low %v8627_v41, %v8628_v51  ;;  %v10309_v51 = vld [vmem:[%s8877_s7 + $0x204] sm:$0x1] }
 0x148   : > { %3212 = vrot.lane.b32.xlu0 %v7095_v8, %s8787_s8  ;;  %v1518_v58 = vsel %vm8920_vm5, %v1513_v45, %v1517_v62  ;;  %v1492_v16 = vor.u32 %v1491_v36, %v1488_v43  ;;  %v6941_v56 = vcombine.low %v8629_v32, %v8630_v12  ;;  %v2317_v50 = vrot.slane %v10203_v29, 5 }
 0x149   : > { %v1523_v9 = vrot.slane %v1522_v49, 4  ;;  %v1502_v38 = vor.u32 %v1501_v20, %v1497_v63  ;;  %v3314_v2 = vsel %vm3248_vm6, %v6942_v34, %v10010_v15  ;;  %v2320_v8 = vrot.slane %v10206_v11, 5  ;;  %v10288_v49 = vld [vmem:[%s8877_s7 + $0x1fc] sm:$0xf]  ;;  %v10312_v34 = vld [vmem:[%s8877_s7 + $0x1f4] sm:$0xf] }
 0x14a   : > { %v1493_v48 = vrot.slane %v1492_v16, 4  ;;  %v3311_v62 = vsel %vm3248_vm6, %v6941_v56, %v10013_v19  ;;  %v2319_v45 = vrot.slane %v2317_v50, 4  ;;  %v6913_v43 = vrot.slane %v10238_v35, 9  ;;  %v10299_v35 = vld [vmem:[%s8877_s7 + $0x200] sm:$0xf]  ;;  %v10322_v32 = vpop.permute.xlu0 %2856 }
 0x14b   : > { %v1528_v29 = vsel %vm8920_vm5, %v1523_v9, %v1527_v44  ;;  %v1503_v36 = vrot.slane %v1502_v38, 4  ;;  %v2322_v6 = vrot.slane %v2320_v8, 4  ;;  %v2314_v46 = vrot.slane %v377_v14, 5 }
 0x14c   : > { %v7034_v15 = vcombine.low %v1518_v58, %v1528_v29  ;;  %v1498_v11 = vsel %vm8920_vm5, %v1493_v48, %v1497_v63  ;;  %v2321_v19 = vsel %vm8879_vm2, %v2319_v45, %v2320_v8  ;;  %v10296_v20 = vsel %vm3441_vm7, %v3314_v2, %v10030_v10  ;;  %v10314_v10 = vpop.permute.xlu1 %2858  ;;  %v10330_v2 = vld [vmem:[%s8877_s7 + $0x1f8] sm:$0xf] }
 0x14d   : > { %12506 = vst [vmem:[#allocation7_spill] sm:$0xff] %v10296_v20  ;;  %v1508_v44 = vsel %vm8920_vm5, %v1503_v36, %v10246_v7  ;;  %v2324_v14 = vsel %vm8879_vm2, %v2322_v6, %v2323_v57  ;;  %v2315_v63 = vsel %vm8879_vm2, %v6913_v43, %v2314_v46  ;;  %v2316_v41 = vrot.slane %v2314_v46, 4 }
 0x14e   : > { %2898 = vrot.lane.b32.xlu1 %v7034_v15, %s8788_s9  ;;  %v7033_v58 = vcombine.low %v1498_v11, %v1508_v44  ;;  %v7098_v16 = vcombine.low %v2321_v19, %v2324_v14  ;;  %v10319_v7 = vsel %vm3441_vm7, %v3311_v62, %v10040_v5  ;;  %v1549_v57 = vshll.u32 %v10288_v49, 16  ;;  %v8631_v14 = vld [vmem:[%s8877_s7 + $0xe4] sm:$0xf] }
 0x14f   : > { %12507 = vst [vmem:[#allocation8_spill] sm:$0xff] %v10319_v7  ;;  %v2318_v12 = vsel %vm8879_vm2, %v2316_v41, %v2317_v50  ;;  %v1553_v56 = vshrl.u32 %v10288_v49, 16  ;;  %v1559_v9 = vshll.u32 %v10299_v35, 16  ;;  %v1563_v38 = vshrl.u32 %v10299_v35, 16  ;;  %7833 = vmatprep.mubr.msk.bf16.mxu1 %vm3684_vm8, %v10319_v7  ;;  %7969 = vmatprep.mubr.msk.bf16.mxu0 %vm3684_vm8, %v10319_v7 }
 0x150   : > { %2896 = vrot.lane.b32.xlu0 %v7033_v58, %s8788_s9  ;;  %v7097_v5 = vcombine.low %v2315_v63, %v2318_v12  ;;  %v1551_v8 = vrot.slane %v1549_v57, 5  ;;  %v1569_v50 = vshll.u32 %v10309_v51, 16  ;;  %v1530_v48 = vshrl.u32 %v10312_v34, 16  ;;  %7834 = vmatmul.mubr.msk.bf16.gmra.mrb[36].mxu1 %vm3684_vm8, %v10296_v20  ;;  %v8632_v63 = vld [vmem:[%s8877_s7 + $0xe8] sm:$0xf]  ;;  %v10349_v58 = vpop.permute.xlu1 %3178 }
 0x151   : > { %v1555_v62 = vrot.slane %v1553_v56, 4  ;;  %v1561_v45 = vrot.slane %v1559_v9, 5  ;;  %v1565_v43 = vrot.slane %v1563_v38, 4  ;;  %v1533_v29 = vshll.u32 %v10312_v34, 16  ;;  %7970 = vmatmul.mubr.msk.bf16.gmra.mrb[40].mxu0 %vm3684_vm8, %v10296_v20  ;;  %v8634_v56 = vld [vmem:[%s8877_s7 + $0xe0] sm:$0xf] }
 0x152   : > { %3218 = vrot.lane.b32.xlu1 %v7098_v16, %s8787_s8  ;;  %v1571_v36 = vrot.slane %v1569_v50, 5  ;;  %v1532_v6 = vrot.slane %v1530_v48, 4  ;;  %v1539_v46 = vshll.u32 %v10330_v2, 16  ;;  %v1543_v15 = vshrl.u32 %v10330_v2, 16  ;;  %v8633_v16 = vld [vmem:[%s8877_s7 + $0xdc] sm:$0xf]  ;;  %v10355_v50 = vpop.permute.xlu0 %3176 }
 0x153   : > { %v1556_v11 = vor.u32 %v1555_v62, %v1551_v8  ;;  %v1566_v19 = vor.u32 %v1565_v43, %v1561_v45  ;;  %v1535_v44 = vrot.slane %v1533_v29, 5  ;;  %v6944_v41 = vcombine.low %v8631_v14, %v8632_v63 }
 0x154   : > { %3216 = vrot.lane.b32.xlu0 %v7097_v5, %s8787_s8  ;;  %v1541_v57 = vrot.slane %v1539_v46, 5  ;;  %v1545_v12 = vrot.slane %v1543_v15, 4  ;;  %v6943_v9 = vcombine.low %v8633_v16, %v8634_v56  ;;  %v2330_v38 = vrot.slane %v10288_v49, 5  ;;  %v10383_v16 = vpop.permute.xlu1 %2862 }
 0x155   : > { %v1557_v48 = vrot.slane %v1556_v11, 4  ;;  %v1567_v62 = vrot.slane %v1566_v19, 4  ;;  %v1536_v43 = vor.u32 %v1535_v44, %v1532_v6  ;;  %v3320_v29 = vsel %vm3248_vm6, %v6944_v41, %v10087_v52  ;;  %v10368_v19 = vld [vmem:[%s8877_s7 + $0x210] sm:$0xf] }
 0x156   : > { %v1546_v14 = vor.u32 %v1545_v12, %v1541_v57  ;;  %v3317_v5 = vsel %vm3248_vm6, %v6943_v9, %v10092_v33  ;;  %v2332_v46 = vrot.slane %v2330_v38, 4  ;;  %v2333_v15 = vrot.slane %v10299_v35, 5  ;;  %v10381_v12 = vld [vmem:[%s8877_s7 + $0x214] sm:$0xf]  ;;  %v10399_v9 = vld [vmem:[%s8877_s7 + $0x208] sm:$0xf] }
 0x157   : > { %v1562_v63 = vsel %vm8920_vm5, %v1557_v48, %v1561_v45  ;;  %v1572_v49 = vsel %vm8920_vm5, %v1567_v62, %v1571_v36  ;;  %v1537_v11 = vrot.slane %v1536_v43, 4  ;;  %v2336_v6 = vrot.slane %v10309_v51, 5  ;;  %v10401_v48 = vpop.permute.xlu0 %2860 }
 0x158   : > { %v7036_v52 = vcombine.low %v1562_v63, %v1572_v49  ;;  %v1547_v44 = vrot.slane %v1546_v14, 4  ;;  %v2334_v33 = vsel %vm8879_vm2, %v2332_v46, %v2333_v15  ;;  %v2335_v41 = vrot.slane %v2333_v15, 4  ;;  %v10415_v15 = vld [vmem:[%s8877_s7 + $0x20c] sm:$0xf] }
 0x159   : > { %v1542_v35 = vsel %vm8920_vm5, %v1537_v11, %v1541_v57  ;;  %v6914_v45 = vrot.slane %v10312_v34, 9  ;;  %v2327_v36 = vrot.slane %v10330_v2, 5  ;;  %v10378_v51 = vsel %vm3441_vm7, %v3320_v29, %v10110_v37  ;;  %v10395_v2 = vld [vmem:[%s8877_s7 + $0x218] sm:$0x1] }
 0x15a   : > { %12508 = vst [vmem:[#allocation9_spill] sm:$0xff] %v10378_v51  ;;  %2902 = vrot.lane.b32.xlu1 %v7036_v52, %s8788_s9  ;;  %v1552_v56 = vsel %vm8920_vm5, %v1547_v44, %v1551_v8  ;;  %v2337_v57 = vsel %vm8879_vm2, %v2335_v41, %v2336_v6  ;;  %v10392_v34 = vsel %vm3441_vm7, %v3317_v5, %v10119_v61  ;;  %v1593_v37 = vshll.u32 %v10368_v19, 16 }
 0x15b   : > { %12509 = vst [vmem:[#allocation10_spill] sm:$0xff] %v10392_v34  ;;  %v7035_v62 = vcombine.low %v1542_v35, %v1552_v56  ;;  %v7100_v43 = vcombine.low %v2334_v33, %v2337_v57  ;;  %v2328_v8 = vsel %vm8879_vm2, %v6914_v45, %v2327_v36  ;;  %v2329_v29 = vrot.slane %v2327_v36, 4  ;;  %7837 = vmatprep.mubr.msk.bf16.mxu1 %vm3684_vm8, %v10392_v34  ;;  %v10429_v56 = vpop.permute.xlu1 %3182 }
 0x15c   : > { %7973 = vmatprep.mubr.msk.bf16.mxu0 %vm3684_vm8, %v10392_v34  ;;  %v10409_v61 = vrot.slane %v1593_v37, 5  ;;  %v1597_v14 = vshrl.u32 %v10368_v19, 16  ;;  %v1603_v5 = vshll.u32 %v10381_v12, 16  ;;  %v1607_v46 = vshrl.u32 %v10381_v12, 16  ;;  %7838 = vmatmul.mubr.msk.bf16.gmra.mrb[40].mxu1 %vm3684_vm8, %v10378_v51 }
 0x15d   : > { %7974 = vmatmul.mubr.msk.bf16.gmra.mrb[44].mxu0 %vm3684_vm8, %v10378_v51  ;;  %2900 = vrot.lane.b32.xlu0 %v7035_v62, %s8788_s9  ;;  %v2331_v63 = vsel %vm8879_vm2, %v2329_v29, %v2330_v38  ;;  %v1613_v49 = vshll.u32 %v10395_v2, 16  ;;  %v1574_v11 = vshrl.u32 %v10399_v9, 16  ;;  %v1577_v6 = vshll.u32 %v10399_v9, 16  ;;  %v8635_v29 = vld [vmem:[%s8877_s7 + $0xf8] sm:$0xf] }
 0x15e   : > { %3222 = vrot.lane.b32.xlu1 %v7100_v43, %s8787_s8  ;;  %v7099_v52 = vcombine.low %v2328_v8, %v2331_v63  ;;  %v1599_v44 = vrot.slane %v1597_v14, 4  ;;  %v1605_v33 = vrot.slane %v1603_v5, 5  ;;  %v1609_v41 = vrot.slane %v1607_v46, 4  ;;  %v8636_v43 = vld [vmem:[%s8877_s7 + $0xfc] sm:$0xf]  ;;  %v10435_v14 = vpop.permute.xlu0 %3180 }
 0x15f   : > { %v1615_v35 = vrot.slane %v1613_v49, 5  ;;  %v1576_v45 = vrot.slane %v1574_v11, 4  ;;  %v1579_v36 = vrot.slane %v1577_v6, 5  ;;  %v1583_v38 = vshll.u32 %v10415_v15, 16  ;;  %v8637_v63 = vld [vmem:[%s8877_s7 + $0xf0] sm:$0xf] }
 0x160   : > { %v1600_v57 = vor.u32 %v1599_v44, %v10409_v61  ;;  %v1610_v37 = vor.u32 %v1609_v41, %v1605_v33  ;;  %v1587_v62 = vshrl.u32 %v10415_v15, 16  ;;  %v6946_v8 = vcombine.low %v8635_v29, %v8636_v43  ;;  %v8638_v49 = vld [vmem:[%s8877_s7 + $0xf4] sm:$0xf] }
 0x161   : > { %3220 = vrot.lane.b32.xlu0 %v7099_v52, %s8787_s8  ;;  %v1580_v5 = vor.u32 %v1579_v36, %v1576_v45  ;;  %v1585_v46 = vrot.slane %v1583_v38, 5  ;;  %v6945_v11 = vcombine.low %v8637_v63, %v8638_v49  ;;  %v2343_v6 = vrot.slane %v10368_v19, 5 }
 0x162   : > { %v1601_v51 = vrot.slane %v1600_v57, 4  ;;  %v1611_v44 = vrot.slane %v1610_v37, 4  ;;  %v1589_v41 = vrot.slane %v1587_v62, 4  ;;  %v3326_v34 = vsel %vm3248_vm6, %v6946_v8, %v10167_v25  ;;  %v10452_v57 = vld [vmem:[%s8877_s7 + $0x224] sm:$0xf]  ;;  %v10458_v62 = vpop.permute.xlu1 %2866 }
 0x163   : > { %v1581_v20 = vrot.slane %v1580_v5, 4  ;;  %v3323_v29 = vsel %vm3248_vm6, %v6945_v11, %v10175_v39  ;;  %v2345_v43 = vrot.slane %v2343_v6, 4  ;;  %v2346_v52 = vrot.slane %v10381_v12, 5  ;;  %v10467_v8 = vld [vmem:[%s8877_s7 + $0x228] sm:$0xf]  ;;  %v10469_v5 = vpop.permute.xlu0 %2864 }
 0x164   : > { %v1606_v45 = vsel %vm8920_vm5, %v1601_v51, %v1605_v33  ;;  %v1616_v19 = vsel %vm8920_vm5, %v1611_v44, %v1615_v35  ;;  %v1590_v36 = vor.u32 %v1589_v41, %v1585_v46  ;;  %v2349_v38 = vrot.slane %v10395_v2, 5 }
 0x165   : > { %v7038_v25 = vcombine.low %v1606_v45, %v1616_v19  ;;  %v1586_v39 = vsel %vm8920_vm5, %v1581_v20, %v1585_v46  ;;  %v2347_v12 = vsel %vm8879_vm2, %v2345_v43, %v2346_v52  ;;  %v2348_v37 = vrot.slane %v2346_v52, 4  ;;  %v392_v52 = vld [vmem:[%s8877_s7 + $0x220] sm:$0xf] }
 0x166   : > { %v1591_v51 = vrot.slane %v1590_v36, 4  ;;  %v6915_v33 = vrot.slane %v10399_v9, 9  ;;  %v2340_v35 = vrot.slane %v10415_v15, 5  ;;  %v10464_v2 = vsel %vm3441_vm7, %v3326_v34, %v10191_v24  ;;  %v10479_v9 = vld [vmem:[%s8877_s7 + $0x22c] sm:$0x1] }
 0x167   : > { %12510 = vst [vmem:[#allocation11_spill] sm:$0xff] %v10464_v2  ;;  %2906 = vrot.lane.b32.xlu1 %v7038_v25, %s8788_s9  ;;  %v2350_v20 = vsel %vm8879_vm2, %v2348_v37, %v2349_v38  ;;  %v10476_v46 = vsel %vm3441_vm7, %v3323_v29, %v10196_v53  ;;  %v1637_v15 = vshll.u32 %v10452_v57, 16  ;;  %v1641_v24 = vshrl.u32 %v10452_v57, 16  ;;  %v10484_v34 = vld [vmem:[%s8877_s7 + $0x21c] sm:$0xf] }
 0x168   : > { %12511 = vst [vmem:[#allocation12_spill] sm:$0xff] %v10476_v46  ;;  %v1596_v63 = vsel %vm8920_vm5, %v1591_v51, %v10409_v61  ;;  %v7102_v49 = vcombine.low %v2347_v12, %v2350_v20  ;;  %v2341_v11 = vsel %vm8879_vm2, %v6915_v33, %v2340_v35  ;;  %v2342_v44 = vrot.slane %v2340_v35, 4  ;;  %7841 = vmatprep.mubr.msk.bf16.mxu1 %vm3684_vm8, %v10476_v46  ;;  %v10514_v20 = vpop.permute.xlu0 %3184 }
 0x169   : > { %7977 = vmatprep.mubr.msk.bf16.mxu0 %vm3684_vm8, %v10476_v46  ;;  %v7037_v53 = vcombine.low %v1586_v39, %v1596_v63  ;;  %v10495_v41 = vrot.slane %v1637_v15, 5  ;;  %v1643_v29 = vrot.slane %v1641_v24, 4  ;;  %v1647_v43 = vshll.u32 %v10467_v8, 16  ;;  %7842 = vmatmul.mubr.msk.bf16.gmra.mrb[44].mxu1 %vm3684_vm8, %v10464_v2 }
 0x16a   : > { %7978 = vmatmul.mubr.msk.bf16.gmra.mrb[48].mxu0 %vm3684_vm8, %v10464_v2  ;;  %v2344_v61 = vsel %vm8879_vm2, %v2342_v44, %v2343_v6  ;;  %v1651_v45 = vshrl.u32 %v10467_v8, 16  ;;  %v1657_v19 = vshll.u32 %v10479_v9, 16  ;;  %v1618_v36 = vshrl.u32 %v10484_v34, 16  ;;  %v10512_v6 = vpop.permute.xlu1 %3186 }
 0x16b   : > { %2904 = vrot.lane.b32.xlu0 %v7037_v53, %s8788_s9  ;;  %3226 = vrot.lane.b32.xlu1 %v7102_v49, %s8787_s8  ;;  %v7101_v38 = vcombine.low %v2341_v11, %v2344_v61  ;;  %v1644_v25 = vor.u32 %v1643_v29, %v10495_v41  ;;  %v1649_v39 = vrot.slane %v1647_v43, 5  ;;  %v1621_v12 = vshll.u32 %v10484_v34, 16  ;;  %v8639_v49 = vld [vmem:[%s8877_s7 + $0x10c] sm:$0xf]  ;;  %v8640_v11 = vld [vmem:[%s8877_s7 + $0x110] sm:$0xf] }
 0x16c   : > { %v1653_v37 = vrot.slane %v1651_v45, 4  ;;  %v1659_v51 = vrot.slane %v1657_v19, 5  ;;  %v1620_v33 = vrot.slane %v1618_v36, 4  ;;  %v1627_v35 = vshll.u32 %v392_v52, 16  ;;  %v8641_v43 = vld [vmem:[%s8877_s7 + $0x104] sm:$0xf] }
 0x16d   : > { %v1645_v15 = vrot.slane %v1644_v25, 4  ;;  %v1623_v24 = vrot.slane %v1621_v12, 5  ;;  %v1631_v63 = vshrl.u32 %v392_v52, 16  ;;  %v6948_v44 = vcombine.low %v8639_v49, %v8640_v11  ;;  %v8642_v61 = vld [vmem:[%s8877_s7 + $0x108] sm:$0xf] }
 0x16e   : > { %v1654_v53 = vor.u32 %v1653_v37, %v1649_v39  ;;  %v1629_v29 = vrot.slane %v1627_v35, 5  ;;  %v6947_v2 = vcombine.low %v8641_v43, %v8642_v61  ;;  %v2356_v46 = vrot.slane %v10452_v57, 5 }
 0x16f   : > { %3224 = vrot.lane.b32.xlu0 %v7101_v38, %s8787_s8  ;;  %v1650_v45 = vsel %vm8920_vm5, %v1645_v15, %v1649_v39  ;;  %v1624_v19 = vor.u32 %v1623_v24, %v1620_v33  ;;  %v1633_v36 = vrot.slane %v1631_v63, 4  ;;  %v3332_v25 = vsel %vm3248_vm6, %v6948_v44, %v10244_v54  ;;  %v10531_v33 = vpop.permute.xlu1 %2870  ;;  %v10538_v24 = vld [vmem:[%s8877_s7 + $0x238] sm:$0xf] }
 0x170   : > { %v1655_v12 = vrot.slane %v1654_v53, 4  ;;  %v3329_v37 = vsel %vm3248_vm6, %v6947_v2, %v10251_v31  ;;  %v2358_v35 = vrot.slane %v2356_v46, 4  ;;  %v2359_v49 = vrot.slane %v10467_v8, 5  ;;  %v10540_v8 = vpop.permute.xlu0 %2868 }
 0x171   : > { %v1625_v57 = vrot.slane %v1624_v19, 4  ;;  %v1634_v11 = vor.u32 %v1633_v36, %v1629_v29  ;;  %v2362_v38 = vrot.slane %v10479_v9, 5  ;;  %v6916_v39 = vrot.slane %v10484_v34, 9 }
 0x172   : > { %v1660_v54 = vsel %vm8920_vm5, %v1655_v12, %v1659_v51  ;;  %v2360_v15 = vsel %vm8879_vm2, %v2358_v35, %v2359_v49  ;;  %v2361_v31 = vrot.slane %v2359_v49, 4  ;;  %v2353_v2 = vrot.slane %v392_v52, 5  ;;  %v10549_v51 = vld [vmem:[%s8877_s7 + $0x23c] sm:$0xf]  ;;  %v10578_v49 = vld [vmem:[%s8877_s7 + $0x234] sm:$0xf] }
 0x173   : > { %v7040_v63 = vcombine.low %v1650_v45, %v1660_v54  ;;  %v1630_v9 = vsel %vm8920_vm5, %v1625_v57, %v1629_v29  ;;  %v1635_v34 = vrot.slane %v1634_v11, 4  ;;  %v10546_v44 = vsel %vm3441_vm7, %v3332_v25, %v10269_v26  ;;  %v10560_v29 = vld [vmem:[%s8877_s7 + $0x240] sm:$0x1]  ;;  %v10569_v25 = vld [vmem:[%s8877_s7 + $0x230] sm:$0xf] }
 0x174   : > { %12512 = vst [vmem:[#allocation13_spill] sm:$0xff] %v10546_v44  ;;  %v2363_v53 = vsel %vm8879_vm2, %v2361_v31, %v2362_v38  ;;  %v2354_v52 = vsel %vm8879_vm2, %v6916_v39, %v2353_v2  ;;  %v2355_v43 = vrot.slane %v2353_v2, 4  ;;  %v10557_v61 = vsel %vm3441_vm7, %v3329_v37, %v10277_v13  ;;  %v10592_v2 = vpop.permute.xlu0 %3188 }
 0x175   : > { %12513 = vst [vmem:[#allocation14_spill] sm:$0xff] %v10557_v61  ;;  %2910 = vrot.lane.b32.xlu1 %v7040_v63, %s8788_s9  ;;  %v1640_v26 = vsel %vm8920_vm5, %v1635_v34, %v10495_v41  ;;  %v7104_v45 = vcombine.low %v2360_v15, %v2363_v53  ;;  %v1681_v19 = vshll.u32 %v10538_v24, 16  ;;  %v1685_v36 = vshrl.u32 %v10538_v24, 16  ;;  %7845 = vmatprep.mubr.msk.bf16.mxu1 %vm3684_vm8, %v10557_v61 }
 0x176   : > { %v7039_v13 = vcombine.low %v1630_v9, %v1640_v26  ;;  %v2357_v12 = vsel %vm8879_vm2, %v2355_v43, %v2356_v46  ;;  %v1691_v37 = vshll.u32 %v10549_v51, 16  ;;  %v1695_v35 = vshrl.u32 %v10549_v51, 16  ;;  %7846 = vmatmul.mubr.msk.bf16.gmra.mrb[48].mxu1 %vm3684_vm8, %v10546_v44  ;;  %7981 = vmatprep.mubr.msk.bf16.mxu0 %vm3684_vm8, %v10557_v61  ;;  %v10587_v46 = vpop.permute.xlu1 %3190  ;;  %v8646_v61 = vld [vmem:[%s8877_s7 + $0x11c] sm:$0xf] }
 0x177   : > { %v7103_v41 = vcombine.low %v2354_v52, %v2357_v12  ;;  %v1683_v57 = vrot.slane %v1681_v19, 5  ;;  %v1687_v11 = vrot.slane %v1685_v36, 4  ;;  %v1701_v38 = vshll.u32 %v10560_v29, 16  ;;  %7982 = vmatmul.mubr.msk.bf16.gmra.mrb[52].mxu0 %vm3684_vm8, %v10546_v44  ;;  %v8643_v19 = vld [vmem:[%s8877_s7 + $0x120] sm:$0xf] }
 0x178   : > { %2908 = vrot.lane.b32.xlu0 %v7039_v13, %s8788_s9  ;;  %v1693_v39 = vrot.slane %v1691_v37, 5  ;;  %v1697_v54 = vrot.slane %v1695_v35, 4  ;;  %v1662_v15 = vshrl.u32 %v10569_v25, 16  ;;  %v1665_v31 = vshll.u32 %v10569_v25, 16  ;;  %v8644_v36 = vld [vmem:[%s8877_s7 + $0x124] sm:$0xf] }
 0x179   : > { %3230 = vrot.lane.b32.xlu1 %v7104_v45, %s8787_s8  ;;  %v1688_v63 = vor.u32 %v1687_v11, %v1683_v57  ;;  %v1703_v9 = vrot.slane %v1701_v38, 5  ;;  %v1671_v34 = vshll.u32 %v10578_v49, 16  ;;  %v1675_v53 = vshrl.u32 %v10578_v49, 16  ;;  %v8645_v44 = vld [vmem:[%s8877_s7 + $0x118] sm:$0xf] }
 0x17a   : > { %v1698_v52 = vor.u32 %v1697_v54, %v1693_v39  ;;  %v1664_v43 = vrot.slane %v1662_v15, 4  ;;  %v1667_v26 = vrot.slane %v1665_v31, 5  ;;  %v6950_v13 = vcombine.low %v8643_v19, %v8644_v36  ;;  %v10631_v19 = vld [vmem:[%s8877_s7 + $0x250] sm:$0xf] }
 0x17b   : > { %v1689_v12 = vrot.slane %v1688_v63, 4  ;;  %v1673_v37 = vrot.slane %v1671_v34, 5  ;;  %v1677_v35 = vrot.slane %v1675_v53, 4  ;;  %v6949_v7 = vcombine.low %v8645_v44, %v8646_v61  ;;  %v10610_v44 = vpop.permute.xlu1 %2874 }
 0x17c   : > { %3228 = vrot.lane.b32.xlu0 %v7103_v41, %s8787_s8  ;;  %v1699_v45 = vrot.slane %v1698_v52, 4  ;;  %v1668_v11 = vor.u32 %v1667_v26, %v1664_v43  ;;  %v3338_v38 = vsel %vm3248_vm6, %v6950_v13, %v10314_v10  ;;  %v2369_v54 = vrot.slane %v10538_v24, 5  ;;  %v10616_v24 = vld [vmem:[%s8877_s7 + $0x24c] sm:$0xf] }
 0x17d   : > { %v1694_v15 = vsel %vm8920_vm5, %v1689_v12, %v1693_v39  ;;  %v1678_v31 = vor.u32 %v1677_v35, %v1673_v37  ;;  %v3335_v63 = vsel %vm3248_vm6, %v6949_v7, %v10322_v32  ;;  %v2372_v34 = vrot.slane %v10549_v51, 5  ;;  %v10618_v39 = vpop.permute.xlu0 %2872  ;;  %v10647_v12 = vld [vmem:[%s8877_s7 + $0x244] sm:$0xf] }
 0x17e   : > { %v1704_v61 = vsel %vm8920_vm5, %v1699_v45, %v1703_v9  ;;  %v1669_v41 = vrot.slane %v1668_v11, 4  ;;  %v2371_v53 = vrot.slane %v2369_v54, 4  ;;  %v2375_v10 = vrot.slane %v10560_v29, 5 }
 0x17f   : > { %v7042_v52 = vcombine.low %v1694_v15, %v1704_v61  ;;  %v1679_v7 = vrot.slane %v1678_v31, 4  ;;  %v2374_v32 = vrot.slane %v2372_v34, 4  ;;  %v6917_v51 = vrot.slane %v10569_v25, 9  ;;  %v10661_v31 = vld [vmem:[%s8877_s7 + $0x248] sm:$0xf] }
 0x180   : > { %v1674_v43 = vsel %vm8920_vm5, %v1669_v41, %v1673_v37  ;;  %v2373_v9 = vsel %vm8879_vm2, %v2371_v53, %v2372_v34  ;;  %v2366_v26 = vrot.slane %v10578_v49, 5  ;;  %v10628_v29 = vsel %vm3441_vm7, %v3338_v38, %v10349_v58  ;;  %v10643_v49 = vld [vmem:[%s8877_s7 + $0x254] sm:$0x1] }
 0x181   : > { %12514 = vst [vmem:[#allocation15_spill] sm:$0xff] %v10628_v29  ;;  %2914 = vrot.lane.b32.xlu1 %v7042_v52, %s8788_s9  ;;  %v1684_v36 = vsel %vm8920_vm5, %v1679_v7, %v1683_v57  ;;  %v2376_v25 = vsel %vm8879_vm2, %v2374_v32, %v2375_v10  ;;  %v10640_v13 = vsel %vm3441_vm7, %v3335_v63, %v10355_v50  ;;  %v1725_v58 = vshll.u32 %v10616_v24, 16  ;;  %v10667_v63 = vpop.permute.xlu1 %3194  ;;  %v10675_v10 = vpop.permute.xlu0 %3192 }
 0x182   : > { %12515 = vst [vmem:[#allocation16_spill] sm:$0xff] %v10640_v13  ;;  %v7041_v37 = vcombine.low %v1674_v43, %v1684_v36  ;;  %v7106_v35 = vcombine.low %v2373_v9, %v2376_v25  ;;  %v2367_v45 = vsel %vm8879_vm2, %v6917_v51, %v2366_v26  ;;  %v2368_v57 = vrot.slane %v2366_v26, 4  ;;  %7849 = vmatprep.mubr.msk.bf16.mxu1 %vm3684_vm8, %v10640_v13 }
 0x183   : > { %7985 = vmatprep.mubr.msk.bf16.mxu0 %vm3684_vm8, %v10640_v13  ;;  %v10655_v50 = vrot.slane %v1725_v58, 5  ;;  %v1729_v11 = vshrl.u32 %v10616_v24, 16  ;;  %v1735_v38 = vshll.u32 %v10631_v19, 16  ;;  %v1739_v15 = vshrl.u32 %v10631_v19, 16  ;;  %7850 = vmatmul.mubr.msk.bf16.gmra.mrb[52].mxu1 %vm3684_vm8, %v10628_v29 }
 0x184   : > { %7986 = vmatmul.mubr.msk.bf16.gmra.mrb[56].mxu0 %vm3684_vm8, %v10628_v29  ;;  %2912 = vrot.lane.b32.xlu0 %v7041_v37, %s8788_s9  ;;  %v2370_v34 = vsel %vm8879_vm2, %v2368_v57, %v2369_v54  ;;  %v1745_v61 = vshll.u32 %v10643_v49, 16  ;;  %v1706_v41 = vshrl.u32 %v10647_v12, 16  ;;  %v1709_v53 = vshll.u32 %v10647_v12, 16  ;;  %v8647_v37 = vld [vmem:[%s8877_s7 + $0x134] sm:$0xf] }
 0x185   : > { %3234 = vrot.lane.b32.xlu1 %v7106_v35, %s8787_s8  ;;  %v7105_v52 = vcombine.low %v2367_v45, %v2370_v34  ;;  %v1731_v7 = vrot.slane %v1729_v11, 4  ;;  %v1737_v32 = vrot.slane %v1735_v38, 5  ;;  %v1741_v51 = vrot.slane %v1739_v15, 4  ;;  %v8648_v57 = vld [vmem:[%s8877_s7 + $0x138] sm:$0xf] }
 0x186   : > { %v1747_v43 = vrot.slane %v1745_v61, 5  ;;  %v1708_v54 = vrot.slane %v1706_v41, 4  ;;  %v1711_v9 = vrot.slane %v1709_v53, 5  ;;  %v1715_v26 = vshll.u32 %v10661_v31, 16  ;;  %v8649_v11 = vld [vmem:[%s8877_s7 + $0x12c] sm:$0xf] }
 0x187   : > { %v1732_v36 = vor.u32 %v1731_v7, %v10655_v50  ;;  %v1742_v25 = vor.u32 %v1741_v51, %v1737_v32  ;;  %v1719_v58 = vshrl.u32 %v10661_v31, 16  ;;  %v6952_v29 = vcombine.low %v8647_v37, %v8648_v57  ;;  %v8650_v38 = vld [vmem:[%s8877_s7 + $0x130] sm:$0xf]  ;;  %v10689_v51 = vpop.permute.xlu1 %2878 }
 0x188   : > { %3232 = vrot.lane.b32.xlu0 %v7105_v52, %s8787_s8  ;;  %v1712_v35 = vor.u32 %v1711_v9, %v1708_v54  ;;  %v1717_v45 = vrot.slane %v1715_v26, 5  ;;  %v6951_v15 = vcombine.low %v8649_v11, %v8650_v38  ;;  %v2382_v34 = vrot.slane %v10616_v24, 5  ;;  %v10694_v26 = vpop.permute.xlu0 %2876  ;;  %v10725_v11 = vld [vmem:[%s8877_s7 + $0x268] sm:$0x1] }
 0x189   : > { %v1733_v61 = vrot.slane %v1732_v36, 4  ;;  %v1743_v41 = vrot.slane %v1742_v25, 4  ;;  %v1721_v53 = vrot.slane %v1719_v58, 4  ;;  %v3344_v7 = vsel %vm3248_vm6, %v6952_v29, %v10383_v16  ;;  %v10702_v25 = vld [vmem:[%s8877_s7 + $0x260] sm:$0xf] }
 0x18a   : > { %v1713_v13 = vrot.slane %v1712_v35, 4  ;;  %v3341_v52 = vsel %vm3248_vm6, %v6951_v15, %v10401_v48  ;;  %v2384_v54 = vrot.slane %v2382_v34, 4  ;;  %v2385_v9 = vrot.slane %v10631_v19, 5 }
 0x18b   : > { %v1738_v24 = vsel %vm8920_vm5, %v1733_v61, %v1737_v32  ;;  %v1748_v36 = vsel %vm8920_vm5, %v1743_v41, %v1747_v43  ;;  %v1722_v16 = vor.u32 %v1721_v53, %v1717_v45  ;;  %v2388_v29 = vrot.slane %v10643_v49, 5  ;;  %v10715_v49 = vld [vmem:[%s8877_s7 + $0x264] sm:$0xf] }
 0x18c   : > { %v7044_v48 = vcombine.low %v1738_v24, %v1748_v36  ;;  %v1718_v58 = vsel %vm8920_vm5, %v1713_v13, %v1717_v45  ;;  %v2386_v19 = vsel %vm8879_vm2, %v2384_v54, %v2385_v9  ;;  %v2387_v37 = vrot.slane %v2385_v9, 4  ;;  %v10753_v36 = vpop.permute.xlu0 %3196 }
 0x18d   : > { %v1723_v57 = vrot.slane %v1722_v16, 4  ;;  %v6918_v32 = vrot.slane %v10647_v12, 9  ;;  %v2379_v43 = vrot.slane %v10661_v31, 5  ;;  %v10712_v35 = vsel %vm3441_vm7, %v3344_v7, %v10429_v56  ;;  %v10730_v56 = vld [vmem:[%s8877_s7 + $0x258] sm:$0xf] }
 0x18e   : > { %12516 = vst [vmem:[#allocation17_spill] sm:$0xff] %v10712_v35  ;;  %2918 = vrot.lane.b32.xlu1 %v7044_v48, %s8788_s9  ;;  %v2389_v13 = vsel %vm8879_vm2, %v2387_v37, %v2388_v29  ;;  %v10722_v45 = vsel %vm3441_vm7, %v3341_v52, %v10435_v14  ;;  %v1769_v38 = vshll.u32 %v10702_v25, 16  ;;  %v1773_v15 = vshrl.u32 %v10702_v25, 16  ;;  %v10741_v14 = vpop.permute.xlu1 %3198 }
 0x18f   : > { %12517 = vst [vmem:[#allocation18_spill] sm:$0xff] %v10722_v45  ;;  %v1728_v61 = vsel %vm8920_vm5, %v1723_v57, %v10655_v50  ;;  %v7108_v41 = vcombine.low %v2386_v19, %v2389_v13  ;;  %v2380_v53 = vsel %vm8879_vm2, %v6918_v32, %v2379_v43  ;;  %v2381_v7 = vrot.slane %v2379_v43, 4  ;;  %7853 = vmatprep.mubr.msk.bf16.mxu1 %vm3684_vm8, %v10722_v45  ;;  %v10747_v50 = vld [vmem:[%s8877_s7 + $0x25c] sm:$0xf] }
 0x190   : > { %7989 = vmatprep.mubr.msk.bf16.mxu0 %vm3684_vm8, %v10722_v45  ;;  %v7043_v52 = vcombine.low %v1718_v58, %v1728_v61  ;;  %v10743_v54 = vrot.slane %v1769_v38, 5  ;;  %v1775_v9 = vrot.slane %v1773_v15, 4  ;;  %v1779_v24 = vshll.u32 %v10715_v49, 16  ;;  %7854 = vmatmul.mubr.msk.bf16.gmra.mrb[56].mxu1 %vm3684_vm8, %v10712_v35 }
 0x191   : > { %7990 = vmatmul.mubr.msk.bf16.gmra.mrb[60].mxu0 %vm3684_vm8, %v10712_v35  ;;  %v2383_v16 = vsel %vm8879_vm2, %v2381_v7, %v2382_v34  ;;  %v1783_v29 = vshrl.u32 %v10715_v49, 16  ;;  %v1789_v48 = vshll.u32 %v10725_v11, 16  ;;  %v1750_v58 = vshrl.u32 %v10730_v56, 16  ;;  %v8651_v7 = vld [vmem:[%s8877_s7 + $0x148] sm:$0xf] }
 0x192   : > { %8061 = vmatprep.mubr.msk.bf16.mxu0 %vm3684_vm8, %v9623_v27  ;;  %2916 = vrot.lane.b32.xlu0 %v7043_v52, %s8788_s9  ;;  %v7107_v19 = vcombine.low %v2380_v53, %v2383_v16  ;;  %v1776_v37 = vor.u32 %v1775_v9, %v10743_v54  ;;  %v1781_v34 = vrot.slane %v1779_v24, 5  ;;  %v1753_v57 = vshll.u32 %v10730_v56, 16  ;;  %v8652_v52 = vld [vmem:[%s8877_s7 + $0x14c] sm:$0xf]  ;;  %v8653_v35 = vld [vmem:[%s8877_s7 + $0x140] sm:$0xf]  ;;  %v10773_v18 = vpop.permute.xlu1 %2882 }
 0x193   : > { %3238 = vrot.lane.b32.xlu1 %v7108_v41, %s8787_s8  ;;  %v1785_v32 = vrot.slane %v1783_v29, 4  ;;  %v1791_v43 = vrot.slane %v1789_v48, 5  ;;  %v1752_v13 = vrot.slane %v1750_v58, 4  ;;  %v1759_v38 = vshll.u32 %v10747_v50, 16  ;;  %v8654_v9 = vld [vmem:[%s8877_s7 + $0x144] sm:$0xf] }
 0x194   : > { %v1777_v15 = vrot.slane %v1776_v37, 4  ;;  %v1755_v61 = vrot.slane %v1753_v57, 5  ;;  %v1763_v27 = vshrl.u32 %v10747_v50, 16  ;;  %v6954_v41 = vcombine.low %v8651_v7, %v8652_v52  ;;  %v10780_v57 = vpop.permute.xlu0 %2880 }
 0x195   : > { %v1786_v53 = vor.u32 %v1785_v32, %v1781_v34  ;;  %v1761_v16 = vrot.slane %v1759_v38, 5  ;;  %v6953_v45 = vcombine.low %v8653_v35, %v8654_v9  ;;  %v2395_v24 = vrot.slane %v10702_v25, 5 }
 0x196   : > { %3236 = vrot.lane.b32.xlu0 %v7107_v19, %s8787_s8  ;;  %v1782_v29 = vsel %vm8920_vm5, %v1777_v15, %v1781_v34  ;;  %v1756_v48 = vor.u32 %v1755_v61, %v1752_v13  ;;  %v1765_v58 = vrot.slane %v1763_v27, 4  ;;  %v3350_v37 = vsel %vm3248_vm6, %v6954_v41, %v10458_v62  ;;  %v10795_v61 = vld [vmem:[%s8877_s7 + $0x274] sm:$0xf]  ;;  %v10806_v41 = vld [vmem:[%s8877_s7 + $0x278] sm:$0xf] }
 0x197   : > { %v1787_v32 = vrot.slane %v1786_v53, 4  ;;  %v3347_v35 = vsel %vm3248_vm6, %v6953_v45, %v10469_v5  ;;  %v2397_v38 = vrot.slane %v2395_v24, 4  ;;  %v2398_v7 = vrot.slane %v10715_v49, 5 }
 0x198   : > { %v1757_v19 = vrot.slane %v1756_v48, 4  ;;  %v1766_v52 = vor.u32 %v1765_v58, %v1761_v16  ;;  %v2401_v34 = vrot.slane %v10725_v11, 5  ;;  %v6919_v13 = vrot.slane %v10730_v56, 9 }
 0x199   : > { %8062 = vmatmul.mubr.msk.bf16.vlgmr.msra.gmra.mrb[0].mxu0 %vm3684_vm8, %v9619_v1  ;;  %v1792_v62 = vsel %vm8920_vm5, %v1787_v32, %v1791_v43  ;;  %v2399_v5 = vsel %vm8879_vm2, %v2397_v38, %v2398_v7  ;;  %v2400_v45 = vrot.slane %v2398_v7, 4  ;;  %v2392_v15 = vrot.slane %v10747_v50, 5  ;;  %v10828_v38 = vld [vmem:[%s8877_s7 + $0x26c] sm:$0xf] }
 0x19a   : > { %8065 = vmatprep.mubr.msk.bf16.mxu0 %vm3684_vm8, %v9713_v42  ;;  %v7046_v11 = vcombine.low %v1782_v29, %v1792_v62  ;;  %v1762_v1 = vsel %vm8920_vm5, %v1757_v19, %v1761_v16  ;;  %v1767_v27 = vrot.slane %v1766_v52, 4  ;;  %v10803_v43 = vsel %vm3441_vm7, %v3350_v37, %v10512_v6  ;;  %v10817_v16 = vld [vmem:[%s8877_s7 + $0x27c] sm:$0x1]  ;;  %v10819_v29 = vpop.permute.xlu1 %3202  ;;  %v10839_v52 = vld [vmem:[%s8877_s7 + $0x270] sm:$0xf] }
 0x19b   : > { %12518 = vst [vmem:[#allocation19_spill] sm:$0xff] %v10803_v43  ;;  %v2402_v53 = vsel %vm8879_vm2, %v2400_v45, %v2401_v34  ;;  %v2393_v9 = vsel %vm8879_vm2, %v6919_v13, %v2392_v15  ;;  %v2394_v48 = vrot.slane %v2392_v15, 4  ;;  %v10814_v42 = vsel %vm3441_vm7, %v3347_v35, %v10514_v20  ;;  %v10832_v20 = vpop.permute.xlu0 %3200 }
 0x19c   : > { %12519 = vst [vmem:[#allocation20_spill] sm:$0xff] %v10814_v42  ;;  %2922 = vrot.lane.b32.xlu1 %v7046_v11, %s8788_s9  ;;  %v1772_v6 = vsel %vm8920_vm5, %v1767_v27, %v10743_v54  ;;  %v7110_v58 = vcombine.low %v2399_v5, %v2402_v53  ;;  %v1813_v37 = vshll.u32 %v10795_v61, 16  ;;  %v1817_v32 = vshrl.u32 %v10795_v61, 16  ;;  %7857 = vmatprep.mubr.msk.bf16.mxu1 %vm3684_vm8, %v10814_v42 }
 0x19d   : > { %v7045_v35 = vcombine.low %v1762_v1, %v1772_v6  ;;  %v2396_v7 = vsel %vm8879_vm2, %v2394_v48, %v2395_v24  ;;  %v1823_v19 = vshll.u32 %v10806_v41, 16  ;;  %v1827_v54 = vshrl.u32 %v10806_v41, 16  ;;  %7858 = vmatmul.mubr.msk.bf16.gmra.mrb[60].mxu1 %vm3684_vm8, %v10803_v43  ;;  %v8658_v43 = vld [vmem:[%s8877_s7 + $0x158] sm:$0xf] }
 0x19e   : > { %v7109_v34 = vcombine.low %v2393_v9, %v2396_v7  ;;  %v10843_v13 = vrot.slane %v1813_v37, 5  ;;  %v1819_v62 = vrot.slane %v1817_v32, 4  ;;  %v1833_v5 = vshll.u32 %v10817_v16, 16  ;;  %v8655_v32 = vld [vmem:[%s8877_s7 + $0x15c] sm:$0xf] }
 0x19f   : > { %2920 = vrot.lane.b32.xlu0 %v7045_v35, %s8788_s9  ;;  %v1825_v24 = vrot.slane %v1823_v19, 5  ;;  %v1829_v45 = vrot.slane %v1827_v54, 4  ;;  %v1794_v15 = vshrl.u32 %v10828_v38, 16  ;;  %v1797_v11 = vshll.u32 %v10828_v38, 16  ;;  %v8656_v35 = vld [vmem:[%s8877_s7 + $0x160] sm:$0xf]  ;;  %v10863_v21 = vpop.permute.xlu0 %2884 }
 0x1a0   : > { %3242 = vrot.lane.b32.xlu1 %v7110_v58, %s8787_s8  ;;  %v1820_v1 = vor.u32 %v1819_v62, %v10843_v13  ;;  %v1835_v27 = vrot.slane %v1833_v5, 5  ;;  %v1803_v53 = vshll.u32 %v10839_v52, 16  ;;  %v1807_v9 = vshrl.u32 %v10839_v52, 16  ;;  %v10859_v58 = vpop.permute.xlu1 %2886  ;;  %v8657_v5 = vld [vmem:[%s8877_s7 + $0x154] sm:$0xf] }
 0x1a1   : > { %8066 = vmatmul.mubr.msk.bf16.gmra.mrb[4].mxu0 %vm3684_vm8, %v9709_v23  ;;  %v1830_v48 = vor.u32 %v1829_v45, %v1825_v24  ;;  %v1796_v6 = vrot.slane %v1794_v15, 4  ;;  %v1799_v37 = vrot.slane %v1797_v11, 5  ;;  %v6956_v7 = vcombine.low %v8655_v32, %v8656_v35 }
 0x1a2   : > { %8069 = vmatprep.mubr.msk.bf16.mxu0 %vm3684_vm8, %v9814_v22  ;;  %v1821_v19 = vrot.slane %v1820_v1, 4  ;;  %v1805_v54 = vrot.slane %v1803_v53, 5  ;;  %v1809_v62 = vrot.slane %v1807_v9, 4  ;;  %v6955_v42 = vcombine.low %v8657_v5, %v8658_v43 }
 0x1a3   : > { %3240 = vrot.lane.b32.xlu0 %v7109_v34, %s8787_s8  ;;  %v1831_v23 = vrot.slane %v1830_v48, 4  ;;  %v1800_v45 = vor.u32 %v1799_v37, %v1796_v6  ;;  %v3356_v15 = vsel %vm3248_vm6, %v6956_v7, %v10531_v33  ;;  %v2408_v22 = vrot.slane %v10795_v61, 5  ;;  %v10878_v33 = vld [vmem:[%s8877_s7 + $0x288] sm:$0xf]  ;;  %v10891_v7 = vld [vmem:[%s8877_s7 + $0x28c] sm:$0xf] }
 0x1a4   : > { %v1826_v11 = vsel %vm8920_vm5, %v1821_v19, %v1825_v24  ;;  %v1810_v1 = vor.u32 %v1809_v62, %v1805_v54  ;;  %v3353_v53 = vsel %vm3248_vm6, %v6955_v42, %v10540_v8  ;;  %v2411_v43 = vrot.slane %v10806_v41, 5  ;;  %v10893_v19 = vpop.permute.xlu1 %3206 }
 0x1a5   : > { %v1836_v34 = vsel %vm8920_vm5, %v1831_v23, %v1835_v27  ;;  %v1801_v9 = vrot.slane %v1800_v45, 4  ;;  %v2410_v48 = vrot.slane %v2408_v22, 4  ;;  %v2414_v6 = vrot.slane %v10817_v16, 5  ;;  %12521 = vst [vmem:[#allocation22_spill] sm:$0xff] %v10893_v19  ;;  %v10910_v45 = vld [vmem:[%s8877_s7 + $0x280] sm:$0xf] }
 0x1a6   : > { %v7048_v37 = vcombine.low %v1826_v11, %v1836_v34  ;;  %v1811_v24 = vrot.slane %v1810_v1, 4  ;;  %v2413_v32 = vrot.slane %v2411_v43, 4  ;;  %v6920_v35 = vrot.slane %v10828_v38, 9 }
 0x1a7   : > { %v1806_v8 = vsel %vm8920_vm5, %v1801_v9, %v1805_v54  ;;  %v2412_v42 = vsel %vm8879_vm2, %v2410_v48, %v2411_v43  ;;  %v2405_v27 = vrot.slane %v10839_v52, 5  ;;  %v10888_v16 = vsel %vm3441_vm7, %v3356_v15, %v10587_v46  ;;  %v10906_v46 = vld [vmem:[%s8877_s7 + $0x290] sm:$0x1]  ;;  %v10914_v15 = vpop.permute.xlu0 %3204  ;;  %v10928_v9 = vld [vmem:[%s8877_s7 + $0x284] sm:$0xf] }
 0x1a8   : > { %12520 = vst [vmem:[#allocation21_spill] sm:$0xff] %v10888_v16  ;;  %2926 = vrot.lane.b32.xlu1 %v7048_v37, %s8788_s9  ;;  %v1816_v62 = vsel %vm8920_vm5, %v1811_v24, %v10843_v13  ;;  %v2415_v54 = vsel %vm8879_vm2, %v2413_v32, %v2414_v6  ;;  %v10903_v5 = vsel %vm3441_vm7, %v3353_v53, %v10592_v2  ;;  %v3593_v23 = vshll.u32 %v10878_v33, 16 }
 0x1a9   : > { %12522 = vst [vmem:[#allocation23_spill] sm:$0xff] %v10903_v5  ;;  %8070 = vmatmul.mubr.msk.bf16.gmra.mrb[8].mxu0 %vm3684_vm8, %v9793_v55  ;;  %v7047_v13 = vcombine.low %v1806_v8, %v1816_v62  ;;  %v7112_v11 = vcombine.low %v2412_v42, %v2415_v54  ;;  %v2406_v1 = vsel %vm8879_vm2, %v6920_v35, %v2405_v27  ;;  %v2407_v43 = vrot.slane %v2405_v27, 4  ;;  %v10940_v54 = vpop.permute.xlu1 %2890 }
 0x1aa   : > { %7861 = vmatprep.mubr.msk.bf16.mxu1 %vm3684_vm8, %v10903_v5  ;;  %8073 = vmatprep.mubr.msk.bf16.mxu0 %vm3684_vm8, %v9877_v30  ;;  %v10922_v2 = vrot.slane %v3593_v23, 5  ;;  %v3597_v53 = vshrl.u32 %v10878_v33, 16  ;;  %v3603_v55 = vshll.u32 %v10891_v7, 16  ;;  %v3607_v34 = vshrl.u32 %v10891_v7, 16  ;;  %12523 = vst [vmem:[#allocation24_spill] sm:$0xff] %v10940_v54 }
 0x1ab   : > { %7862 = vmatmul.mubr.msk.bf16.gmra.mrb[64].mxu1 %vm3684_vm8, %v10888_v16  ;;  %2924 = vrot.lane.b32.xlu0 %v7047_v13, %s8788_s9  ;;  %v2409_v48 = vsel %vm8879_vm2, %v2407_v43, %v2408_v22  ;;  %v3613_v30 = vshll.u32 %v10906_v46, 16  ;;  %v3574_v6 = vshrl.u32 %v10910_v45, 16  ;;  %v3577_v37 = vshll.u32 %v10910_v45, 16  ;;  %v8659_v16 = vld [vmem:[%s8877_s7 + $0x170] sm:$0xf] }
 0x1ac   : > { %3246 = vrot.lane.b32.xlu1 %v7112_v11, %s8787_s8  ;;  %v7111_v24 = vcombine.low %v2406_v1, %v2409_v48  ;;  %v3599_v32 = vrot.slane %v3597_v53, 4  ;;  %v3605_v35 = vrot.slane %v3603_v55, 5  ;;  %v3609_v8 = vrot.slane %v3607_v34, 4  ;;  %v8660_v11 = vld [vmem:[%s8877_s7 + $0x174] sm:$0xf]  ;;  %v10946_v53 = vpop.permute.xlu0 %2888 }
 0x1ad   : > { %v3615_v42 = vrot.slane %v3613_v30, 5  ;;  %v3576_v27 = vrot.slane %v3574_v6, 4  ;;  %v3579_v62 = vrot.slane %v3577_v37, 5  ;;  %v3583_v22 = vshll.u32 %v10928_v9, 16  ;;  %v8661_v30 = vld [vmem:[%s8877_s7 + $0x168] sm:$0xf] }
 0x1ae   : > { %v3600_v23 = vor.u32 %v3599_v32, %v10922_v2  ;;  %v3610_v13 = vor.u32 %v3609_v8, %v3605_v35  ;;  %v3587_v43 = vshrl.u32 %v10928_v9, 16  ;;  %v6958_v1 = vcombine.low %v8659_v16, %v8660_v11  ;;  %v10948_v55 = vpop.f32.mrb[0].mxu1  ;;  %v8662_v6 = vld [vmem:[%s8877_s7 + $0x16c] sm:$0xf] }
 0x1af   : > { %3244 = vrot.lane.b32.xlu0 %v7111_v24, %s8787_s8  ;;  %v3580_v34 = vor.u32 %v3579_v62, %v3576_v27  ;;  %v3585_v48 = vrot.slane %v3583_v22, 5  ;;  %v6957_v37 = vcombine.low %v8661_v30, %v8662_v6  ;;  %v3627_v5 = vrot.slane %v10878_v33, 5  ;;  %v10954_v32 = vpop.f32.mrb[1].mxu1  ;;  %v10978_v30 = vpop.permute.xlu1 %3210 }
 0x1b0   : > { %v3601_v8 = vrot.slane %v3600_v23, 4  ;;  %v3611_v54 = vrot.slane %v3610_v13, 4  ;;  %v3589_v19 = vrot.slane %v3587_v43, 4  ;;  %v3362_v16 = vsel %vm3248_vm6, %v6958_v1, %v10610_v44  ;;  %v10960_v11 = vpop.f32.mrb[2].mxu1 }
 0x1b1   : > { %8074 = vmatmul.mubr.msk.bf16.gmra.mrb[12].mxu0 %vm3684_vm8, %v9873_v60  ;;  %v3581_v24 = vrot.slane %v3580_v34, 4  ;;  %v3359_v27 = vsel %vm3248_vm6, %v6957_v37, %v10618_v39  ;;  %v3629_v62 = vrot.slane %v3627_v5, 4  ;;  %v3630_v22 = vrot.slane %v10891_v7, 5  ;;  %v10967_v23 = vpop.f32.mrb[3].mxu1  ;;  %v8663_v37 = vld [vmem:[%s8877_s7 + $0x17c] sm:$0xf] }
 0x1b2   : > { %8077 = vmatprep.mubr.msk.bf16.mxu0 %vm3684_vm8, %v9966_v59  ;;  %v3606_v44 = vsel %vm8920_vm5, %v3601_v8, %v3605_v35  ;;  %v3616_v60 = vsel %vm8920_vm5, %v3611_v54, %v3615_v42  ;;  %v3590_v13 = vor.u32 %v3589_v19, %v3585_v48  ;;  %v3633_v43 = vrot.slane %v10906_v46, 5  ;;  %v10986_v46 = vpop.permute.xlu0 %3208  ;;  %v8664_v8 = vld [vmem:[%s8877_s7 + $0x180] sm:$0xf] }
 0x1b3   : > { %v7117_v39 = vcombine.low %v3606_v44, %v3616_v60  ;;  %v3586_v1 = vsel %vm8920_vm5, %v3581_v24, %v3585_v48  ;;  %v3631_v59 = vsel %vm8879_vm2, %v3629_v62, %v3630_v22  ;;  %v3632_v34 = vrot.slane %v3630_v22, 4 }
 0x1b4   : > { %v3591_v6 = vrot.slane %v3590_v13, 4  ;;  %v7113_v35 = vrot.slane %v10910_v45, 9  ;;  %v3624_v42 = vrot.slane %v10928_v9, 5  ;;  %v10984_v19 = vsel %vm3441_vm7, %v3362_v16, %v10667_v63 }
 0x1b5   : > { %3649 = vrot.lane.b32.xlu1 %v7117_v39, %s8788_s9  ;;  %v3634_v54 = vsel %vm8879_vm2, %v3632_v34, %v3633_v43  ;;  %v10993_v48 = vsel %vm3441_vm7, %v3359_v27, %v10675_v10  ;;  %v6959_v24 = vcombine.low %v8663_v37, %v8664_v8  ;;  %v8665_v10 = vld [vmem:[%s8877_s7 + $0x184] sm:$0xf]  ;;  %v8666_v27 = vld [vmem:[%s8877_s7 + $0x188] sm:$0xf]  ;;  %v8667_v39 = vld [vmem:[%s8877_s7 + $0x190] sm:$0xf]  ;;  %v11022_v34 = vpop.permute.xlu1 %2894 }
 0x1b6   : > { %v3596_v63 = vsel %vm8920_vm5, %v3591_v6, %v10922_v2  ;;  %v7119_v16 = vcombine.low %v3631_v59, %v3634_v54  ;;  %v3625_v62 = vsel %vm8879_vm2, %v7113_v35, %v3624_v42  ;;  %v3626_v22 = vrot.slane %v3624_v42, 4  ;;  %7865 = vmatprep.mubr.msk.bf16.mxu1 %vm3684_vm8, %v10993_v48  ;;  %v8668_v59 = vld [vmem:[%s8877_s7 + $0x194] sm:$0xf]  ;;  %v8669_v37 = vld [vmem:[%s8877_s7 + $0x198] sm:$0xf] }
 0x1b7   : > { %v7116_v44 = vcombine.low %v3586_v1, %v3596_v63  ;;  %7866 = vmatmul.mubr.msk.bf16.gmra.mrb[68].mxu1 %vm3684_vm8, %v10984_v19  ;;  %v6960_v60 = vcombine.low %v8665_v10, %v8666_v27  ;;  %v3365_v13 = vsel %vm3248_vm6, %v6959_v24, %v10694_v26  ;;  %v6961_v1 = vcombine.low %v8667_v39, %v8668_v59  ;;  %v11039_v42 = vld [vmem:[%s8877_s7 + $0x294] sm:$0xf]  ;;  %v8670_v8 = vld [vmem:[%s8877_s7 + $0x19c] sm:$0xf]  ;;  %v11081_v39 = vld [vmem:[%s8877_s7 + $0x298] sm:$0xf] }
 0x1b8   : > { %v3628_v2 = vsel %vm8879_vm2, %v3626_v22, %v3627_v5  ;;  %v11014_v43 = vsel %vm3441_vm7, %v3365_v13, %v10753_v36  ;;  %v11030_v36 = vpop.permute.xlu0 %2892  ;;  %12527 = vst [vmem:[#allocation28_spill] sm:$0xff] %v11039_v42  ;;  %v4927_v13 = vshll.u32 %v11039_v42, 16 }
 0x1b9   : > { %8078 = vmatmul.mubr.msk.bf16.gmra.mrb[16].mxu0 %vm3684_vm8, %v9962_v3  ;;  %3647 = vrot.lane.b32.xlu0 %v7116_v44, %s8788_s9  ;;  %v7118_v26 = vcombine.low %v3625_v62, %v3628_v2  ;;  %v3368_v6 = vsel %vm3248_vm6, %v6960_v60, %v10689_v51  ;;  %v3371_v24 = vsel %vm3248_vm6, %v6961_v1, %v10780_v57  ;;  %v8672_v62 = vld [vmem:[%s8877_s7 + $0x1b0] sm:$0xf]  ;;  %v8673_v44 = vld [vmem:[%s8877_s7 + $0x1a4] sm:$0xf]  ;;  %v8674_v57 = vld [vmem:[%s8877_s7 + $0x1a8] sm:$0xf]  ;;  %v11063_v27 = vpop.permute.xlu1 %3214 }
 0x1ba   : > { %3659 = vrot.lane.b32.xlu1 %v7119_v16, %s8787_s8  ;;  %v11024_v5 = vpop.f32.mrb[4].mxu1  ;;  %7869 = vmatprep.mubr.msk.bf16.mxu1 %vm3684_vm8, %v11014_v43  ;;  %v11043_v54 = vsel %vm3441_vm7, %v3368_v6, %v10741_v14  ;;  %v11054_v51 = vsel %vm3441_vm7, %v3371_v24, %v10832_v20  ;;  %v8671_v16 = vld [vmem:[%s8877_s7 + $0x1ac] sm:$0xf]  ;;  %v4924_v14 = vshrl.u32 %v11039_v42, 16  ;;  %v6963_v10 = vcombine.low %v8673_v44, %v8674_v57  ;;  %v11090_v1 = vld [vmem:[%s8877_s7 + $0x29c] sm:$0xf] }
 0x1bb   : > { %12524 = vst [vmem:[#allocation25_spill] sm:$0xff] %v11024_v5  ;;  %8081 = vmatprep.mubr.msk.bf16.mxu0 %vm3684_vm8, %v10067_v4  ;;  %v11032_v3 = vpop.f32.mrb[5].mxu1  ;;  %v6962_v4 = vcombine.low %v8669_v37, %v8670_v8  ;;  %v6964_v22 = vcombine.low %v8671_v16, %v8672_v62  ;;  %12529 = vst [vmem:[#allocation30_spill] sm:$0xff] %v11090_v1  ;;  %v11101_v37 = vld [vmem:[%s8877_s7 + $0x2a0] sm:$0xf]  ;;  %v4929_v24 = vrot.slane %v4927_v13, 5 }
 0x1bc   : > { %12525 = vst [vmem:[#allocation26_spill] sm:$0xff] %v11032_v3  ;;  %v11036_v35 = vpop.f32.mrb[6].mxu1  ;;  %v11071_v20 = vpop.permute.xlu0 %3212  ;;  %v11117_v44 = vld [vmem:[%s8877_s7 + $0x2a4] sm:$0x1]  ;;  %v4947_v57 = vshrl.u32 %v11090_v1, 16  ;;  %v4953_v8 = vshll.u32 %v11101_v37, 16 }
 0x1bd   : > { %12526 = vst [vmem:[#allocation27_spill] sm:$0xff] %v11036_v35  ;;  %v11049_v63 = vpop.f32.mrb[7].mxu1  ;;  %3657 = vrot.lane.b32.xlu0 %v7118_v26, %s8787_s8  ;;  %v3374_v60 = vsel %vm3248_vm6, %v6962_v4, %v10773_v18  ;;  %v3380_v18 = vsel %vm3248_vm6, %v6964_v22, %v10859_v58  ;;  %v4926_v26 = vrot.slane %v4924_v14, 4  ;;  %v4937_v22 = vshrl.u32 %v11081_v39, 16  ;;  %v8676_v58 = vld [vmem:[%s8877_s7 + $0x1bc] sm:$0xf] }
 0x1be   : > { %12528 = vst [vmem:[#allocation29_spill] sm:$0xff] %v11049_v63  ;;  %v11076_v2 = vsel %vm3441_vm7, %v3374_v60, %v10819_v29  ;;  %v3377_v29 = vsel %vm3248_vm6, %v6963_v10, %v10863_v21  ;;  %v4933_v21 = vshll.u32 %v11081_v39, 16  ;;  %v4943_v14 = vshll.u32 %v11090_v1, 16  ;;  %v12533_v3 = vld [vmem:[#allocation22_spill] sm:$0xff] }
 0x1bf   : > { %7870 = vmatmul.mubr.msk.bf16.gmra.mrb[72].mxu1 %vm3684_vm8, %v11043_v54  ;;  %v11110_v16 = vsel %vm3441_vm7, %v3377_v29, %v10914_v15  ;;  %v4930_v13 = vor.u32 %v4929_v24, %v4926_v26  ;;  %v4957_v15 = vshrl.u32 %v11101_v37, 16  ;;  %v8675_v29 = vld [vmem:[%s8877_s7 + $0x1b8] sm:$0xf]  ;;  %v4949_v63 = vrot.slane %v4947_v57, 4 }
 0x1c0   : > { %7873 = vmatprep.mubr.msk.bf16.mxu1 %vm3684_vm8, %v11054_v51  ;;  %v11112_v62 = vpop.permute.xlu1 %2898  ;;  %v4935_v4 = vrot.slane %v4933_v21, 5  ;;  %v6965_v6 = vcombine.low %v8675_v29, %v8676_v58  ;;  %v4945_v59 = vrot.slane %v4943_v14, 5  ;;  %v4955_v21 = vrot.slane %v4953_v8, 5 }
 0x1c1   : > { %8082 = vmatmul.mubr.msk.bf16.gmra.mrb[20].mxu0 %vm3684_vm8, %v10048_v28  ;;  %v4939_v28 = vrot.slane %v4937_v22, 4  ;;  %v4931_v24 = vrot.slane %v4930_v13, 4  ;;  %v4963_v35 = vshll.u32 %v11117_v44, 16  ;;  %v11141_v58 = vsel %vm3441_vm7, %v3380_v18, %v12533_v3  ;;  %v12534_v22 = vld [vmem:[#allocation6_spill] sm:$0xff] }
 0x1c2   : > { %8085 = vmatprep.mubr.msk.bf16.mxu0 %vm3684_vm8, %v10132_v17  ;;  %v11120_v10 = vpop.permute.xlu0 %2896  ;;  %v4950_v29 = vor.u32 %v4949_v63, %v4945_v59  ;;  %v7255_v8 = vrot.slane %v11039_v42, 9  ;;  %v4977_v13 = vrot.slane %v11090_v1, 5  ;;  %v3383_v63 = vsel %vm3248_vm6, %v6965_v6, %v10946_v53 }
 0x1c3   : > { %v4940_v57 = vor.u32 %v4939_v28, %v4935_v4  ;;  %v4936_v3 = vsel %vm8920_vm5, %v4931_v24, %v4935_v4  ;;  %v4980_v42 = vrot.slane %v11101_v37, 5  ;;  %v11159_v1 = vsel %vm3441_vm7, %v3383_v63, %v10986_v46 }
 0x1c4   : > { %v4951_v5 = vrot.slane %v4950_v29, 4  ;;  %v8678_v29 = vld [vmem:[%s8877_s7 + $0x1c4] sm:$0xf] }
 0x1c5   : > { %v4941_v18 = vrot.slane %v4940_v57, 4  ;;  %v4983_v57 = vrot.slane %v11117_v44, 5  ;;  %v4982_v44 = vrot.slane %v4980_v42, 4 }
 0x1c6   : > { %v11122_v60 = vpop.f32.mrb[8].mxu1  ;;  %v3217_v28 = vpop.permute.xlu0 %3216  ;;  %v4956_v24 = vsel %vm8920_vm5, %v4951_v5, %v4955_v21 }
 0x1c7   : > { %12530 = vst [vmem:[#allocation31_spill] sm:$0xff] %v11122_v60  ;;  %7874 = vmatmul.mubr.msk.bf16.gmra.mrb[76].mxu1 %vm3684_vm8, %v11076_v2  ;;  %v11130_v17 = vpop.f32.mrb[9].mxu1  ;;  %v4959_v60 = vrot.slane %v4957_v15, 4  ;;  %v11150_v15 = vpop.permute.xlu1 %3218  ;;  %v4946_v4 = vsel %vm8920_vm5, %v4941_v18, %v4945_v59  ;;  %v8677_v59 = vld [vmem:[%s8877_s7 + $0x1c0] sm:$0xf] }
 0x1c8   : > { %12531 = vst [vmem:[#allocation32_spill] sm:$0xff] %v11130_v17  ;;  %7877 = vmatprep.mubr.msk.bf16.mxu1 %vm3684_vm8, %v11110_v16  ;;  %v11136_v26 = vpop.f32.mrb[10].mxu1  ;;  %v7258_v53 = vcombine.low %v4936_v3, %v4946_v4  ;;  %v6966_v18 = vcombine.low %v8677_v59, %v8678_v29  ;;  %v8684_v29 = vld [vmem:[%s8877_s7 + $0x1e4] sm:$0xf] }
 0x1c9   : > { %8086 = vmatmul.mubr.msk.bf16.gmra.mrb[24].mxu0 %vm3684_vm8, %v10128_v47  ;;  %12532 = vst [vmem:[#allocation33_spill] sm:$0xff] %v11136_v26  ;;  %v11145_v14 = vpop.f32.mrb[11].mxu1  ;;  %v4974_v47 = vrot.slane %v11081_v39, 5  ;;  %v4960_v17 = vor.u32 %v4959_v60, %v4955_v21  ;;  %v4965_v26 = vrot.slane %v4963_v35, 5  ;;  %v4979_v35 = vrot.slane %v4977_v13, 4 }
 0x1ca   : > { %8089 = vmatprep.mubr.msk.bf16.mxu0 %vm3684_vm8, %v12534_v22  ;;  %4997 = vrot.lane.b32.xlu0 %v7258_v53, %s8788_s9 }
 0x1cb   : > { %v4976_v22 = vrot.slane %v4974_v47, 4  ;;  %v4961_v60 = vrot.slane %v4960_v17, 4  ;;  %v4975_v6 = vsel %vm8879_vm2, %v7255_v8, %v4974_v47  ;;  %v4981_v5 = vsel %vm8879_vm2, %v4979_v35, %v4980_v42  ;;  %v12535_v47 = vld [vmem:[#allocation5_spill] sm:$0xff]  ;;  %v12536_v8 = vld [vmem:[#allocation8_spill] sm:$0xff] }
 0x1cc   : > { %v4984_v42 = vsel %vm8879_vm2, %v4982_v44, %v4983_v57  ;;  %v12537_v35 = vld [vmem:[#allocation24_spill] sm:$0xff] }
 0x1cd   : > { %v4966_v17 = vsel %vm8920_vm5, %v4961_v60, %v4965_v26  ;;  %v4978_v46 = vsel %vm8879_vm2, %v4976_v22, %v4977_v13  ;;  %v8680_v26 = vld [vmem:[%s8877_s7 + $0x1d0] sm:$0xf]  ;;  %v11186_v13 = vpop.permute.xlu1 %2902  ;;  %v7261_v60 = vcombine.low %v4981_v5, %v4984_v42  ;;  %v3386_v4 = vsel %vm3248_vm6, %v6966_v18, %v12537_v35  ;;  %v12538_v5 = vld [vmem:[#allocation7_spill] sm:$0xff]  ;;  %v8686_v35 = vld [vmem:[%s8877_s7 + $0x1ec] sm:$0xf] }
 0x1ce   : > { %v7259_v63 = vcombine.low %v4956_v24, %v4966_v17  ;;  %v6967_v21 = vcombine.low %v8679_v40, %v8680_v26  ;;  %v7260_v3 = vcombine.low %v4975_v6, %v4978_v46  ;;  %v11196_v24 = vsel %vm3441_vm7, %v3386_v4, %v10978_v30  ;;  %v8681_v30 = vld [vmem:[%s8877_s7 + $0x1d4] sm:$0xf]  ;;  %v8682_v6 = vld [vmem:[%s8877_s7 + $0x1d8] sm:$0xf] }
 0x1cf   : > { %7878 = vmatmul.mubr.msk.bf16.gmra.mrb[80].mxu1 %vm3684_vm8, %v11141_v58  ;;  %v2901_v22 = vpop.permute.xlu0 %2900  ;;  %v6968_v46 = vcombine.low %v8681_v30, %v8682_v6  ;;  %v12539_v40 = vld [vmem:[#allocation10_spill] sm:$0xff]  ;;  %v12542_v30 = vld [vmem:[#allocation12_spill] sm:$0xff] }
 0x1d0   : > { %7881 = vmatprep.mubr.msk.bf16.mxu1 %vm3684_vm8, %v11159_v1  ;;  %4999 = vrot.lane.b32.xlu1 %v7259_v63, %s8788_s9  ;;  %v3389_v53 = vsel %vm3248_vm6, %v6967_v21, %v11030_v36  ;;  %s237_s9 = sand.u32 1, %s8769_s16  }
 0x1d1   : > { %8090 = vmatmul.mubr.msk.bf16.gmra.mrb[28].mxu0 %vm3684_vm8, %v12535_v47  ;;  %v11202_v0 = vsel %vm3441_vm7, %v3389_v53, %v11071_v20  ;;  %5007 = vrot.lane.b32.xlu0 %v7260_v3, %s8787_s8  ;;  %v3223_v59 = vpop.permute.xlu1 %3222  ;;  %v8683_v20 = vld [vmem:[%s8877_s7 + $0x1e0] sm:$0xf]  ;;  %v3392_v26 = vsel %vm3248_vm6, %v6968_v46, %v11022_v34  ;;  %v8687_v34 = vld [vmem:[%s8877_s7 + $0x1f4] sm:$0xf]  ;;  %s6887_s21 = sshll.u32 %s237_s9, 9  ;;  %s12423_s18 = scalar_lea.sflag [#allocation3], %s237_s9 }
 0x1d2   : > { %8093 = vmatprep.mubr.msk.bf16.mxu0 %vm3684_vm8, %v12536_v8  ;;  %v6969_v18 = vcombine.low %v8683_v20, %v8684_v29  ;;  %v11230_v21 = vsel %vm3441_vm7, %v3392_v26, %v11063_v27  ;;  %v8688_v27 = vld [vmem:[%s8877_s7 + $0x1f8] sm:$0xf]  ;;  %s11620_s22 = scalar_lea.vmem [#allocation2], %s6887_s21 }
 0x1d3   : > { %v3221_v63 = vpop.permute.xlu0 %3220  ;;  %v6971_v53 = vcombine.low %v8687_v34, %v8688_v27  ;;  %v12546_v27 = vld [vmem:[#allocation11_spill] sm:$0xff]  ;;  %s6768_s6 = sshll.u32 %s11620_s22, 4  ;;  %s12413_s6 = int_to_ptr.vmem [resolvable:$true] %s6768_s6 }
 0x1d4   : > { %5009 = vrot.lane.b32.xlu1 %v7261_v60, %s8787_s8  ;;  %v3395_v47 = vsel %vm3248_vm6, %v6969_v18, %v11120_v10  ;;  %v8685_v60 = vld [vmem:[%s8877_s7 + $0x1e8] sm:$0xf]  ;;  %v12540_v10 = vld [vmem:[#allocation9_spill] sm:$0xff]  ;;  %s8789_s8 = smov [#allocation2]  }
 0x1d5   : > { %v11204_v57 = vpop.f32.mrb[12].mxu1  ;;  %v11235_v8 = vsel %vm3441_vm7, %v3395_v47, %v3217_v28  ;;  %v6970_v4 = vcombine.low %v8685_v60, %v8686_v35  ;;  %v8689_v60 = vld [vmem:[%s8877_s7 + $0x1fc] sm:$0xf]  ;;  %v8690_v35 = vld [vmem:[%s8877_s7 + $0x200] sm:$0xf]  ;;  %s8711_s13 = sshll.u32 %s8789_s8, 4  ;;  %s8712_s13 = int_to_ptr.vmem [resolvable:$false] %s8711_s13 }
 0x1d6   : > { %v11207_v17 = vpop.f32.mrb[13].mxu1  ;;  %v6972_v34 = vcombine.low %v8689_v60, %v8690_v35  ;;  %s8713_s14 = scalar_lea.vmem %s8712_s13, 16384  ;;  %p8714_p1 = scmp.lt.s32.totalorder %s12413_s6, %s8712_s13 }
 0x1d7   : > { %7882 = vmatmul.mubr.msk.bf16.gmra.mrb[84].mxu1 %vm3684_vm8, %v11196_v24  ;;  %v11214_v36 = vpop.f32.mrb[14].mxu1  ;;  %v3398_v20 = vsel %vm3248_vm6, %v6970_v4, %v11112_v62  ;;  %v8691_v62 = vld [vmem:[%s8877_s7 + $0x208] sm:$0xf] }
 0x1d8   : > { %7885 = vmatprep.mubr.msk.bf16.mxu1 %vm3684_vm8, %v11202_v0  ;;  %v11222_v44 = vpop.f32.mrb[15].mxu1 }
 0x1d9   : > { %8094 = vmatmul.mubr.msk.bf16.gmra.mrb[32].mxu0 %vm3684_vm8, %v12538_v5  ;;  %v2907_v3 = vpop.permute.xlu1 %2906  ;;  %v11261_v5 = vsel %vm3441_vm7, %v3398_v20, %v11150_v15  ;;  %v8692_v15 = vld [vmem:[%s8877_s7 + $0x20c] sm:$0xf] }
 0x1da   : > { %8097 = vmatprep.mubr.msk.bf16.mxu0 %vm3684_vm8, %v12539_v40  ;;  %v3401_v40 = vsel %vm3248_vm6, %v6971_v53, %v2901_v22  ;;  %v6973_v4 = vcombine.low %v8691_v62, %v8692_v15  ;;  %v8693_v62 = vld [vmem:[%s8877_s7 + $0x210] sm:$0xf]  ;;  %v8694_v15 = vld [vmem:[%s8877_s7 + $0x214] sm:$0xf] }
 0x1db   : > { %v11265_v47 = vsel %vm3441_vm7, %v3401_v40, %v3221_v63  ;;  %v12547_v63 = vld [vmem:[#allocation14_spill] sm:$0xff] }
 0x1dd   : > { %v2905_v42 = vpop.permute.xlu0 %2904  ;;  %v3227_v29 = vpop.permute.xlu1 %3226 }
 0x1de   : > { %v3407_v20 = vsel %vm3248_vm6, %v6973_v4, %v2905_v42  ;;  %v8696_v42 = vld [vmem:[%s8877_s7 + $0x220] sm:$0xf]  ;;  %v12551_v4 = vld [vmem:[#allocation13_spill] sm:$0xff] }
 0x1df   : > { %7886 = vmatmul.mubr.msk.bf16.gmra.mrb[88].mxu1 %vm3684_vm8, %v11230_v21 }
 0x1e0   : > { %7889 = vmatprep.mubr.msk.bf16.mxu1 %vm3684_vm8, %v11235_v8  ;;  %v11247_v28 = vpop.f32.mrb[16].mxu1 }
 0x1e1   : > { %8098 = vmatmul.mubr.msk.bf16.gmra.mrb[36].mxu0 %vm3684_vm8, %v12540_v10  ;;  %12541 = vst [vmem:[#allocation22_spill] sm:$0xff] %v11247_v28  ;;  %v11251_v6 = vpop.f32.mrb[17].mxu1  ;;  %v3225_v26 = vpop.permute.xlu0 %3224  ;;  %v3404_v10 = vsel %vm3248_vm6, %v6972_v34, %v11186_v13 }
 0x1e2   : > { %8101 = vmatprep.mubr.msk.bf16.mxu0 %vm3684_vm8, %v12542_v30  ;;  %12543 = vst [vmem:[#allocation6_spill] sm:$0xff] %v11251_v6  ;;  %v11253_v46 = vpop.f32.mrb[18].mxu1  ;;  %v11282_v30 = vsel %vm3441_vm7, %v3404_v10, %v3223_v59  ;;  %v11286_v40 = vsel %vm3441_vm7, %v3407_v20, %v3225_v26  ;;  %v8695_v59 = vld [vmem:[%s8877_s7 + $0x21c] sm:$0xf]  ;;  %v12553_v20 = vld [vmem:[#allocation16_spill] sm:$0xff] }
 0x1e3   : > { %12544 = vst [vmem:[#allocation5_spill] sm:$0xff] %v11253_v46  ;;  %v11257_v18 = vpop.f32.mrb[19].mxu1  ;;  %v6975_v26 = vcombine.low %v8695_v59, %v8696_v42 }
 0x1e4   : > { %12545 = vst [vmem:[#allocation8_spill] sm:$0xff] %v11257_v18 }
 0x1e7   : > { %7890 = vmatmul.mubr.msk.bf16.gmra.mrb[92].mxu1 %vm3684_vm8, %v11261_v5  ;;  %v2911_v22 = vpop.permute.xlu1 %2910 }
 0x1e8   : > { %7893 = vmatprep.mubr.msk.bf16.mxu1 %vm3684_vm8, %v11265_v47 }
 0x1e9   : > { %8102 = vmatmul.mubr.msk.bf16.gmra.mrb[40].mxu0 %vm3684_vm8, %v12546_v27  ;;  %v6974_v27 = vcombine.low %v8693_v62, %v8694_v15 }
 0x1ea   : > { %8105 = vmatprep.mubr.msk.bf16.mxu0 %vm3684_vm8, %v12547_v63  ;;  %v2909_v53 = vpop.permute.xlu0 %2908 }
 0x1eb   : > { %v3231_v63 = vpop.permute.xlu1 %3230  ;;  %v3410_v62 = vsel %vm3248_vm6, %v6974_v27, %v2907_v3  ;;  %v8699_v3 = vld [vmem:[%s8877_s7 + $0x230] sm:$0xf] }
 0x1ec   : > { %v11310_v15 = vsel %vm3441_vm7, %v3410_v62, %v3227_v29  ;;  %v8700_v29 = vld [vmem:[%s8877_s7 + $0x234] sm:$0xf] }
 0x1ed   : > { %v11288_v60 = vpop.f32.mrb[20].mxu1  ;;  %v6977_v27 = vcombine.low %v8699_v3, %v8700_v29 }
 0x1ee   : > { %12548 = vst [vmem:[#allocation24_spill] sm:$0xff] %v11288_v60  ;;  %v11290_v35 = vpop.f32.mrb[21].mxu1  ;;  %v3229_v34 = vpop.permute.xlu0 %3228 }
 0x1ef   : > { %12549 = vst [vmem:[#allocation7_spill] sm:$0xff] %v11290_v35  ;;  %7894 = vmatmul.mubr.msk.bf16.gmra.mrb[96].mxu1 %vm3684_vm8, %v11282_v30  ;;  %v11296_v13 = vpop.f32.mrb[22].mxu1 }
 0x1f0   : > { %12550 = vst [vmem:[#allocation10_spill] sm:$0xff] %v11296_v13  ;;  %7897 = vmatprep.mubr.msk.bf16.mxu1 %vm3684_vm8, %v11286_v40  ;;  %v11304_v10 = vpop.f32.mrb[23].mxu1  ;;  %v3413_v13 = vsel %vm3248_vm6, %v6975_v26, %v2909_v53  ;;  %v12554_v53 = vld [vmem:[#allocation15_spill] sm:$0xff] }
 0x1f1   : > { %8106 = vmatmul.mubr.msk.bf16.gmra.mrb[44].mxu0 %vm3684_vm8, %v12551_v4  ;;  %12552 = vst [vmem:[#allocation9_spill] sm:$0xff] %v11304_v10  ;;  %v11314_v59 = vsel %vm3441_vm7, %v3413_v13, %v3229_v34  ;;  %v8697_v4 = vld [vmem:[%s8877_s7 + $0x224] sm:$0xf]  ;;  %v8698_v10 = vld [vmem:[%s8877_s7 + $0x228] sm:$0xf]  ;;  %v12555_v13 = vld [vmem:[#allocation18_spill] sm:$0xff] }
 0x1f2   : > { %8109 = vmatprep.mubr.msk.bf16.mxu0 %vm3684_vm8, %v12553_v20  ;;  %v6976_v60 = vcombine.low %v8697_v4, %v8698_v10 }
 0x1f3   : > { %v2915_v42 = vpop.permute.xlu1 %2914 }
 0x1f4   : > { %v3416_v34 = vsel %vm3248_vm6, %v6976_v60, %v2911_v22  ;;  %v8701_v22 = vld [vmem:[%s8877_s7 + $0x238] sm:$0xf]  ;;  %v8702_v60 = vld [vmem:[%s8877_s7 + $0x23c] sm:$0xf] }
 0x1f5   : > { %v11330_v10 = vsel %vm3441_vm7, %v3416_v34, %v3231_v63  ;;  %v6978_v63 = vcombine.low %v8701_v22, %v8702_v60  ;;  %v8703_v22 = vld [vmem:[%s8877_s7 + $0x24c] sm:$0xf]  ;;  %v8704_v60 = vld [vmem:[%s8877_s7 + $0x250] sm:$0xf]  ;;  %s8707_s7 = scalar_lea.vmem %s12413_s6, 8192 }
 0x1f6   : > { %v2913_v35 = vpop.permute.xlu0 %2912  ;;  %p8708_p12 = scmp.ne.s32.totalorder %s12413_s6, %s8707_s7  ;;  %p8715_p2 = scmp.lt.s32.totalorder %s8713_s14, %s8707_s7 }
 0x1f7   : > { %7898 = vmatmul.mubr.msk.bf16.gmra.mrb[100].mxu1 %vm3684_vm8, %v11310_v15  ;;  %v3235_v20 = vpop.permute.xlu1 %3234  ;;  %v3419_v62 = vsel %vm3248_vm6, %v6977_v27, %v2913_v35  ;;  %v12560_v35 = vld [vmem:[#allocation17_spill] sm:$0xff] }
 0x1f8   : > { %7901 = vmatprep.mubr.msk.bf16.mxu1 %vm3684_vm8, %v11314_v59  ;;  %p8709_p13 = pnand %p8708_p12, %p8857_p4  ;;  %p8716_p3 = por %p8715_p2, %p8714_p1 }
 0x1f9   : > { %8110 = vmatmul.mubr.msk.bf16.gmra.mrb[48].mxu0 %vm3684_vm8, %v12554_v53 }
 0x1fa   : > { %8113 = vmatprep.mubr.msk.bf16.mxu0 %vm3684_vm8, %v12555_v13  ;;  %v3233_v26 = vpop.permute.xlu0 %3232  ;;  %v12561_v13 = vld [vmem:[#allocation20_spill] sm:$0xff]  ;;  %p8710_p0 = pneg %p8709_p13 }
 0x1fb   : > { %v11336_v18 = vsel %vm3441_vm7, %v3419_v62, %v3233_v26  ;;  %v3422_v26 = vsel %vm3248_vm6, %v6978_v63, %v2915_v42  ;;  %v12564_v42 = vld [vmem:[#allocation19_spill] sm:$0xff] }
 0x1fc   : > { %v11333_v4 = vpop.f32.mrb[24].mxu1  ;;  %v11356_v34 = vsel %vm3441_vm7, %v3422_v26, %v3235_v20  ;;  %v12566_v26 = vld [vmem:[#allocation23_spill] sm:$0xff]  ;;  %p8717_p5 = pnand %p8716_p3, %p8710_p0 }
 0x1fd   : > { %12556 = vst [vmem:[#allocation12_spill] sm:$0xff] %v11333_v4  ;;  %v11338_v3 = vpop.f32.mrb[25].mxu1 }
 0x1fe   : > { %12557 = vst [vmem:[#allocation11_spill] sm:$0xff] %v11338_v3  ;;  %v11340_v29 = vpop.f32.mrb[26].mxu1 }
 0x1ff   : > { %12558 = vst [vmem:[#allocation14_spill] sm:$0xff] %v11340_v29  ;;  %7902 = vmatmul.mubr.msk.bf16.gmra.mrb[104].mxu1 %vm3684_vm8, %v11330_v10  ;;  %v11346_v53 = vpop.f32.mrb[27].mxu1 }
 0x200   : > { %12559 = vst [vmem:[#allocation13_spill] sm:$0xff] %v11346_v53  ;;  %7905 = vmatprep.mubr.msk.bf16.mxu1 %vm3684_vm8, %v11336_v18  ;;  %v2919_v27 = vpop.permute.xlu1 %2918  ;;  %v6980_v53 = vcombine.low %v8703_v22, %v8704_v60 }
 0x201   : > { %8114 = vmatmul.mubr.msk.bf16.gmra.mrb[52].mxu0 %vm3684_vm8, %v12560_v35  ;;  %v12563_v35 = vcombine.low %v10647_v12, %v10661_v31 }
 0x202   : > { %8117 = vmatprep.mubr.msk.bf16.mxu0 %vm3684_vm8, %v12561_v13  ;;  %v3428_v31 = vsel %vm3248_vm6, %v6980_v53, %v2919_v27 }
 0x204   : > { %v2917_v62 = vpop.permute.xlu0 %2916 }
 0x205   : > { %v3239_v29 = vpop.permute.xlu1 %3238  ;;  %v3425_v4 = vsel %vm3248_vm6, %v12563_v35, %v2917_v62 }
 0x206   : > { %v11385_v62 = vsel %vm3441_vm7, %v3428_v31, %v3239_v29  ;;  %v12571_v29 = vcombine.low %v10730_v56, %v10747_v50 }
 0x207   : > { %7906 = vmatmul.mubr.msk.bf16.gmra.mrb[108].mxu1 %vm3684_vm8, %v11356_v34  ;;  %v11362_v3 = vpop.f32.mrb[28].mxu1 }
 0x208   : > { %12562 = vst [vmem:[#allocation16_spill] sm:$0xff] %v11362_v3  ;;  %v3237_v46 = vpop.permute.xlu0 %3236  ;;  %v11370_v20 = vpop.f32.mrb[29].mxu1 }
 0x209   : > { %8118 = vmatmul.mubr.msk.bf16.gmra.mrb[56].mxu0 %vm3684_vm8, %v12564_v42  ;;  %12565 = vst [vmem:[#allocation15_spill] sm:$0xff] %v11370_v20  ;;  %v11373_v63 = vsel %vm3441_vm7, %v3425_v4, %v3237_v46  ;;  %v11377_v22 = vpop.f32.mrb[30].mxu1  ;;  %v12569_v46 = vld [vmem:[#allocation21_spill] sm:$0xff] }
 0x20a   : > { %8121 = vmatprep.mubr.msk.bf16.mxu0 %vm3684_vm8, %v12566_v26  ;;  %12567 = vst [vmem:[#allocation18_spill] sm:$0xff] %v11377_v22  ;;  %7909 = vmatprep.mubr.msk.bf16.mxu1 %vm3684_vm8, %v11373_v63  ;;  %v11381_v12 = vpop.f32.mrb[31].mxu1 }
 0x20b   : > { %12568 = vst [vmem:[#allocation17_spill] sm:$0xff] %v11381_v12  ;;  %v12570_v12 = vcombine.low %v10702_v25, %v10715_v49 }
 0x20e   : > { %v2923_v60 = vpop.permute.xlu1 %2922 }
 0x20f   : > { %7910 = vmatmul.mubr.msk.bf16.gmra.mrb[112].mxu1 %vm3684_vm8, %v11385_v62  ;;  %v3434_v53 = vsel %vm3248_vm6, %v12570_v12, %v2923_v60  ;;  %v12573_v60 = vcombine.low %v10828_v38, %v10839_v52 }
 0x211   : > { %8122 = vmatmul.mubr.msk.bf16.gmra.mrb[60].mxu0 %vm3684_vm8, %v12569_v46  ;;  %v2921_v4 = vpop.permute.xlu0 %2920 }
 0x212   : > { %8125 = vmatprep.mubr.msk.bf16.mxu0 %vm3684_vm8, %v10993_v48  ;;  %v3243_v35 = vpop.permute.xlu1 %3242  ;;  %v3431_v31 = vsel %vm3248_vm6, %v12571_v29, %v2921_v4 }
 0x213   : > { %v11404_v22 = vsel %vm3441_vm7, %v3434_v53, %v3243_v35 }
 0x214   : > { %v11397_v27 = vpop.f32.mrb[32].mxu1 }
 0x215   : > { %v3241_v20 = vpop.permute.xlu0 %3240  ;;  %v11406_v3 = vpop.f32.mrb[33].mxu1 }
 0x216   : > { %v11409_v6 = vsel %vm3441_vm7, %v3431_v31, %v3241_v20  ;;  %v11411_v28 = vpop.f32.mrb[34].mxu1  ;;  %v12572_v20 = vcombine.low %v10795_v61, %v10806_v41 }
 0x217   : > { %7913 = vmatprep.mubr.msk.bf16.mxu1 %vm3684_vm8, %v11409_v6  ;;  %v11415_v25 = vpop.f32.mrb[35].mxu1 }
 0x218   : > { %7914 = vmatmul.mubr.msk.bf16.gmra.mrb[116].mxu1 %vm3684_vm8, %v11404_v22 }
 0x219   : > { %8126 = vmatmul.mubr.msk.bf16.gmra.mrb[64].mxu0 %vm3684_vm8, %v10984_v19 }
 0x21a   : > { %8129 = vmatprep.mubr.msk.bf16.mxu0 %vm3684_vm8, %v11014_v43  ;;  %v2927_v49 = vpop.permute.xlu1 %2926 }
 0x21b   : > { %v3440_v12 = vsel %vm3248_vm6, %v12572_v20, %v2927_v49 }
 0x21d   : > { %v2925_v56 = vpop.permute.xlu0 %2924 }
 0x21e   : > { %v3247_v50 = vpop.permute.xlu1 %3246  ;;  %v3437_v4 = vsel %vm3248_vm6, %v12573_v60, %v2925_v56 }
 0x21f   : > { %v11434_v35 = vsel %vm3441_vm7, %v3440_v12, %v3247_v50  ;;  %v12576_v50 = vcombine.low %v10878_v33, %v10891_v7  ;;  %v12577_v12 = vcombine.low %v10910_v45, %v10928_v9 }
 0x221   : > { %8130 = vmatmul.mubr.msk.bf16.gmra.mrb[68].mxu0 %vm3684_vm8, %v11043_v54  ;;  %v3245_v53 = vpop.permute.xlu0 %3244 }
 0x222   : > { %8133 = vmatprep.mubr.msk.bf16.mxu0 %vm3684_vm8, %v11054_v51  ;;  %v11439_v29 = vsel %vm3441_vm7, %v3437_v4, %v3245_v53 }
 0x223   : > { %7917 = vmatprep.mubr.msk.bf16.mxu1 %vm3684_vm8, %v11439_v29  ;;  %v11443_v61 = vpop.f32.mrb[36].mxu1 }
 0x224   : > { %7918 = vmatmul.mubr.msk.bf16.gmra.mrb[120].mxu1 %vm3684_vm8, %v11434_v35  ;;  %v11447_v41 = vpop.f32.mrb[37].mxu1 }
 0x225   : > { %v11449_v38 = vpop.f32.mrb[38].mxu1 }
 0x226   : > { %12574 = vst [vmem:[#allocation20_spill] sm:$0xff] %v11449_v38  ;;  %v11451_v52 = vpop.f32.mrb[39].mxu1 }
 0x227   : > { %12575 = vst [vmem:[#allocation19_spill] sm:$0xff] %v11451_v52  ;;  %v3650_v31 = vpop.permute.xlu1 %3649 }
 0x228   : > { %v3666_v20 = vsel %vm3248_vm6, %v12576_v50, %v3650_v31 }
 0x229   : > { %8134 = vmatmul.mubr.msk.bf16.gmra.mrb[72].mxu0 %vm3684_vm8, %v11076_v2 }
 0x22a   : > { %8137 = vmatprep.mubr.msk.bf16.mxu0 %vm3684_vm8, %v11110_v16 }
 0x22b   : > { %v3648_v49 = vpop.permute.xlu0 %3647 }
 0x22c   : > { %v3660_v56 = vpop.permute.xlu1 %3659  ;;  %v3663_v60 = vsel %vm3248_vm6, %v12577_v12, %v3648_v49 }
 0x22d   : > { %v11466_v4 = vsel %vm3441_vm7, %v3666_v20, %v3660_v56 }
 0x22f   : > { %v3658_v53 = vpop.permute.xlu0 %3657  ;;  %v11468_v52 = vpop.f32.mrb[40].mxu1 }
 0x230   : > { %v11471_v38 = vsel %vm3441_vm7, %v3663_v60, %v3658_v53  ;;  %v11475_v33 = vpop.f32.mrb[41].mxu1  ;;  %v11587_v60 = vld [vmem:[%s12472_s3] ss:$0 sm:$0xff] }
 0x231   : > { %8138 = vmatmul.mubr.msk.bf16.gmra.mrb[76].mxu0 %vm3684_vm8, %v11141_v58  ;;  %7921 = vmatprep.mubr.msk.bf16.mxu1 %vm3684_vm8, %v11471_v38  ;;  %v11481_v7 = vpop.f32.mrb[42].mxu1 }
 0x232   : > { %8141 = vmatprep.mubr.msk.bf16.mxu0 %vm3684_vm8, %v11159_v1  ;;  %7922 = vmatmul.mubr.msk.bf16.gmra.mrb[124].mxu1 %vm3684_vm8, %v11466_v4  ;;  %v11485_v45 = vpop.f32.mrb[43].mxu1 }
 0x233   : > { %7993 = vmatprep.mubr.msk.bf16.mxu1 %vm3684_vm8, %v12561_v13 }
 0x239   : > { %8142 = vmatmul.mubr.msk.bf16.gmra.mrb[80].mxu0 %vm3684_vm8, %v11196_v24 }
 0x23a   : > { %8145 = vmatprep.mubr.msk.bf16.mxu0 %vm3684_vm8, %v11202_v0  ;;  %7994 = vmatmul.mubr.msk.bf16.vlgmr.msra.gmra.mrb[64].mxu1 %vm3684_vm8, %v12564_v42 }
 0x23b   : > { %7997 = vmatprep.mubr.msk.bf16.mxu1 %vm3684_vm8, %v12566_v26 }
 0x23c   : > { %v11497_v9 = vpop.f32.mrb[44].mxu1 }
 0x23d   : > { %v11499_v31 = vpop.f32.mrb[45].mxu1 }
 0x23e   : > { %v11501_v49 = vpop.f32.mrb[46].mxu1 }
 0x23f   : > { %v11503_v56 = vpop.f32.mrb[47].mxu1 }
 0x241   : > { %8146 = vmatmul.mubr.msk.bf16.gmra.mrb[84].mxu0 %vm3684_vm8, %v11230_v21 }
 0x242   : > { %8149 = vmatprep.mubr.msk.bf16.mxu0 %vm3684_vm8, %v11235_v8  ;;  %7998 = vmatmul.mubr.msk.bf16.gmra.mrb[68].mxu1 %vm3684_vm8, %v12569_v46 }
 0x243   : > { %8001 = vmatprep.mubr.msk.bf16.mxu1 %vm3684_vm8, %v10993_v48 }
 0x249   : > { %8150 = vmatmul.mubr.msk.bf16.gmra.mrb[88].mxu0 %vm3684_vm8, %v11261_v5  ;;  %v11517_v13 = vpop.f32.mrb[48].mxu1 }
 0x24a   : > { %8153 = vmatprep.mubr.msk.bf16.mxu0 %vm3684_vm8, %v11265_v47  ;;  %8002 = vmatmul.mubr.msk.bf16.gmra.mrb[72].mxu1 %vm3684_vm8, %v10984_v19  ;;  %v11521_v42 = vpop.f32.mrb[49].mxu1 }
 0x24b   : > { %8005 = vmatprep.mubr.msk.bf16.mxu1 %vm3684_vm8, %v11014_v43  ;;  %v11525_v26 = vpop.f32.mrb[50].mxu1 }
 0x24c   : > { %v11527_v46 = vpop.f32.mrb[51].mxu1 }
 0x251   : > { %8154 = vmatmul.mubr.msk.bf16.gmra.mrb[92].mxu0 %vm3684_vm8, %v11282_v30 }
 0x252   : > { %8157 = vmatprep.mubr.msk.bf16.mxu0 %vm3684_vm8, %v11286_v40  ;;  %8006 = vmatmul.mubr.msk.bf16.gmra.mrb[76].mxu1 %vm3684_vm8, %v11043_v54 }
 0x253   : > { %8009 = vmatprep.mubr.msk.bf16.mxu1 %vm3684_vm8, %v11054_v51 }
 0x256   : > { %v11537_v19 = vpop.f32.mrb[52].mxu1 }
 0x257   : > { %v11539_v48 = vpop.f32.mrb[53].mxu1 }
 0x258   : > { %12578 = vst [vmem:[#allocation23_spill] sm:$0xff] %v11539_v48  ;;  %v11541_v43 = vpop.f32.mrb[54].mxu1 }
 0x259   : > { %12579 = vst [vmem:[#allocation21_spill] sm:$0xff] %v11541_v43  ;;  %8158 = vmatmul.mubr.msk.bf16.gmra.mrb[96].mxu0 %vm3684_vm8, %v11310_v15  ;;  %v11545_v50 = vpop.f32.mrb[55].mxu1 }
 0x25a   : > { %12580 = vst [vmem:[#allocation34_spill] sm:$0xff] %v11545_v50  ;;  %8161 = vmatprep.mubr.msk.bf16.mxu0 %vm3684_vm8, %v11314_v59  ;;  %8010 = vmatmul.mubr.msk.bf16.gmra.mrb[80].mxu1 %vm3684_vm8, %v11076_v2 }
 0x25b   : > { %8013 = vmatprep.mubr.msk.bf16.mxu1 %vm3684_vm8, %v11110_v16 }
 0x261   : > { %8162 = vmatmul.mubr.msk.bf16.gmra.mrb[100].mxu0 %vm3684_vm8, %v11330_v10 }
 0x262   : > { %8165 = vmatprep.mubr.msk.bf16.mxu0 %vm3684_vm8, %v11336_v18  ;;  %8014 = vmatmul.mubr.msk.bf16.gmra.mrb[84].mxu1 %vm3684_vm8, %v11141_v58  ;;  %v11580_v58 = vld [vmem:[%s12471_s2] ss:$0 sm:$0xff] }
 0x263   : > { %8017 = vmatprep.mubr.msk.bf16.mxu1 %vm3684_vm8, %v11159_v1  ;;  %v11561_v54 = vpop.f32.mrb[56].mxu1 }
 0x264   : > { %12581 = vst [vmem:[#allocation35_spill] sm:$0xff] %v11561_v54  ;;  %v11563_v51 = vpop.f32.mrb[57].mxu1 }
 0x265   : > { %12582 = vst [vmem:[#allocation36_spill] sm:$0xff] %v11563_v51  ;;  %v11565_v2 = vpop.f32.mrb[58].mxu1 }
 0x266   : > { %12583 = vst [vmem:[#allocation37_spill] sm:$0xff] %v11565_v2  ;;  %v11567_v16 = vpop.f32.mrb[59].mxu1 }
 0x267   : > { %12584 = vst [vmem:[#allocation38_spill] sm:$0xff] %v11567_v16 }
 0x269   : > { %8166 = vmatmul.mubr.msk.bf16.gmra.mrb[104].mxu0 %vm3684_vm8, %v11356_v34 }
 0x26a   : > { %8169 = vmatprep.mubr.msk.bf16.mxu0 %vm3684_vm8, %v11373_v63  ;;  %8018 = vmatmul.mubr.msk.bf16.gmra.mrb[88].mxu1 %vm3684_vm8, %v11196_v24 }
 0x26b   : > { %8021 = vmatprep.mubr.msk.bf16.mxu1 %vm3684_vm8, %v11202_v0 }
 0x26c   : > { %v8063_v1 = vpop.f32.mrb[0].mxu0 }
 0x26d   : > { %v8193_v20 = vadd.f32 %v8063_v1, %v10948_v55  ;;  %v5075_v12 = vpop.f32.mrb[1].mxu0 }
 0x26e   : > { %v8194_v24 = vadd.f32 %v5075_v12, %v10954_v32  ;;  %v8064_v53 = vpop.f32.mrb[2].mxu0 }
 0x26f   : > { %v5723_v0 = vmul.f32 %v8193_v20, %v11580_v58  ;;  %v8195_v16 = vadd.f32 %v8064_v53, %v10960_v11  ;;  %v5078_v2 = vpop.f32.mrb[3].mxu0 }
 0x270   : > { %v5721_v51 = vmul.f32 %v8194_v24, %v11580_v58  ;;  %v8196_v54 = vadd.f32 %v5078_v2, %v10967_v23  ;;  %v11594_v55 = vpop.f32.mrb[60].mxu1 }
 0x271   : > { %12585 = vst [vmem:[#allocation39_spill] sm:$0xff] %v11594_v55  ;;  %v5858_v1 = vadd.f32 %v11587_v60, %v5723_v0  ;;  %v5724_v50 = vmul.f32 %v8195_v16, %v11580_v58  ;;  %8170 = vmatmul.mubr.msk.bf16.gmra.mrb[108].mxu0 %vm3684_vm8, %v11385_v62  ;;  %v11602_v32 = vpop.f32.mrb[61].mxu1 }
 0x272   : > { %12586 = vst [vmem:[#allocation40_spill] sm:$0xff] %v11602_v32  ;;  %v5856_v11 = vadd.f32 %v11587_v60, %v5721_v51  ;;  %v5722_v20 = vmul.f32 %v8196_v54, %v11580_v58  ;;  %8173 = vmatprep.mubr.msk.bf16.mxu0 %vm3684_vm8, %v11409_v6  ;;  %8022 = vmatmul.mubr.msk.bf16.gmra.mrb[92].mxu1 %vm3684_vm8, %v11230_v21  ;;  %v11610_v23 = vpop.f32.mrb[62].mxu1  ;;  %v12588_v32 = vld [vmem:[#allocation25_spill] sm:$0xff] }
 0x273   : > { %12587 = vst [vmem:[#allocation41_spill] sm:$0xff] %v11610_v23  ;;  %v5986_v2 = vmax.f32 %v5858_v1, 0.0  ;;  %v5859_v16 = vadd.f32 %v11587_v60, %v5724_v50  ;;  %8025 = vmatprep.mubr.msk.bf16.mxu1 %vm3684_vm8, %v11235_v8  ;;  %v11615_v12 = vpop.f32.mrb[63].mxu1  ;;  %v12589_v1 = vld [vmem:[#allocation26_spill] sm:$0xff] }
 0x274   : > { %v5984_v51 = vmax.f32 %v5856_v11, 0.0  ;;  %v5857_v54 = vadd.f32 %v11587_v60, %v5722_v20  ;;  %v8067_v24 = vpop.f32.mrb[4].mxu0  ;;  %v12590_v20 = vld [vmem:[#allocation27_spill] sm:$0xff] }
 0x275   : > { %v7468_v53 = vpack.c.bf16 %v5986_v2, %v5986_v2  ;;  %v5987_v0 = vmax.f32 %v5859_v16, 0.0  ;;  %v8197_v55 = vadd.f32 %v8067_v24, %v12588_v32  ;;  %v5091_v21 = vpop.f32.mrb[5].mxu0 }
 0x276   : > { %v7466_v43 = vpack.c.bf16 %v5984_v51, %v5984_v51  ;;  %v5985_v23 = vmax.f32 %v5857_v54, 0.0  ;;  %v8198_v48 = vadd.f32 %v5091_v21, %v12589_v1  ;;  %v8068_v50 = vpop.f32.mrb[6].mxu0  ;;  %v12591_v54 = vld [vmem:[#allocation29_spill] sm:$0xff] }
 0x277   : > { %6627 = vst.msk [vmem:[%s11620_s22 + $0x8] sm:$0xf] %vm6624_vm10, %v7468_v53  ;;  %v7469_v8 = vpack.c.bf16 %v5987_v0, %v5987_v0  ;;  %v5727_v11 = vmul.f32 %v8197_v55, %v11580_v58  ;;  %v8199_v2 = vadd.f32 %v8068_v50, %v12590_v20  ;;  %v5094_v32 = vpop.f32.mrb[7].mxu0  ;;  %v12592_v20 = vld [vmem:[#allocation31_spill] sm:$0xff] }
 0x278   : > { %6625 = vst.msk [vmem:[%s11620_s22] sm:$0xf] %vm6624_vm10, %v7466_v43  ;;  %v7467_v16 = vpack.c.bf16 %v5985_v23, %v5985_v23  ;;  %v5725_v51 = vmul.f32 %v8198_v48, %v11580_v58  ;;  %v8200_v24 = vadd.f32 %v5094_v32, %v12591_v54 }
 0x279   : > { %6628 = vst.msk [vmem:[%s11620_s22 + $0xc] sm:$0xf] %vm6624_vm10, %v7469_v8  ;;  %v5862_v21 = vadd.f32 %v11587_v60, %v5727_v11  ;;  %v5728_v1 = vmul.f32 %v8199_v2, %v11580_v58  ;;  %8174 = vmatmul.mubr.msk.bf16.gmra.mrb[112].mxu0 %vm3684_vm8, %v11404_v22 }
 0x27a   : > { %6626 = vst.msk [vmem:[%s11620_s22 + $0x4] sm:$0xf] %vm6624_vm10, %v7467_v16  ;;  %v5860_v55 = vadd.f32 %v11587_v60, %v5725_v51  ;;  %v5726_v43 = vmul.f32 %v8200_v24, %v11580_v58  ;;  %8177 = vmatprep.mubr.msk.bf16.mxu0 %vm3684_vm8, %v11439_v29  ;;  %8026 = vmatmul.mubr.msk.bf16.gmra.mrb[96].mxu1 %vm3684_vm8, %v11261_v5  ;;  %v12593_v51 = vld [vmem:[#allocation32_spill] sm:$0xff] }
 0x27b   : > { %v5990_v48 = vmax.f32 %v5862_v21, 0.0  ;;  %v5863_v23 = vadd.f32 %v11587_v60, %v5728_v1  ;;  %8029 = vmatprep.mubr.msk.bf16.mxu1 %vm3684_vm8, %v11265_v47  ;;  %v4998_v21 = vpop.permute.xlu0 %4997 }
 0x27c   : > { %v5988_v53 = vmax.f32 %v5860_v55, 0.0  ;;  %v5861_v0 = vadd.f32 %v11587_v60, %v5726_v43  ;;  %v8071_v50 = vpop.f32.mrb[8].mxu0  ;;  %v12594_v55 = vld [vmem:[#allocation33_spill] sm:$0xff] }
 0x27d   : > { %v7472_v8 = vpack.c.bf16 %v5990_v48, %v5990_v48  ;;  %v5991_v11 = vmax.f32 %v5863_v23, 0.0  ;;  %v8201_v2 = vadd.f32 %v8071_v50, %v12592_v20  ;;  %v5107_v32 = vpop.f32.mrb[9].mxu0 }
 0x27e   : > { %v7470_v16 = vpack.c.bf16 %v5988_v53, %v5988_v53  ;;  %v5989_v5 = vmax.f32 %v5861_v0, 0.0  ;;  %v8202_v54 = vadd.f32 %v5107_v32, %v12593_v51  ;;  %v8072_v24 = vpop.f32.mrb[10].mxu0  ;;  %v12595_v0 = vld [vmem:[#allocation28_spill] sm:$0xff] }
 0x27f   : > { %6631 = vst.msk [vmem:[%s11620_s22 + $0x18] sm:$0xf] %vm6624_vm10, %v7472_v8  ;;  %v7473_v47 = vpack.c.bf16 %v5991_v11, %v5991_v11  ;;  %v5731_v1 = vmul.f32 %v8201_v2, %v11580_v58  ;;  %v8203_v43 = vadd.f32 %v8072_v24, %v12594_v55  ;;  %v5110_v48 = vpop.f32.mrb[11].mxu0  ;;  %v7256_v20 = vcombine.low %v12595_v0, %v11081_v39  ;;  %v5008_v24 = vpop.permute.xlu0 %5007 }
 0x280   : > { %6629 = vst.msk [vmem:[%s11620_s22 + $0x10] sm:$0xf] %vm6624_vm10, %v7470_v16  ;;  %v7471_v23 = vpack.c.bf16 %v5989_v5, %v5989_v5  ;;  %v5729_v50 = vmul.f32 %v8202_v54, %v11580_v58  ;;  %v8204_v53 = vadd.f32 %v5110_v48, %v11145_v14  ;;  %v5000_v0 = vpop.permute.xlu1 %4999 }
 0x281   : > { %6632 = vst.msk [vmem:[%s11620_s22 + $0x1c] sm:$0xf] %vm6624_vm10, %v7473_v47  ;;  %v5866_v8 = vadd.f32 %v11587_v60, %v5731_v1  ;;  %v5732_v11 = vmul.f32 %v8203_v43, %v11580_v58  ;;  %8178 = vmatmul.mubr.msk.bf16.gmra.mrb[116].mxu0 %vm3684_vm8, %v11434_v35  ;;  %v5013_v54 = vsel %vm3248_vm6, %v7256_v20, %v4998_v21 }
 0x282   : > { %6630 = vst.msk [vmem:[%s11620_s22 + $0x14] sm:$0xf] %vm6624_vm10, %v7471_v23  ;;  %v5864_v2 = vadd.f32 %v11587_v60, %v5729_v50  ;;  %v5730_v32 = vmul.f32 %v8204_v53, %v11580_v58  ;;  %8181 = vmatprep.mubr.msk.bf16.mxu0 %vm3684_vm8, %v11471_v38  ;;  %8030 = vmatmul.mubr.msk.bf16.gmra.mrb[100].mxu1 %vm3684_vm8, %v11282_v30 }
 0x283   : > { %v5994_v39 = vmax.f32 %v5866_v8, 0.0  ;;  %v5867_v14 = vadd.f32 %v11587_v60, %v5732_v11  ;;  %8033 = vmatprep.mubr.msk.bf16.mxu1 %vm3684_vm8, %v11286_v40  ;;  %v5018_v20 = vsel %vm3441_vm7, %v5013_v54, %v5008_v24 }
 0x284   : > { %v5992_v16 = vmax.f32 %v5864_v2, 0.0  ;;  %v5865_v5 = vadd.f32 %v11587_v60, %v5730_v32  ;;  %v8075_v51 = vpop.f32.mrb[12].mxu0  ;;  %v12596_v32 = vld [vmem:[#allocation30_spill] sm:$0xff] }
 0x285   : > { %v7476_v47 = vpack.c.bf16 %v5994_v39, %v5994_v39  ;;  %v5995_v38 = vmax.f32 %v5867_v14, 0.0  ;;  %v8205_v1 = vadd.f32 %v8075_v51, %v11204_v57  ;;  %v5123_v30 = vpop.f32.mrb[13].mxu0 }
 0x286   : > { %v7474_v55 = vpack.c.bf16 %v5992_v16, %v5992_v16  ;;  %v5993_v43 = vmax.f32 %v5865_v5, 0.0  ;;  %v8206_v48 = vadd.f32 %v5123_v30, %v11207_v17  ;;  %v8076_v23 = vpop.f32.mrb[14].mxu0 }
 0x287   : > { %6635 = vst.msk [vmem:[%s11620_s22 + $0x28] sm:$0xf] %vm6624_vm10, %v7476_v47  ;;  %v7477_v40 = vpack.c.bf16 %v5995_v38, %v5995_v38  ;;  %v5735_v50 = vmul.f32 %v8205_v1, %v11580_v58  ;;  %v8207_v21 = vadd.f32 %v8076_v23, %v11214_v36  ;;  %v5126_v53 = vpop.f32.mrb[15].mxu0  ;;  %v7257_v36 = vcombine.low %v12596_v32, %v11101_v37  ;;  %v12597_v47 = vld [vmem:[#allocation22_spill] sm:$0xff]  ;;  %v5010_v1 = vpop.permute.xlu1 %5009 }
 0x288   : > { %6633 = vst.msk [vmem:[%s11620_s22 + $0x20] sm:$0xf] %vm6624_vm10, %v7474_v55  ;;  %v7475_v57 = vpack.c.bf16 %v5993_v43, %v5993_v43  ;;  %v5733_v8 = vmul.f32 %v8206_v48, %v11580_v58  ;;  %v8208_v17 = vadd.f32 %v5126_v53, %v11222_v44  ;;  %v12598_v43 = vld [vmem:[#allocation6_spill] sm:$0xff] }
 0x289   : > { %6636 = vst.msk [vmem:[%s11620_s22 + $0x2c] sm:$0xf] %vm6624_vm10, %v7477_v40  ;;  %v5870_v11 = vadd.f32 %v11587_v60, %v5735_v50  ;;  %v5736_v2 = vmul.f32 %v8207_v21, %v11580_v58  ;;  %8182 = vmatmul.mubr.msk.bf16.gmra.mrb[120].mxu0 %vm3684_vm8, %v11466_v4  ;;  %v5016_v24 = vsel %vm3248_vm6, %v7257_v36, %v5000_v0  ;;  %v12599_v50 = vld [vmem:[#allocation5_spill] sm:$0xff] }
 0x28a   : > { %6634 = vst.msk [vmem:[%s11620_s22 + $0x24] sm:$0xf] %vm6624_vm10, %v7475_v57  ;;  %v5868_v39 = vadd.f32 %v11587_v60, %v5733_v8  ;;  %v5734_v14 = vmul.f32 %v8208_v17, %v11580_v58  ;;  %8185 = vmatprep.mubr.msk.bf16.mxu0 %vm3684_vm8, %v5018_v20  ;;  %8034 = vmatmul.mubr.msk.bf16.gmra.mrb[104].mxu1 %vm3684_vm8, %v11310_v15  ;;  %v12600_v8 = vld [vmem:[#allocation8_spill] sm:$0xff] }
 0x28b   : > { %v5998_v44 = vmax.f32 %v5870_v11, 0.0  ;;  %v5871_v16 = vadd.f32 %v11587_v60, %v5736_v2  ;;  %8037 = vmatprep.mubr.msk.bf16.mxu1 %vm3684_vm8, %v11314_v59  ;;  %v5020_v20 = vsel %vm3441_vm7, %v5016_v24, %v5010_v1 }
 0x28c   : > { %v5996_v37 = vmax.f32 %v5868_v39, 0.0  ;;  %v5869_v4 = vadd.f32 %v11587_v60, %v5734_v14  ;;  %v8079_v5 = vpop.f32.mrb[16].mxu0 }
 0x28d   : > { %v7480_v51 = vpack.c.bf16 %v5998_v44, %v5998_v44  ;;  %v5999_v54 = vmax.f32 %v5871_v16, 0.0  ;;  %v8209_v38 = vadd.f32 %v8079_v5, %v12597_v47  ;;  %v5139_v15 = vpop.f32.mrb[17].mxu0 }
 0x28e   : > { %v7478_v30 = vpack.c.bf16 %v5996_v37, %v5996_v37  ;;  %v5997_v55 = vmax.f32 %v5869_v4, 0.0  ;;  %v8210_v48 = vadd.f32 %v5139_v15, %v12598_v43  ;;  %v8080_v59 = vpop.f32.mrb[18].mxu0 }
 0x28f   : > { %6639 = vst.msk [vmem:[%s11620_s22 + $0x38] sm:$0xf] %vm6624_vm10, %v7480_v51  ;;  %v7481_v23 = vpack.c.bf16 %v5999_v54, %v5999_v54  ;;  %v5739_v40 = vmul.f32 %v8209_v38, %v11580_v58  ;;  %v8211_v21 = vadd.f32 %v8080_v59, %v12599_v50  ;;  %v5142_v53 = vpop.f32.mrb[19].mxu0  ;;  %v12601_v51 = vld [vmem:[#allocation24_spill] sm:$0xff]  ;;  %v12602_v38 = vld [vmem:[#allocation7_spill] sm:$0xff] }
 0x290   : > { %6637 = vst.msk [vmem:[%s11620_s22 + $0x30] sm:$0xf] %vm6624_vm10, %v7478_v30  ;;  %v7479_v0 = vpack.c.bf16 %v5997_v55, %v5997_v55  ;;  %v5737_v57 = vmul.f32 %v8210_v48, %v11580_v58  ;;  %v8212_v17 = vadd.f32 %v5142_v53, %v12600_v8  ;;  %v12603_v55 = vld [vmem:[#allocation10_spill] sm:$0xff] }
 0x291   : > { %6640 = vst.msk [vmem:[%s11620_s22 + $0x3c] sm:$0xf] %vm6624_vm10, %v7481_v23  ;;  %v5874_v11 = vadd.f32 %v11587_v60, %v5739_v40  ;;  %v5740_v2 = vmul.f32 %v8211_v21, %v11580_v58  ;;  %8186 = vmatmul.mubr.msk.bf16.gmra.mrb[124].mxu0 %vm3684_vm8, %v5020_v20  ;;  %v12604_v40 = vld [vmem:[#allocation9_spill] sm:$0xff] }
 0x292   : > { %6638 = vst.msk [vmem:[%s11620_s22 + $0x34] sm:$0xf] %vm6624_vm10, %v7479_v0  ;;  %v5872_v32 = vadd.f32 %v11587_v60, %v5737_v57  ;;  %v5738_v36 = vmul.f32 %v8212_v17, %v11580_v58  ;;  %8038 = vmatmul.mubr.msk.bf16.gmra.mrb[108].mxu1 %vm3684_vm8, %v11330_v10 }
 0x293   : > { %v6002_v39 = vmax.f32 %v5874_v11, 0.0  ;;  %v5875_v14 = vadd.f32 %v11587_v60, %v5740_v2  ;;  %8041 = vmatprep.mubr.msk.bf16.mxu1 %vm3684_vm8, %v11336_v18 }
 0x294   : > { %v6000_v44 = vmax.f32 %v5872_v32, 0.0  ;;  %v5873_v16 = vadd.f32 %v11587_v60, %v5738_v36  ;;  %v8083_v37 = vpop.f32.mrb[20].mxu0 }
 0x295   : > { %v7484_v4 = vpack.c.bf16 %v6002_v39, %v6002_v39  ;;  %v6003_v5 = vmax.f32 %v5875_v14, 0.0  ;;  %v8213_v54 = vadd.f32 %v8083_v37, %v12601_v51  ;;  %v5155_v24 = vpop.f32.mrb[21].mxu0  ;;  %v12605_v39 = vld [vmem:[#allocation12_spill] sm:$0xff]  ;;  %v12606_v37 = vld [vmem:[#allocation11_spill] sm:$0xff] }
 0x296   : > { %v7482_v47 = vpack.c.bf16 %v6000_v44, %v6000_v44  ;;  %v6001_v10 = vmax.f32 %v5873_v16, 0.0  ;;  %v8214_v1 = vadd.f32 %v5155_v24, %v12602_v38  ;;  %v8084_v15 = vpop.f32.mrb[22].mxu0 }
 0x297   : > { %6643 = vst.msk [vmem:[%s11620_s22 + $0x48] sm:$0xf] %vm6624_vm10, %v7484_v4  ;;  %v7485_v18 = vpack.c.bf16 %v6003_v5, %v6003_v5  ;;  %v5743_v30 = vmul.f32 %v8213_v54, %v11580_v58  ;;  %v8215_v43 = vadd.f32 %v8084_v15, %v12603_v55  ;;  %v5158_v48 = vpop.f32.mrb[23].mxu0  ;;  %v12607_v54 = vld [vmem:[#allocation14_spill] sm:$0xff] }
 0x298   : > { %6641 = vst.msk [vmem:[%s11620_s22 + $0x40] sm:$0xf] %vm6624_vm10, %v7482_v47  ;;  %v7483_v59 = vpack.c.bf16 %v6001_v10, %v6001_v10  ;;  %v5741_v23 = vmul.f32 %v8214_v1, %v11580_v58  ;;  %v8216_v50 = vadd.f32 %v5158_v48, %v12604_v40  ;;  %v12608_v1 = vld [vmem:[#allocation13_spill] sm:$0xff] }
 0x299   : > { %6644 = vst.msk [vmem:[%s11620_s22 + $0x4c] sm:$0xf] %vm6624_vm10, %v7485_v18  ;;  %v5878_v21 = vadd.f32 %v11587_v60, %v5743_v30  ;;  %v5744_v53 = vmul.f32 %v8215_v43, %v11580_v58 }
 0x29a   : > { %6642 = vst.msk [vmem:[%s11620_s22 + $0x44] sm:$0xf] %vm6624_vm10, %v7483_v59  ;;  %v5876_v0 = vadd.f32 %v11587_v60, %v5741_v23  ;;  %v5742_v20 = vmul.f32 %v8216_v50, %v11580_v58  ;;  %8042 = vmatmul.mubr.msk.bf16.gmra.mrb[112].mxu1 %vm3684_vm8, %v11356_v34 }
 0x29b   : > { %v6006_v57 = vmax.f32 %v5878_v21, 0.0  ;;  %v5879_v8 = vadd.f32 %v11587_v60, %v5744_v53  ;;  %8045 = vmatprep.mubr.msk.bf16.mxu1 %vm3684_vm8, %v11373_v63 }
 0x29c   : > { %v6004_v17 = vmax.f32 %v5876_v0, 0.0  ;;  %v5877_v11 = vadd.f32 %v11587_v60, %v5742_v20  ;;  %v8087_v2 = vpop.f32.mrb[24].mxu0  ;;  %v12609_v0 = vld [vmem:[#allocation16_spill] sm:$0xff] }
 0x29d   : > { %v7488_v32 = vpack.c.bf16 %v6006_v57, %v6006_v57  ;;  %v6007_v36 = vmax.f32 %v5879_v8, 0.0  ;;  %v8217_v14 = vadd.f32 %v8087_v2, %v12605_v39  ;;  %v5171_v44 = vpop.f32.mrb[25].mxu0 }
 0x29e   : > { %v7486_v16 = vpack.c.bf16 %v6004_v17, %v6004_v17  ;;  %v6005_v34 = vmax.f32 %v5877_v11, 0.0  ;;  %v8218_v4 = vadd.f32 %v5171_v44, %v12606_v37  ;;  %v8088_v5 = vpop.f32.mrb[26].mxu0  ;;  %v12610_v17 = vld [vmem:[#allocation15_spill] sm:$0xff] }
 0x29f   : > { %6647 = vst.msk [vmem:[%s11620_s22 + $0x58] sm:$0xf] %vm6624_vm10, %v7488_v32  ;;  %v7489_v63 = vpack.c.bf16 %v6007_v36, %v6007_v36  ;;  %v5747_v51 = vmul.f32 %v8217_v14, %v11580_v58  ;;  %v8219_v24 = vadd.f32 %v8088_v5, %v12607_v54  ;;  %v5174_v47 = vpop.f32.mrb[27].mxu0  ;;  %v12611_v36 = vld [vmem:[#allocation18_spill] sm:$0xff] }
 0x2a0   : > { %6645 = vst.msk [vmem:[%s11620_s22 + $0x50] sm:$0xf] %vm6624_vm10, %v7486_v16  ;;  %v7487_v10 = vpack.c.bf16 %v6005_v34, %v6005_v34  ;;  %v5745_v38 = vmul.f32 %v8218_v4, %v11580_v58  ;;  %v8220_v15 = vadd.f32 %v5174_v47, %v12608_v1  ;;  %v12612_v34 = vld [vmem:[#allocation17_spill] sm:$0xff] }
 0x2a1   : > { %6648 = vst.msk [vmem:[%s11620_s22 + $0x5c] sm:$0xf] %vm6624_vm10, %v7489_v63  ;;  %v5882_v18 = vadd.f32 %v11587_v60, %v5747_v51  ;;  %v5748_v30 = vmul.f32 %v8219_v24, %v11580_v58 }
 0x2a2   : > { %6646 = vst.msk [vmem:[%s11620_s22 + $0x54] sm:$0xf] %vm6624_vm10, %v7487_v10  ;;  %v5880_v55 = vadd.f32 %v11587_v60, %v5745_v38  ;;  %v5746_v43 = vmul.f32 %v8220_v15, %v11580_v58  ;;  %8046 = vmatmul.mubr.msk.bf16.gmra.mrb[116].mxu1 %vm3684_vm8, %v11385_v62 }
 0x2a3   : > { %v6010_v48 = vmax.f32 %v5882_v18, 0.0  ;;  %v5883_v59 = vadd.f32 %v11587_v60, %v5748_v30  ;;  %8049 = vmatprep.mubr.msk.bf16.mxu1 %vm3684_vm8, %v11409_v6 }
 0x2a4   : > { %v6008_v23 = vmax.f32 %v5880_v55, 0.0  ;;  %v5881_v40 = vadd.f32 %v11587_v60, %v5746_v43  ;;  %v8091_v50 = vpop.f32.mrb[28].mxu0 }
 0x2a5   : > { %v7492_v21 = vpack.c.bf16 %v6010_v48, %v6010_v48  ;;  %v6011_v53 = vmax.f32 %v5883_v59, 0.0  ;;  %v8221_v20 = vadd.f32 %v8091_v50, %v12609_v0  ;;  %v5187_v57 = vpop.f32.mrb[29].mxu0 }
 0x2a6   : > { %v7490_v8 = vpack.c.bf16 %v6008_v23, %v6008_v23  ;;  %v6009_v62 = vmax.f32 %v5881_v40, 0.0  ;;  %v8222_v11 = vadd.f32 %v5187_v57, %v12610_v17  ;;  %v8092_v2 = vpop.f32.mrb[30].mxu0 }
 0x2a7   : > { %6651 = vst.msk [vmem:[%s11620_s22 + $0x68] sm:$0xf] %vm6624_vm10, %v7492_v21  ;;  %v7493_v6 = vpack.c.bf16 %v6011_v53, %v6011_v53  ;;  %v5751_v32 = vmul.f32 %v8221_v20, %v11580_v58  ;;  %v8223_v39 = vadd.f32 %v8092_v2, %v12611_v36  ;;  %v5190_v14 = vpop.f32.mrb[31].mxu0 }
 0x2a8   : > { %6649 = vst.msk [vmem:[%s11620_s22 + $0x60] sm:$0xf] %vm6624_vm10, %v7490_v8  ;;  %v7491_v44 = vpack.c.bf16 %v6009_v62, %v6009_v62  ;;  %v5749_v16 = vmul.f32 %v8222_v11, %v11580_v58  ;;  %v8224_v37 = vadd.f32 %v5190_v14, %v12612_v34 }
 0x2a9   : > { %6652 = vst.msk [vmem:[%s11620_s22 + $0x6c] sm:$0xf] %vm6624_vm10, %v7493_v6  ;;  %v5886_v4 = vadd.f32 %v11587_v60, %v5751_v32  ;;  %v5752_v5 = vmul.f32 %v8223_v39, %v11580_v58 }
 0x2aa   : > { %6650 = vst.msk [vmem:[%s11620_s22 + $0x64] sm:$0xf] %vm6624_vm10, %v7491_v44  ;;  %v5884_v63 = vadd.f32 %v11587_v60, %v5749_v16  ;;  %v5750_v51 = vmul.f32 %v8224_v37, %v11580_v58  ;;  %8050 = vmatmul.mubr.msk.bf16.gmra.mrb[120].mxu1 %vm3684_vm8, %v11404_v22  ;;  %v12613_v16 = vld [vmem:[#allocation20_spill] sm:$0xff] }
 0x2ab   : > { %v6014_v54 = vmax.f32 %v5886_v4, 0.0  ;;  %v5887_v24 = vadd.f32 %v11587_v60, %v5752_v5  ;;  %8053 = vmatprep.mubr.msk.bf16.mxu1 %vm3684_vm8, %v11439_v29  ;;  %v12614_v5 = vld [vmem:[#allocation19_spill] sm:$0xff] }
 0x2ac   : > { %v6012_v47 = vmax.f32 %v5884_v63, 0.0  ;;  %v5885_v10 = vadd.f32 %v11587_v60, %v5750_v51  ;;  %v8095_v38 = vpop.f32.mrb[32].mxu0 }
 0x2ad   : > { %v7496_v1 = vpack.c.bf16 %v6014_v54, %v6014_v54  ;;  %v6015_v15 = vmax.f32 %v5887_v24, 0.0  ;;  %v8225_v18 = vadd.f32 %v8095_v38, %v11397_v27  ;;  %v5203_v30 = vpop.f32.mrb[33].mxu0 }
 0x2ae   : > { %v7494_v55 = vpack.c.bf16 %v6012_v47, %v6012_v47  ;;  %v6013_v22 = vmax.f32 %v5885_v10, 0.0  ;;  %v8226_v43 = vadd.f32 %v5203_v30, %v11406_v3  ;;  %v8096_v48 = vpop.f32.mrb[34].mxu0 }
 0x2af   : > { %6655 = vst.msk [vmem:[%s11620_s22 + $0x78] sm:$0xf] %vm6624_vm10, %v7496_v1  ;;  %v7497_v29 = vpack.c.bf16 %v6015_v15, %v6015_v15  ;;  %v5755_v59 = vmul.f32 %v8225_v18, %v11580_v58  ;;  %v8227_v23 = vadd.f32 %v8096_v48, %v11411_v28  ;;  %v5206_v40 = vpop.f32.mrb[35].mxu0 }
 0x2b0   : > { %6653 = vst.msk [vmem:[%s11620_s22 + $0x70] sm:$0xf] %vm6624_vm10, %v7494_v55  ;;  %v7495_v50 = vpack.c.bf16 %v6013_v22, %v6013_v22  ;;  %v5753_v27 = vmul.f32 %v8226_v43, %v11580_v58  ;;  %v8228_v21 = vadd.f32 %v5206_v40, %v11415_v25 }
 0x2b1   : > { %6656 = vst.msk [vmem:[%s11620_s22 + $0x7c] sm:$0xf] %vm6624_vm10, %v7497_v29  ;;  %v5890_v3 = vadd.f32 %v11587_v60, %v5755_v59  ;;  %v5756_v53 = vmul.f32 %v8227_v23, %v11580_v58 }
 0x2b2   : > { %6654 = vst.msk [vmem:[%s11620_s22 + $0x74] sm:$0xf] %vm6624_vm10, %v7495_v50  ;;  %v5888_v0 = vadd.f32 %v11587_v60, %v5753_v27  ;;  %v5754_v28 = vmul.f32 %v8228_v21, %v11580_v58  ;;  %8054 = vmatmul.mubr.msk.bf16.gmra.mrb[124].mxu1 %vm3684_vm8, %v11434_v35 }
 0x2b3   : > { %v6018_v20 = vmax.f32 %v5890_v3, 0.0  ;;  %v5891_v57 = vadd.f32 %v11587_v60, %v5756_v53 }
 0x2b4   : > { %v6016_v25 = vmax.f32 %v5888_v0, 0.0  ;;  %v5889_v8 = vadd.f32 %v11587_v60, %v5754_v28  ;;  %v8099_v62 = vpop.f32.mrb[36].mxu0 }
 0x2b5   : > { %v7500_v17 = vpack.c.bf16 %v6018_v20, %v6018_v20  ;;  %v6019_v11 = vmax.f32 %v5891_v57, 0.0  ;;  %v8229_v2 = vadd.f32 %v8099_v62, %v11443_v61  ;;  %v5219_v6 = vpop.f32.mrb[37].mxu0 }
 0x2b6   : > { %v7498_v32 = vpack.c.bf16 %v6016_v25, %v6016_v25  ;;  %v6017_v36 = vmax.f32 %v5889_v8, 0.0  ;;  %v8230_v39 = vadd.f32 %v5219_v6, %v11447_v41  ;;  %v8100_v35 = vpop.f32.mrb[38].mxu0 }
 0x2b7   : > { %6659 = vst.msk [vmem:[%s11620_s22 + $0x88] sm:$0xf] %vm6624_vm10, %v7500_v17  ;;  %v7501_v14 = vpack.c.bf16 %v6019_v11, %v6019_v11  ;;  %v5759_v44 = vmul.f32 %v8229_v2, %v11580_v58  ;;  %v8231_v34 = vadd.f32 %v8100_v35, %v12613_v16  ;;  %v5222_v37 = vpop.f32.mrb[39].mxu0 }
 0x2b8   : > { %6657 = vst.msk [vmem:[%s11620_s22 + $0x80] sm:$0xf] %vm6624_vm10, %v7498_v32  ;;  %v7499_v4 = vpack.c.bf16 %v6017_v36, %v6017_v36  ;;  %v5757_v61 = vmul.f32 %v8230_v39, %v11580_v58  ;;  %v8232_v63 = vadd.f32 %v5222_v37, %v12614_v5 }
 0x2b9   : > { %6660 = vst.msk [vmem:[%s11620_s22 + $0x8c] sm:$0xf] %vm6624_vm10, %v7501_v14  ;;  %v5894_v41 = vadd.f32 %v11587_v60, %v5759_v44  ;;  %v5760_v51 = vmul.f32 %v8231_v34, %v11580_v58 }
 0x2ba   : > { %6658 = vst.msk [vmem:[%s11620_s22 + $0x84] sm:$0xf] %vm6624_vm10, %v7499_v4  ;;  %v5892_v54 = vadd.f32 %v11587_v60, %v5757_v61  ;;  %v5758_v24 = vmul.f32 %v8232_v63, %v11580_v58 }
 0x2bb   : > { %v6022_v47 = vmax.f32 %v5894_v41, 0.0  ;;  %v5895_v10 = vadd.f32 %v11587_v60, %v5760_v51 }
 0x2bc   : > { %v6020_v38 = vmax.f32 %v5892_v54, 0.0  ;;  %v5893_v1 = vadd.f32 %v11587_v60, %v5758_v24  ;;  %v8103_v15 = vpop.f32.mrb[40].mxu0 }
 0x2bd   : > { %v7504_v18 = vpack.c.bf16 %v6022_v47, %v6022_v47  ;;  %v6023_v30 = vmax.f32 %v5895_v10, 0.0  ;;  %v8233_v55 = vadd.f32 %v8103_v15, %v11468_v52  ;;  %v5235_v22 = vpop.f32.mrb[41].mxu0 }
 0x2be   : > { %v7502_v43 = vpack.c.bf16 %v6020_v38, %v6020_v38  ;;  %v6021_v48 = vmax.f32 %v5893_v1, 0.0  ;;  %v8234_v29 = vadd.f32 %v5235_v22, %v11475_v33  ;;  %v8104_v59 = vpop.f32.mrb[42].mxu0 }
 0x2bf   : > { %6663 = vst.msk [vmem:[%s11620_s22 + $0x98] sm:$0xf] %vm6624_vm10, %v7504_v18  ;;  %v7505_v23 = vpack.c.bf16 %v6023_v30, %v6023_v30  ;;  %v5763_v40 = vmul.f32 %v8233_v55, %v11580_v58  ;;  %v8235_v50 = vadd.f32 %v8104_v59, %v11481_v7  ;;  %v5238_v27 = vpop.f32.mrb[43].mxu0 }
 0x2c0   : > { %6661 = vst.msk [vmem:[%s11620_s22 + $0x90] sm:$0xf] %vm6624_vm10, %v7502_v43  ;;  %v7503_v21 = vpack.c.bf16 %v6021_v48, %v6021_v48  ;;  %v5761_v52 = vmul.f32 %v8234_v29, %v11580_v58  ;;  %v8236_v3 = vadd.f32 %v5238_v27, %v11485_v45 }
 0x2c1   : > { %6664 = vst.msk [vmem:[%s11620_s22 + $0x9c] sm:$0xf] %vm6624_vm10, %v7505_v23  ;;  %v5898_v33 = vadd.f32 %v11587_v60, %v5763_v40  ;;  %v5764_v53 = vmul.f32 %v8235_v50, %v11580_v58 }
 0x2c2   : > { %6662 = vst.msk [vmem:[%s11620_s22 + $0x94] sm:$0xf] %vm6624_vm10, %v7503_v21  ;;  %v5896_v0 = vadd.f32 %v11587_v60, %v5761_v52  ;;  %v5762_v7 = vmul.f32 %v8236_v3, %v11580_v58 }
 0x2c3   : > { %v6026_v28 = vmax.f32 %v5898_v33, 0.0  ;;  %v5899_v20 = vadd.f32 %v11587_v60, %v5764_v53 }
 0x2c4   : > { %v6024_v57 = vmax.f32 %v5896_v0, 0.0  ;;  %v5897_v45 = vadd.f32 %v11587_v60, %v5762_v7  ;;  %v8107_v25 = vpop.f32.mrb[44].mxu0  ;;  %v12615_v7 = vld [vmem:[#allocation23_spill] sm:$0xff] }
 0x2c5   : > { %v7508_v8 = vpack.c.bf16 %v6026_v28, %v6026_v28  ;;  %v6027_v62 = vmax.f32 %v5899_v20, 0.0  ;;  %v8237_v17 = vadd.f32 %v8107_v25, %v11497_v9  ;;  %v5251_v11 = vpop.f32.mrb[45].mxu0  ;;  %v12616_v25 = vld [vmem:[#allocation21_spill] sm:$0xff] }
 0x2c6   : > { %v7506_v2 = vpack.c.bf16 %v6024_v57, %v6024_v57  ;;  %v6025_v6 = vmax.f32 %v5897_v45, 0.0  ;;  %v8238_v32 = vadd.f32 %v5251_v11, %v11499_v31  ;;  %v8108_v36 = vpop.f32.mrb[46].mxu0  ;;  %v12617_v11 = vld [vmem:[#allocation34_spill] sm:$0xff] }
 0x2c7   : > { %6667 = vst.msk [vmem:[%s11620_s22 + $0xa8] sm:$0xf] %vm6624_vm10, %v7508_v8  ;;  %v7509_v39 = vpack.c.bf16 %v6027_v62, %v6027_v62  ;;  %v5767_v35 = vmul.f32 %v8237_v17, %v11580_v58  ;;  %v8239_v14 = vadd.f32 %v8108_v36, %v11501_v49  ;;  %v5254_v44 = vpop.f32.mrb[47].mxu0 }
 0x2c8   : > { %6665 = vst.msk [vmem:[%s11620_s22 + $0xa0] sm:$0xf] %vm6624_vm10, %v7506_v2  ;;  %v7507_v16 = vpack.c.bf16 %v6025_v6, %v6025_v6  ;;  %v5765_v9 = vmul.f32 %v8238_v32, %v11580_v58  ;;  %v8240_v34 = vadd.f32 %v5254_v44, %v11503_v56 }
 0x2c9   : > { %6668 = vst.msk [vmem:[%s11620_s22 + $0xac] sm:$0xf] %vm6624_vm10, %v7509_v39  ;;  %v5902_v31 = vadd.f32 %v11587_v60, %v5767_v35  ;;  %v5768_v37 = vmul.f32 %v8239_v14, %v11580_v58 }
 0x2ca   : > { %6666 = vst.msk [vmem:[%s11620_s22 + $0xa4] sm:$0xf] %vm6624_vm10, %v7507_v16  ;;  %v5900_v4 = vadd.f32 %v11587_v60, %v5765_v9  ;;  %v5766_v49 = vmul.f32 %v8240_v34, %v11580_v58 }
 0x2cb   : > { %v6030_v61 = vmax.f32 %v5902_v31, 0.0  ;;  %v5903_v5 = vadd.f32 %v11587_v60, %v5768_v37  ;;  %v12618_v37 = vld [vmem:[#allocation35_spill] sm:$0xff] }
 0x2cc   : > { %v6028_v63 = vmax.f32 %v5900_v4, 0.0  ;;  %v5901_v56 = vadd.f32 %v11587_v60, %v5766_v49  ;;  %v8111_v41 = vpop.f32.mrb[48].mxu0 }
 0x2cd   : > { %v7512_v51 = vpack.c.bf16 %v6030_v61, %v6030_v61  ;;  %v6031_v54 = vmax.f32 %v5903_v5, 0.0  ;;  %v8241_v24 = vadd.f32 %v8111_v41, %v11517_v13  ;;  %v5267_v47 = vpop.f32.mrb[49].mxu0 }
 0x2ce   : > { %v7510_v10 = vpack.c.bf16 %v6028_v63, %v6028_v63  ;;  %v6029_v38 = vmax.f32 %v5901_v56, 0.0  ;;  %v8242_v1 = vadd.f32 %v5267_v47, %v11521_v42  ;;  %v8112_v15 = vpop.f32.mrb[50].mxu0  ;;  %v12619_v63 = vld [vmem:[#allocation36_spill] sm:$0xff] }
 0x2cf   : > { %6671 = vst.msk [vmem:[%s11620_s22 + $0xb8] sm:$0xf] %vm6624_vm10, %v7512_v51  ;;  %v7513_v18 = vpack.c.bf16 %v6031_v54, %v6031_v54  ;;  %v5771_v30 = vmul.f32 %v8241_v24, %v11580_v58  ;;  %v8243_v55 = vadd.f32 %v8112_v15, %v11525_v26  ;;  %v5270_v22 = vpop.f32.mrb[51].mxu0  ;;  %v12620_v24 = vld [vmem:[#allocation37_spill] sm:$0xff]  ;;  %v12621_v15 = vld [vmem:[#allocation38_spill] sm:$0xff] }
 0x2d0   : > { %6669 = vst.msk [vmem:[%s11620_s22 + $0xb0] sm:$0xf] %vm6624_vm10, %v7510_v10  ;;  %v7511_v43 = vpack.c.bf16 %v6029_v38, %v6029_v38  ;;  %v5769_v13 = vmul.f32 %v8242_v1, %v11580_v58  ;;  %v8244_v48 = vadd.f32 %v5270_v22, %v11527_v46 }
 0x2d1   : > { %6672 = vst.msk [vmem:[%s11620_s22 + $0xbc] sm:$0xf] %vm6624_vm10, %v7513_v18  ;;  %v5906_v42 = vadd.f32 %v11587_v60, %v5771_v30  ;;  %v5772_v29 = vmul.f32 %v8243_v55, %v11580_v58 }
 0x2d2   : > { %6670 = vst.msk [vmem:[%s11620_s22 + $0xb4] sm:$0xf] %vm6624_vm10, %v7511_v43  ;;  %v5904_v59 = vadd.f32 %v11587_v60, %v5769_v13  ;;  %v5770_v26 = vmul.f32 %v8244_v48, %v11580_v58 }
 0x2d3   : > { %v6034_v23 = vmax.f32 %v5906_v42, 0.0  ;;  %v5907_v40 = vadd.f32 %v11587_v60, %v5772_v29 }
 0x2d4   : > { %v6032_v50 = vmax.f32 %v5904_v59, 0.0  ;;  %v5905_v46 = vadd.f32 %v11587_v60, %v5770_v26  ;;  %v8115_v27 = vpop.f32.mrb[52].mxu0 }
 0x2d5   : > { %v7516_v21 = vpack.c.bf16 %v6034_v23, %v6034_v23  ;;  %v6035_v52 = vmax.f32 %v5907_v40, 0.0  ;;  %v8245_v3 = vadd.f32 %v8115_v27, %v11537_v19  ;;  %v5283_v33 = vpop.f32.mrb[53].mxu0  ;;  %v12622_v40 = vld [vmem:[#allocation39_spill] sm:$0xff] }
 0x2d6   : > { %v7514_v53 = vpack.c.bf16 %v6032_v50, %v6032_v50  ;;  %v6033_v0 = vmax.f32 %v5905_v46, 0.0  ;;  %v8246_v28 = vadd.f32 %v5283_v33, %v12615_v7  ;;  %v8116_v20 = vpop.f32.mrb[54].mxu0  ;;  %v12624_v7 = vld [vmem:[#allocation41_spill] sm:$0xff] }
 0x2d7   : > { %6675 = vst.msk [vmem:[%s11620_s22 + $0xc8] sm:$0xf] %vm6624_vm10, %v7516_v21  ;;  %v7517_v57 = vpack.c.bf16 %v6035_v52, %v6035_v52  ;;  %v5775_v45 = vmul.f32 %v8245_v3, %v11580_v58  ;;  %v8247_v8 = vadd.f32 %v8116_v20, %v12616_v25  ;;  %v5286_v62 = vpop.f32.mrb[55].mxu0  ;;  %v12623_v52 = vld [vmem:[#allocation40_spill] sm:$0xff] }
 0x2d8   : > { %6673 = vst.msk [vmem:[%s11620_s22 + $0xc0] sm:$0xf] %vm6624_vm10, %v7514_v53  ;;  %v7515_v17 = vpack.c.bf16 %v6033_v0, %v6033_v0  ;;  %v5773_v19 = vmul.f32 %v8246_v28, %v11580_v58  ;;  %v8248_v2 = vadd.f32 %v5286_v62, %v12617_v11 }
 0x2d9   : > { %6676 = vst.msk [vmem:[%s11620_s22 + $0xcc] sm:$0xf] %vm6624_vm10, %v7517_v57  ;;  %v5910_v6 = vadd.f32 %v11587_v60, %v5775_v45  ;;  %v5776_v32 = vmul.f32 %v8247_v8, %v11580_v58 }
 0x2da   : > { %6674 = vst.msk [vmem:[%s11620_s22 + $0xc4] sm:$0xf] %vm6624_vm10, %v7515_v17  ;;  %v5908_v36 = vadd.f32 %v11587_v60, %v5773_v19  ;;  %v5774_v39 = vmul.f32 %v8248_v2, %v11580_v58 }
 0x2db   : > { %v6038_v35 = vmax.f32 %v5910_v6, 0.0  ;;  %v5911_v14 = vadd.f32 %v11587_v60, %v5776_v32 }
 0x2dc   : > { %v6036_v44 = vmax.f32 %v5908_v36, 0.0  ;;  %v5909_v16 = vadd.f32 %v11587_v60, %v5774_v39  ;;  %v8119_v9 = vpop.f32.mrb[56].mxu0 }
 0x2dd   : > { %v7520_v34 = vpack.c.bf16 %v6038_v35, %v6038_v35  ;;  %v6039_v31 = vmax.f32 %v5911_v14, 0.0  ;;  %v8249_v4 = vadd.f32 %v8119_v9, %v12618_v37  ;;  %v5299_v49 = vpop.f32.mrb[57].mxu0 }
 0x2de   : > { %v7518_v61 = vpack.c.bf16 %v6036_v44, %v6036_v44  ;;  %v6037_v5 = vmax.f32 %v5909_v16, 0.0  ;;  %v8250_v56 = vadd.f32 %v5299_v49, %v12619_v63  ;;  %v8120_v41 = vpop.f32.mrb[58].mxu0 }
 0x2df   : > { %6679 = vst.msk [vmem:[%s11620_s22 + $0xd8] sm:$0xf] %vm6624_vm10, %v7520_v34  ;;  %v7521_v51 = vpack.c.bf16 %v6039_v31, %v6039_v31  ;;  %v5779_v54 = vmul.f32 %v8249_v4, %v11580_v58  ;;  %v8251_v47 = vadd.f32 %v8120_v41, %v12620_v24  ;;  %v5302_v10 = vpop.f32.mrb[59].mxu0 }
 0x2e0   : > { %6677 = vst.msk [vmem:[%s11620_s22 + $0xd0] sm:$0xf] %vm6624_vm10, %v7518_v61  ;;  %v7519_v38 = vpack.c.bf16 %v6037_v5, %v6037_v5  ;;  %v5777_v1 = vmul.f32 %v8250_v56, %v11580_v58  ;;  %v8252_v18 = vadd.f32 %v5302_v10, %v12621_v15 }
 0x2e1   : > { %6680 = vst.msk [vmem:[%s11620_s22 + $0xdc] sm:$0xf] %vm6624_vm10, %v7521_v51  ;;  %v5914_v30 = vadd.f32 %v11587_v60, %v5779_v54  ;;  %v5780_v55 = vmul.f32 %v8251_v47, %v11580_v58 }
 0x2e2   : > { %6678 = vst.msk [vmem:[%s11620_s22 + $0xd4] sm:$0xf] %vm6624_vm10, %v7519_v38  ;;  %v5912_v22 = vadd.f32 %v11587_v60, %v5777_v1  ;;  %v5778_v43 = vmul.f32 %v8252_v18, %v11580_v58 }
 0x2e3   : > { %v6042_v13 = vmax.f32 %v5914_v30, 0.0  ;;  %v5915_v48 = vadd.f32 %v11587_v60, %v5780_v55 }
 0x2e4   : > { %v6040_v42 = vmax.f32 %v5912_v22, 0.0  ;;  %v5913_v29 = vadd.f32 %v11587_v60, %v5778_v43  ;;  %v8123_v59 = vpop.f32.mrb[60].mxu0  ;;  %v12005_v22 = vld [vmem:[%s12471_s2] ss:$0 sm:$0xff] }
 0x2e5   : > { %v7524_v26 = vpack.c.bf16 %v6042_v13, %v6042_v13  ;;  %v6043_v23 = vmax.f32 %v5915_v48, 0.0  ;;  %v8253_v50 = vadd.f32 %v8123_v59, %v12622_v40  ;;  %v5315_v46 = vpop.f32.mrb[61].mxu0  ;;  %v12012_v59 = vld [vmem:[%s12472_s3] ss:$0 sm:$0xff] }
 0x2e6   : > { %v7522_v27 = vpack.c.bf16 %v6040_v42, %v6040_v42  ;;  %v6041_v21 = vmax.f32 %v5913_v29, 0.0  ;;  %v8254_v3 = vadd.f32 %v5315_v46, %v12623_v52  ;;  %v8124_v33 = vpop.f32.mrb[62].mxu0 }
 0x2e7   : > { %6683 = vst.msk [vmem:[%s11620_s22 + $0xe8] sm:$0xf] %vm6624_vm10, %v7524_v26  ;;  %v7525_v53 = vpack.c.bf16 %v6043_v23, %v6043_v23  ;;  %v5783_v0 = vmul.f32 %v8253_v50, %v11580_v58  ;;  %v8255_v28 = vadd.f32 %v8124_v33, %v12624_v7  ;;  %v5318_v20 = vpop.f32.mrb[63].mxu0 }
 0x2e8   : > { %6681 = vst.msk [vmem:[%s11620_s22 + $0xe0] sm:$0xf] %vm6624_vm10, %v7522_v27  ;;  %v7523_v57 = vpack.c.bf16 %v6041_v21, %v6041_v21  ;;  %v5781_v45 = vmul.f32 %v8254_v3, %v11580_v58  ;;  %v8256_v25 = vadd.f32 %v5318_v20, %v11615_v12 }
 0x2e9   : > { %6684 = vst.msk [vmem:[%s11620_s22 + $0xec] sm:$0xf] %vm6624_vm10, %v7525_v53  ;;  %v5918_v8 = vadd.f32 %v11587_v60, %v5783_v0  ;;  %v5784_v62 = vmul.f32 %v8255_v28, %v11580_v58 }
 0x2ea   : > { %6682 = vst.msk [vmem:[%s11620_s22 + $0xe4] sm:$0xf] %vm6624_vm10, %v7523_v57  ;;  %v5916_v17 = vadd.f32 %v11587_v60, %v5781_v45  ;;  %v5782_v19 = vmul.f32 %v8256_v25, %v11580_v58 }
 0x2eb   : > { %v6046_v11 = vmax.f32 %v5918_v8, 0.0  ;;  %v5919_v2 = vadd.f32 %v11587_v60, %v5784_v62 }
 0x2ec   : > { %v6044_v12 = vmax.f32 %v5916_v17, 0.0  ;;  %v5917_v6 = vadd.f32 %v11587_v60, %v5782_v19  ;;  %v8127_v32 = vpop.f32.mrb[64].mxu0 }
 0x2ed   : > { %v7528_v36 = vpack.c.bf16 %v6046_v11, %v6046_v11  ;;  %v6047_v39 = vmax.f32 %v5919_v2, 0.0  ;;  %v5331_v35 = vpop.f32.mrb[65].mxu0 }
 0x2ee   : > { %v7526_v14 = vpack.c.bf16 %v6044_v12, %v6044_v12  ;;  %v6045_v44 = vmax.f32 %v5917_v6, 0.0  ;;  %v8128_v16 = vpop.f32.mrb[66].mxu0 }
 0x2ef   : > { %6687 = vst.msk [vmem:[%s11620_s22 + $0xf8] sm:$0xf] %vm6624_vm10, %v7528_v36  ;;  %v7529_v9 = vpack.c.bf16 %v6047_v39, %v6047_v39  ;;  %v5334_v34 = vpop.f32.mrb[67].mxu0 }
 0x2f0   : > { %6685 = vst.msk [vmem:[%s11620_s22 + $0xf0] sm:$0xf] %vm6624_vm10, %v7526_v14  ;;  %v7527_v58 = vpack.c.bf16 %v6045_v44, %v6045_v44 }
 0x2f1   : > { %6688 = vst.msk [vmem:[%s11620_s22 + $0xfc] sm:$0xf] %vm6624_vm10, %v7529_v9 }
 0x2f2   : > { %6686 = vst.msk [vmem:[%s11620_s22 + $0xf4] sm:$0xf] %vm6624_vm10, %v7527_v58 }
 0x2f4   : > { %v8131_v31 = vpop.f32.mrb[68].mxu0 }
 0x2f5   : > { %v5347_v60 = vpop.f32.mrb[69].mxu0 }
 0x2f6   : > { %v8132_v37 = vpop.f32.mrb[70].mxu0 }
 0x2f7   : > { %v5350_v4 = vpop.f32.mrb[71].mxu0 }
 0x2fc   : > { %v11978_v49 = vpop.f32.mrb[72].mxu0 }
 0x2fd   : > { %v11980_v61 = vpop.f32.mrb[73].mxu0 }
 0x2fe   : > { %v11982_v5 = vpop.f32.mrb[74].mxu0 }
 0x2ff   : > { %v11984_v63 = vpop.f32.mrb[75].mxu0 }
 0x304   : > { %v11986_v56 = vpop.f32.mrb[76].mxu0 }
 0x305   : > { %v11988_v41 = vpop.f32.mrb[77].mxu0 }
 0x306   : > { %v11990_v51 = vpop.f32.mrb[78].mxu0 }
 0x307   : > { %v11992_v54 = vpop.f32.mrb[79].mxu0 }
 0x30c   : > { %v11994_v24 = vpop.f32.mrb[80].mxu0 }
 0x30d   : > { %v11996_v47 = vpop.f32.mrb[81].mxu0  ;;  %v7995_v10 = vpop.f32.mrb[64].mxu1 }
 0x30e   : > { %v11998_v38 = vpop.f32.mrb[82].mxu0  ;;  %v8257_v1 = vadd.f32 %v8127_v32, %v7995_v10  ;;  %v4668_v15 = vpop.f32.mrb[65].mxu1 }
 0x30f   : > { %v12000_v18 = vpop.f32.mrb[83].mxu0  ;;  %v8258_v30 = vadd.f32 %v5331_v35, %v4668_v15  ;;  %v7996_v55 = vpop.f32.mrb[66].mxu1 }
 0x310   : > { %v5787_v43 = vmul.f32 %v12005_v22, %v8257_v1  ;;  %v8259_v13 = vadd.f32 %v8128_v16, %v7996_v55  ;;  %v4671_v48 = vpop.f32.mrb[67].mxu1 }
 0x311   : > { %v5785_v42 = vmul.f32 %v12005_v22, %v8258_v30  ;;  %v8260_v29 = vadd.f32 %v5334_v34, %v4671_v48 }
 0x312   : > { %v5922_v26 = vadd.f32 %v12012_v59, %v5787_v43  ;;  %v5788_v23 = vmul.f32 %v12005_v22, %v8259_v13 }
 0x313   : > { %v5920_v40 = vadd.f32 %v12012_v59, %v5785_v42  ;;  %v5786_v50 = vmul.f32 %v12005_v22, %v8260_v29 }
 0x314   : > { %v12018_v46 = vpop.f32.mrb[84].mxu0  ;;  %v6050_v27 = vmax.f32 %v5922_v26, 0.0  ;;  %v5923_v21 = vadd.f32 %v12012_v59, %v5788_v23 }
 0x315   : > { %v12021_v52 = vpop.f32.mrb[85].mxu0  ;;  %v6048_v3 = vmax.f32 %v5920_v40, 0.0  ;;  %v5921_v33 = vadd.f32 %v12012_v59, %v5786_v50  ;;  %v7999_v53 = vpop.f32.mrb[68].mxu1 }
 0x316   : > { %v12024_v0 = vpop.f32.mrb[86].mxu0  ;;  %v7532_v7 = vpack.c.bf16 %v6050_v27, %v6050_v27  ;;  %v6051_v28 = vmax.f32 %v5923_v21, 0.0  ;;  %v8261_v20 = vadd.f32 %v8131_v31, %v7999_v53  ;;  %v4684_v57 = vpop.f32.mrb[69].mxu1 }
 0x317   : > { %v12026_v45 = vpop.f32.mrb[87].mxu0  ;;  %v7530_v25 = vpack.c.bf16 %v6048_v3, %v6048_v3  ;;  %v6049_v8 = vmax.f32 %v5921_v33, 0.0  ;;  %v8262_v62 = vadd.f32 %v5347_v60, %v4684_v57  ;;  %v8000_v17 = vpop.f32.mrb[70].mxu1 }
 0x318   : > { %6691 = vst.msk [vmem:[%s11620_s22 + $0x108] sm:$0xf] %vm6624_vm10, %v7532_v7  ;;  %v7533_v19 = vpack.c.bf16 %v6051_v28, %v6051_v28  ;;  %v5791_v11 = vmul.f32 %v12005_v22, %v8261_v20  ;;  %v8263_v2 = vadd.f32 %v8132_v37, %v8000_v17  ;;  %v4687_v12 = vpop.f32.mrb[71].mxu1 }
 0x319   : > { %6689 = vst.msk [vmem:[%s11620_s22 + $0x100] sm:$0xf] %vm6624_vm10, %v7530_v25  ;;  %v7531_v6 = vpack.c.bf16 %v6049_v8, %v6049_v8  ;;  %v5789_v32 = vmul.f32 %v12005_v22, %v8262_v62  ;;  %v8264_v36 = vadd.f32 %v5350_v4, %v4687_v12 }
 0x31a   : > { %6692 = vst.msk [vmem:[%s11620_s22 + $0x10c] sm:$0xf] %vm6624_vm10, %v7533_v19  ;;  %v5926_v39 = vadd.f32 %v12012_v59, %v5791_v11  ;;  %v5792_v35 = vmul.f32 %v12005_v22, %v8263_v2 }
 0x31b   : > { %6690 = vst.msk [vmem:[%s11620_s22 + $0x104] sm:$0xf] %vm6624_vm10, %v7531_v6  ;;  %v5924_v14 = vadd.f32 %v12012_v59, %v5789_v32  ;;  %v5790_v44 = vmul.f32 %v12005_v22, %v8264_v36 }
 0x31c   : > { %v12042_v16 = vpop.f32.mrb[88].mxu0  ;;  %v6054_v9 = vmax.f32 %v5926_v39, 0.0  ;;  %v5927_v34 = vadd.f32 %v12012_v59, %v5792_v35 }
 0x31d   : > { %v12045_v58 = vpop.f32.mrb[89].mxu0  ;;  %v6052_v31 = vmax.f32 %v5924_v14, 0.0  ;;  %v5925_v60 = vadd.f32 %v12012_v59, %v5790_v44  ;;  %v8003_v37 = vpop.f32.mrb[72].mxu1 }
 0x31e   : > { %v12048_v4 = vpop.f32.mrb[90].mxu0  ;;  %v7536_v10 = vpack.c.bf16 %v6054_v9, %v6054_v9  ;;  %v6055_v1 = vmax.f32 %v5927_v34, 0.0  ;;  %v8265_v15 = vadd.f32 %v11978_v49, %v8003_v37  ;;  %v4700_v30 = vpop.f32.mrb[73].mxu1 }
 0x31f   : > { %v12051_v55 = vpop.f32.mrb[91].mxu0  ;;  %v7534_v43 = vpack.c.bf16 %v6052_v31, %v6052_v31  ;;  %v6053_v13 = vmax.f32 %v5925_v60, 0.0  ;;  %v8266_v48 = vadd.f32 %v11980_v61, %v4700_v30  ;;  %v8004_v42 = vpop.f32.mrb[74].mxu1 }
 0x320   : > { %6695 = vst.msk [vmem:[%s11620_s22 + $0x118] sm:$0xf] %vm6624_vm10, %v7536_v10  ;;  %v7537_v29 = vpack.c.bf16 %v6055_v1, %v6055_v1  ;;  %v5795_v26 = vmul.f32 %v12005_v22, %v8265_v15  ;;  %v8267_v23 = vadd.f32 %v11982_v5, %v8004_v42  ;;  %v4703_v40 = vpop.f32.mrb[75].mxu1 }
 0x321   : > { %6693 = vst.msk [vmem:[%s11620_s22 + $0x110] sm:$0xf] %vm6624_vm10, %v7534_v43  ;;  %v7535_v49 = vpack.c.bf16 %v6053_v13, %v6053_v13  ;;  %v5793_v50 = vmul.f32 %v12005_v22, %v8266_v48  ;;  %v8268_v27 = vadd.f32 %v11984_v63, %v4703_v40 }
 0x322   : > { %6696 = vst.msk [vmem:[%s11620_s22 + $0x11c] sm:$0xf] %vm6624_vm10, %v7537_v29  ;;  %v5930_v61 = vadd.f32 %v12012_v59, %v5795_v26  ;;  %v5796_v21 = vmul.f32 %v12005_v22, %v8267_v23 }
 0x323   : > { %6694 = vst.msk [vmem:[%s11620_s22 + $0x114] sm:$0xf] %vm6624_vm10, %v7535_v49  ;;  %v5928_v3 = vadd.f32 %v12012_v59, %v5793_v50  ;;  %v5794_v5 = vmul.f32 %v12005_v22, %v8268_v27 }
 0x324   : > { %v12070_v33 = vpop.f32.mrb[92].mxu0  ;;  %v6058_v53 = vmax.f32 %v5930_v61, 0.0  ;;  %v5931_v7 = vadd.f32 %v12012_v59, %v5796_v21 }
 0x325   : > { %v12073_v28 = vpop.f32.mrb[93].mxu0  ;;  %v6056_v63 = vmax.f32 %v5928_v3, 0.0  ;;  %v5929_v20 = vadd.f32 %v12012_v59, %v5794_v5  ;;  %v8007_v57 = vpop.f32.mrb[76].mxu1 }
 0x326   : > { %v12076_v25 = vpop.f32.mrb[94].mxu0  ;;  %v7540_v8 = vpack.c.bf16 %v6058_v53, %v6058_v53  ;;  %v6059_v62 = vmax.f32 %v5931_v7, 0.0  ;;  %v8269_v17 = vadd.f32 %v11986_v56, %v8007_v57  ;;  %v4716_v19 = vpop.f32.mrb[77].mxu1 }
 0x327   : > { %v12079_v11 = vpop.f32.mrb[95].mxu0  ;;  %v7538_v2 = vpack.c.bf16 %v6056_v63, %v6056_v63  ;;  %v6057_v12 = vmax.f32 %v5929_v20, 0.0  ;;  %v8270_v6 = vadd.f32 %v11988_v41, %v4716_v19  ;;  %v8008_v32 = vpop.f32.mrb[78].mxu1 }
 0x328   : > { %6699 = vst.msk [vmem:[%s11620_s22 + $0x128] sm:$0xf] %vm6624_vm10, %v7540_v8  ;;  %v7541_v36 = vpack.c.bf16 %v6059_v62, %v6059_v62  ;;  %v5799_v39 = vmul.f32 %v12005_v22, %v8269_v17  ;;  %v8271_v35 = vadd.f32 %v11990_v51, %v8008_v32  ;;  %v4719_v14 = vpop.f32.mrb[79].mxu1 }
 0x329   : > { %6697 = vst.msk [vmem:[%s11620_s22 + $0x120] sm:$0xf] %vm6624_vm10, %v7538_v2  ;;  %v7539_v56 = vpack.c.bf16 %v6057_v12, %v6057_v12  ;;  %v5797_v44 = vmul.f32 %v12005_v22, %v8270_v6  ;;  %v8272_v9 = vadd.f32 %v11992_v54, %v4719_v14 }
 0x32a   : > { %6700 = vst.msk [vmem:[%s11620_s22 + $0x12c] sm:$0xf] %vm6624_vm10, %v7541_v36  ;;  %v5934_v41 = vadd.f32 %v12012_v59, %v5799_v39  ;;  %v5800_v34 = vmul.f32 %v12005_v22, %v8271_v35 }
 0x32b   : > { %6698 = vst.msk [vmem:[%s11620_s22 + $0x124] sm:$0xf] %vm6624_vm10, %v7539_v56  ;;  %v5932_v31 = vadd.f32 %v12012_v59, %v5797_v44  ;;  %v5798_v51 = vmul.f32 %v12005_v22, %v8272_v9 }
 0x32c   : > { %v12098_v60 = vpop.f32.mrb[96].mxu0  ;;  %v6062_v37 = vmax.f32 %v5934_v41, 0.0  ;;  %v5935_v10 = vadd.f32 %v12012_v59, %v5800_v34 }
 0x32d   : > { %v12101_v1 = vpop.f32.mrb[97].mxu0  ;;  %v6060_v54 = vmax.f32 %v5932_v31, 0.0  ;;  %v5933_v15 = vadd.f32 %v12012_v59, %v5798_v51  ;;  %v8011_v30 = vpop.f32.mrb[80].mxu1 }
 0x32e   : > { %v12104_v43 = vpop.f32.mrb[98].mxu0  ;;  %v7544_v13 = vpack.c.bf16 %v6062_v37, %v6062_v37  ;;  %v6063_v48 = vmax.f32 %v5935_v10, 0.0  ;;  %v8273_v42 = vadd.f32 %v11994_v24, %v8011_v30  ;;  %v4732_v29 = vpop.f32.mrb[81].mxu1 }
 0x32f   : > { %v12107_v26 = vpop.f32.mrb[99].mxu0  ;;  %v7542_v23 = vpack.c.bf16 %v6060_v54, %v6060_v54  ;;  %v6061_v40 = vmax.f32 %v5933_v15, 0.0  ;;  %v8274_v49 = vadd.f32 %v11996_v47, %v4732_v29  ;;  %v8012_v50 = vpop.f32.mrb[82].mxu1 }
 0x330   : > { %6703 = vst.msk [vmem:[%s11620_s22 + $0x138] sm:$0xf] %vm6624_vm10, %v7544_v13  ;;  %v7545_v27 = vpack.c.bf16 %v6063_v48, %v6063_v48  ;;  %v5803_v61 = vmul.f32 %v12005_v22, %v8273_v42  ;;  %v8275_v21 = vadd.f32 %v11998_v38, %v8012_v50  ;;  %v4735_v3 = vpop.f32.mrb[83].mxu1 }
 0x331   : > { %6701 = vst.msk [vmem:[%s11620_s22 + $0x130] sm:$0xf] %vm6624_vm10, %v7542_v23  ;;  %v7543_v24 = vpack.c.bf16 %v6061_v40, %v6061_v40  ;;  %v5801_v5 = vmul.f32 %v12005_v22, %v8274_v49  ;;  %v8276_v53 = vadd.f32 %v12000_v18, %v4735_v3 }
 0x332   : > { %6704 = vst.msk [vmem:[%s11620_s22 + $0x13c] sm:$0xf] %vm6624_vm10, %v7545_v27  ;;  %v5938_v47 = vadd.f32 %v12012_v59, %v5803_v61  ;;  %v5804_v7 = vmul.f32 %v12005_v22, %v8275_v21 }
 0x333   : > { %6702 = vst.msk [vmem:[%s11620_s22 + $0x134] sm:$0xf] %vm6624_vm10, %v7543_v24  ;;  %v5936_v63 = vadd.f32 %v12012_v59, %v5801_v5  ;;  %v5802_v38 = vmul.f32 %v12005_v22, %v8276_v53 }
 0x334   : > { %v12126_v20 = vpop.f32.mrb[100].mxu0  ;;  %v6066_v57 = vmax.f32 %v5938_v47, 0.0  ;;  %v5939_v8 = vadd.f32 %v12012_v59, %v5804_v7 }
 0x335   : > { %v12129_v62 = vpop.f32.mrb[101].mxu0  ;;  %v6064_v18 = vmax.f32 %v5936_v63, 0.0  ;;  %v5937_v17 = vadd.f32 %v12012_v59, %v5802_v38  ;;  %v8015_v19 = vpop.f32.mrb[84].mxu1 }
 0x336   : > { %v12132_v2 = vpop.f32.mrb[102].mxu0  ;;  %v7548_v12 = vpack.c.bf16 %v6066_v57, %v6066_v57  ;;  %v6067_v6 = vmax.f32 %v5939_v8, 0.0  ;;  %v8277_v32 = vadd.f32 %v12018_v46, %v8015_v19  ;;  %v4748_v36 = vpop.f32.mrb[85].mxu1 }
 0x337   : > { %v12135_v39 = vpop.f32.mrb[103].mxu0  ;;  %v7546_v35 = vpack.c.bf16 %v6064_v18, %v6064_v18  ;;  %v6065_v14 = vmax.f32 %v5937_v17, 0.0  ;;  %v8278_v56 = vadd.f32 %v12021_v52, %v4748_v36  ;;  %v8016_v44 = vpop.f32.mrb[86].mxu1 }
 0x338   : > { %6707 = vst.msk [vmem:[%s11620_s22 + $0x148] sm:$0xf] %vm6624_vm10, %v7548_v12  ;;  %v7549_v9 = vpack.c.bf16 %v6067_v6, %v6067_v6  ;;  %v5807_v41 = vmul.f32 %v12005_v22, %v8277_v32  ;;  %v8279_v34 = vadd.f32 %v12024_v0, %v8016_v44  ;;  %v4751_v31 = vpop.f32.mrb[87].mxu1 }
 0x339   : > { %6705 = vst.msk [vmem:[%s11620_s22 + $0x140] sm:$0xf] %vm6624_vm10, %v7546_v35  ;;  %v7547_v46 = vpack.c.bf16 %v6065_v14, %v6065_v14  ;;  %v5805_v51 = vmul.f32 %v12005_v22, %v8278_v56  ;;  %v8280_v37 = vadd.f32 %v12026_v45, %v4751_v31 }
 0x33a   : > { %6708 = vst.msk [vmem:[%s11620_s22 + $0x14c] sm:$0xf] %vm6624_vm10, %v7549_v9  ;;  %v5942_v52 = vadd.f32 %v12012_v59, %v5807_v41  ;;  %v5808_v10 = vmul.f32 %v12005_v22, %v8279_v34 }
 0x33b   : > { %6706 = vst.msk [vmem:[%s11620_s22 + $0x144] sm:$0xf] %vm6624_vm10, %v7547_v46  ;;  %v5940_v54 = vadd.f32 %v12012_v59, %v5805_v51  ;;  %v5806_v0 = vmul.f32 %v12005_v22, %v8280_v37 }
 0x33c   : > { %v12154_v15 = vpop.f32.mrb[104].mxu0  ;;  %v6070_v30 = vmax.f32 %v5942_v52, 0.0  ;;  %v5943_v13 = vadd.f32 %v12012_v59, %v5808_v10 }
 0x33d   : > { %v12157_v48 = vpop.f32.mrb[105].mxu0  ;;  %v6068_v45 = vmax.f32 %v5940_v54, 0.0  ;;  %v5941_v42 = vadd.f32 %v12012_v59, %v5806_v0  ;;  %v8019_v29 = vpop.f32.mrb[88].mxu1 }
 0x33e   : > { %v12160_v23 = vpop.f32.mrb[106].mxu0  ;;  %v7552_v40 = vpack.c.bf16 %v6070_v30, %v6070_v30  ;;  %v6071_v49 = vmax.f32 %v5943_v13, 0.0  ;;  %v8281_v50 = vadd.f32 %v12042_v16, %v8019_v29  ;;  %v4764_v27 = vpop.f32.mrb[89].mxu1 }
 0x33f   : > { %v12163_v61 = vpop.f32.mrb[107].mxu0  ;;  %v7550_v21 = vpack.c.bf16 %v6068_v45, %v6068_v45  ;;  %v6069_v3 = vmax.f32 %v5941_v42, 0.0  ;;  %v8282_v24 = vadd.f32 %v12045_v58, %v4764_v27  ;;  %v8020_v5 = vpop.f32.mrb[90].mxu1 }
 0x340   : > { %6711 = vst.msk [vmem:[%s11620_s22 + $0x158] sm:$0xf] %vm6624_vm10, %v7552_v40  ;;  %v7553_v53 = vpack.c.bf16 %v6071_v49, %v6071_v49  ;;  %v5811_v47 = vmul.f32 %v12005_v22, %v8281_v50  ;;  %v8283_v7 = vadd.f32 %v12048_v4, %v8020_v5  ;;  %v4767_v63 = vpop.f32.mrb[91].mxu1 }
 0x341   : > { %6709 = vst.msk [vmem:[%s11620_s22 + $0x150] sm:$0xf] %vm6624_vm10, %v7550_v21  ;;  %v7551_v16 = vpack.c.bf16 %v6069_v3, %v6069_v3  ;;  %v5809_v38 = vmul.f32 %v12005_v22, %v8282_v24  ;;  %v8284_v57 = vadd.f32 %v12051_v55, %v4767_v63 }
 0x342   : > { %6712 = vst.msk [vmem:[%s11620_s22 + $0x15c] sm:$0xf] %vm6624_vm10, %v7553_v53  ;;  %v5946_v58 = vadd.f32 %v12012_v59, %v5811_v47  ;;  %v5812_v8 = vmul.f32 %v12005_v22, %v8283_v7 }
 0x343   : > { %6710 = vst.msk [vmem:[%s11620_s22 + $0x154] sm:$0xf] %vm6624_vm10, %v7551_v16  ;;  %v5944_v18 = vadd.f32 %v12012_v59, %v5809_v38  ;;  %v5810_v4 = vmul.f32 %v12005_v22, %v8284_v57 }
 0x344   : > { %v12182_v17 = vpop.f32.mrb[108].mxu0  ;;  %v6074_v19 = vmax.f32 %v5946_v58, 0.0  ;;  %v5947_v12 = vadd.f32 %v12012_v59, %v5812_v8 }
 0x345   : > { %v12185_v6 = vpop.f32.mrb[109].mxu0  ;;  %v6072_v55 = vmax.f32 %v5944_v18, 0.0  ;;  %v5945_v32 = vadd.f32 %v12012_v59, %v5810_v4  ;;  %v8023_v36 = vpop.f32.mrb[92].mxu1 }
 0x346   : > { %v12188_v35 = vpop.f32.mrb[110].mxu0  ;;  %v7556_v14 = vpack.c.bf16 %v6074_v19, %v6074_v19  ;;  %v6075_v56 = vmax.f32 %v5947_v12, 0.0  ;;  %v8285_v44 = vadd.f32 %v12070_v33, %v8023_v36  ;;  %v4780_v9 = vpop.f32.mrb[93].mxu1 }
 0x347   : > { %v12191_v41 = vpop.f32.mrb[111].mxu0  ;;  %v7554_v34 = vpack.c.bf16 %v6072_v55, %v6072_v55  ;;  %v6073_v31 = vmax.f32 %v5945_v32, 0.0  ;;  %v8286_v46 = vadd.f32 %v12073_v28, %v4780_v9  ;;  %v8024_v51 = vpop.f32.mrb[94].mxu1 }
 0x348   : > { %6715 = vst.msk [vmem:[%s11620_s22 + $0x168] sm:$0xf] %vm6624_vm10, %v7556_v14  ;;  %v7557_v37 = vpack.c.bf16 %v6075_v56, %v6075_v56  ;;  %v5815_v52 = vmul.f32 %v12005_v22, %v8285_v44  ;;  %v8287_v10 = vadd.f32 %v12076_v25, %v8024_v51  ;;  %v4783_v54 = vpop.f32.mrb[95].mxu1 }
 0x349   : > { %6713 = vst.msk [vmem:[%s11620_s22 + $0x160] sm:$0xf] %vm6624_vm10, %v7554_v34  ;;  %v7555_v33 = vpack.c.bf16 %v6073_v31, %v6073_v31  ;;  %v5813_v0 = vmul.f32 %v12005_v22, %v8286_v46  ;;  %v8288_v30 = vadd.f32 %v12079_v11, %v4783_v54 }
 0x34a   : > { %6716 = vst.msk [vmem:[%s11620_s22 + $0x16c] sm:$0xf] %vm6624_vm10, %v7557_v37  ;;  %v5950_v28 = vadd.f32 %v12012_v59, %v5815_v52  ;;  %v5816_v13 = vmul.f32 %v12005_v22, %v8287_v10 }
 0x34b   : > { %6714 = vst.msk [vmem:[%s11620_s22 + $0x164] sm:$0xf] %vm6624_vm10, %v7555_v33  ;;  %v5948_v45 = vadd.f32 %v12012_v59, %v5813_v0  ;;  %v5814_v25 = vmul.f32 %v12005_v22, %v8288_v30 }
 0x34c   : > { %v12210_v42 = vpop.f32.mrb[112].mxu0  ;;  %v6078_v29 = vmax.f32 %v5950_v28, 0.0  ;;  %v5951_v40 = vadd.f32 %v12012_v59, %v5816_v13 }
 0x34d   : > { %v12213_v49 = vpop.f32.mrb[113].mxu0  ;;  %v6076_v11 = vmax.f32 %v5948_v45, 0.0  ;;  %v5949_v50 = vadd.f32 %v12012_v59, %v5814_v25  ;;  %v8027_v27 = vpop.f32.mrb[96].mxu1 }
 0x34e   : > { %v12216_v21 = vpop.f32.mrb[114].mxu0  ;;  %v7560_v3 = vpack.c.bf16 %v6078_v29, %v6078_v29  ;;  %v6079_v24 = vmax.f32 %v5951_v40, 0.0  ;;  %v8289_v5 = vadd.f32 %v12098_v60, %v8027_v27  ;;  %v4796_v53 = vpop.f32.mrb[97].mxu1 }
 0x34f   : > { %v12219_v47 = vpop.f32.mrb[115].mxu0  ;;  %v7558_v7 = vpack.c.bf16 %v6076_v11, %v6076_v11  ;;  %v6077_v63 = vmax.f32 %v5949_v50, 0.0  ;;  %v8290_v16 = vadd.f32 %v12101_v1, %v4796_v53  ;;  %v8028_v38 = vpop.f32.mrb[98].mxu1 }
 0x350   : > { %6719 = vst.msk [vmem:[%s11620_s22 + $0x178] sm:$0xf] %vm6624_vm10, %v7560_v3  ;;  %v7561_v57 = vpack.c.bf16 %v6079_v24, %v6079_v24  ;;  %v5819_v58 = vmul.f32 %v12005_v22, %v8289_v5  ;;  %v8291_v8 = vadd.f32 %v12104_v43, %v8028_v38  ;;  %v4799_v18 = vpop.f32.mrb[99].mxu1 }
 0x351   : > { %6717 = vst.msk [vmem:[%s11620_s22 + $0x170] sm:$0xf] %vm6624_vm10, %v7558_v7  ;;  %v7559_v60 = vpack.c.bf16 %v6077_v63, %v6077_v63  ;;  %v5817_v4 = vmul.f32 %v12005_v22, %v8290_v16  ;;  %v8292_v19 = vadd.f32 %v12107_v26, %v4799_v18 }
 0x352   : > { %6720 = vst.msk [vmem:[%s11620_s22 + $0x17c] sm:$0xf] %vm6624_vm10, %v7561_v57  ;;  %v5954_v1 = vadd.f32 %v12012_v59, %v5819_v58  ;;  %v5820_v12 = vmul.f32 %v12005_v22, %v8291_v8 }
 0x353   : > { %6718 = vst.msk [vmem:[%s11620_s22 + $0x174] sm:$0xf] %vm6624_vm10, %v7559_v60  ;;  %v5952_v55 = vadd.f32 %v12012_v59, %v5817_v4  ;;  %v5818_v43 = vmul.f32 %v12005_v22, %v8292_v19 }
 0x354   : > { %v12238_v32 = vpop.f32.mrb[116].mxu0  ;;  %v6082_v36 = vmax.f32 %v5954_v1, 0.0  ;;  %v5955_v14 = vadd.f32 %v12012_v59, %v5820_v12 }
 0x355   : > { %v12241_v56 = vpop.f32.mrb[117].mxu0  ;;  %v6080_v26 = vmax.f32 %v5952_v55, 0.0  ;;  %v5953_v44 = vadd.f32 %v12012_v59, %v5818_v43  ;;  %v8031_v9 = vpop.f32.mrb[100].mxu1 }
 0x356   : > { %v12244_v34 = vpop.f32.mrb[118].mxu0  ;;  %v7564_v31 = vpack.c.bf16 %v6082_v36, %v6082_v36  ;;  %v6083_v46 = vmax.f32 %v5955_v14, 0.0  ;;  %v8293_v51 = vadd.f32 %v12126_v20, %v8031_v9  ;;  %v4812_v37 = vpop.f32.mrb[101].mxu1 }
 0x357   : > { %v12247_v52 = vpop.f32.mrb[119].mxu0  ;;  %v7562_v10 = vpack.c.bf16 %v6080_v26, %v6080_v26  ;;  %v6081_v54 = vmax.f32 %v5953_v44, 0.0  ;;  %v8294_v33 = vadd.f32 %v12129_v62, %v4812_v37  ;;  %v8032_v0 = vpop.f32.mrb[102].mxu1 }
 0x358   : > { %6723 = vst.msk [vmem:[%s11620_s22 + $0x188] sm:$0xf] %vm6624_vm10, %v7564_v31  ;;  %v7565_v30 = vpack.c.bf16 %v6083_v46, %v6083_v46  ;;  %v5823_v28 = vmul.f32 %v12005_v22, %v8293_v51  ;;  %v8295_v13 = vadd.f32 %v12132_v2, %v8032_v0  ;;  %v4815_v45 = vpop.f32.mrb[103].mxu1 }
 0x359   : > { %6721 = vst.msk [vmem:[%s11620_s22 + $0x180] sm:$0xf] %vm6624_vm10, %v7562_v10  ;;  %v7563_v20 = vpack.c.bf16 %v6081_v54, %v6081_v54  ;;  %v5821_v25 = vmul.f32 %v12005_v22, %v8294_v33  ;;  %v8296_v29 = vadd.f32 %v12135_v39, %v4815_v45 }
 0x35a   : > { %6724 = vst.msk [vmem:[%s11620_s22 + $0x18c] sm:$0xf] %vm6624_vm10, %v7565_v30  ;;  %v5958_v62 = vadd.f32 %v12012_v59, %v5823_v28  ;;  %v5824_v40 = vmul.f32 %v12005_v22, %v8295_v13 }
 0x35b   : > { %6722 = vst.msk [vmem:[%s11620_s22 + $0x184] sm:$0xf] %vm6624_vm10, %v7563_v20  ;;  %v5956_v11 = vadd.f32 %v12012_v59, %v5821_v25  ;;  %v5822_v2 = vmul.f32 %v12005_v22, %v8296_v29 }
 0x35c   : > { %v12266_v50 = vpop.f32.mrb[120].mxu0  ;;  %v6086_v27 = vmax.f32 %v5958_v62, 0.0  ;;  %v5959_v3 = vadd.f32 %v12012_v59, %v5824_v40 }
 0x35d   : > { %v12269_v24 = vpop.f32.mrb[121].mxu0  ;;  %v6084_v39 = vmax.f32 %v5956_v11, 0.0  ;;  %v5957_v5 = vadd.f32 %v12012_v59, %v5822_v2  ;;  %v8035_v53 = vpop.f32.mrb[104].mxu1 }
 0x35e   : > { %v12272_v7 = vpop.f32.mrb[122].mxu0  ;;  %v7568_v63 = vpack.c.bf16 %v6086_v27, %v6086_v27  ;;  %v6087_v16 = vmax.f32 %v5959_v3, 0.0  ;;  %v8297_v38 = vadd.f32 %v12154_v15, %v8035_v53  ;;  %v4828_v57 = vpop.f32.mrb[105].mxu1 }
 0x35f   : > { %v12275_v58 = vpop.f32.mrb[123].mxu0  ;;  %v7566_v8 = vpack.c.bf16 %v6084_v39, %v6084_v39  ;;  %v6085_v18 = vmax.f32 %v5957_v5, 0.0  ;;  %v8298_v60 = vadd.f32 %v12157_v48, %v4828_v57  ;;  %v8036_v4 = vpop.f32.mrb[106].mxu1 }
 0x360   : > { %6727 = vst.msk [vmem:[%s11620_s22 + $0x198] sm:$0xf] %vm6624_vm10, %v7568_v63  ;;  %v7569_v19 = vpack.c.bf16 %v6087_v16, %v6087_v16  ;;  %v5827_v1 = vmul.f32 %v12005_v22, %v8297_v38  ;;  %v8299_v12 = vadd.f32 %v12160_v23, %v8036_v4  ;;  %v4831_v55 = vpop.f32.mrb[107].mxu1 }
 0x361   : > { %6725 = vst.msk [vmem:[%s11620_s22 + $0x190] sm:$0xf] %vm6624_vm10, %v7566_v8  ;;  %v7567_v15 = vpack.c.bf16 %v6085_v18, %v6085_v18  ;;  %v5825_v43 = vmul.f32 %v12005_v22, %v8298_v60  ;;  %v8300_v36 = vadd.f32 %v12163_v61, %v4831_v55 }
 0x362   : > { %6728 = vst.msk [vmem:[%s11620_s22 + $0x19c] sm:$0xf] %vm6624_vm10, %v7569_v19  ;;  %v5962_v48 = vadd.f32 %v12012_v59, %v5827_v1  ;;  %v5828_v14 = vmul.f32 %v12005_v22, %v8299_v12 }
 0x363   : > { %6726 = vst.msk [vmem:[%s11620_s22 + $0x194] sm:$0xf] %vm6624_vm10, %v7567_v15  ;;  %v5960_v26 = vadd.f32 %v12012_v59, %v5825_v43  ;;  %v5826_v23 = vmul.f32 %v12005_v22, %v8300_v36 }
 0x364   : > { %v12294_v44 = vpop.f32.mrb[124].mxu0  ;;  %v6090_v9 = vmax.f32 %v5962_v48, 0.0  ;;  %v5963_v31 = vadd.f32 %v12012_v59, %v5828_v14 }
 0x365   : > { %v12297_v46 = vpop.f32.mrb[125].mxu0  ;;  %v6088_v61 = vmax.f32 %v5960_v26, 0.0  ;;  %v5961_v51 = vadd.f32 %v12012_v59, %v5826_v23  ;;  %v8039_v37 = vpop.f32.mrb[108].mxu1 }
 0x366   : > { %v12300_v10 = vpop.f32.mrb[126].mxu0  ;;  %v7572_v54 = vpack.c.bf16 %v6090_v9, %v6090_v9  ;;  %v6091_v33 = vmax.f32 %v5963_v31, 0.0  ;;  %v8301_v0 = vadd.f32 %v12182_v17, %v8039_v37  ;;  %v4844_v30 = vpop.f32.mrb[109].mxu1 }
 0x367   : > { %v12303_v28 = vpop.f32.mrb[127].mxu0  ;;  %v7570_v13 = vpack.c.bf16 %v6088_v61, %v6088_v61  ;;  %v6089_v45 = vmax.f32 %v5961_v51, 0.0  ;;  %v8302_v20 = vadd.f32 %v12185_v6, %v4844_v30  ;;  %v8040_v25 = vpop.f32.mrb[110].mxu1 }
 0x368   : > { %6731 = vst.msk [vmem:[%s11620_s22 + $0x1a8] sm:$0xf] %vm6624_vm10, %v7572_v54  ;;  %v7573_v29 = vpack.c.bf16 %v6091_v33, %v6091_v33  ;;  %v5831_v62 = vmul.f32 %v12005_v22, %v8301_v0  ;;  %v8303_v40 = vadd.f32 %v12188_v35, %v8040_v25  ;;  %v4847_v11 = vpop.f32.mrb[111].mxu1 }
 0x369   : > { %6729 = vst.msk [vmem:[%s11620_s22 + $0x1a0] sm:$0xf] %vm6624_vm10, %v7570_v13  ;;  %v7571_v17 = vpack.c.bf16 %v6089_v45, %v6089_v45  ;;  %v5829_v2 = vmul.f32 %v12005_v22, %v8302_v20  ;;  %v8304_v27 = vadd.f32 %v12191_v41, %v4847_v11 }
 0x36a   : > { %6732 = vst.msk [vmem:[%s11620_s22 + $0x1ac] sm:$0xf] %vm6624_vm10, %v7573_v29  ;;  %v5966_v6 = vadd.f32 %v12012_v59, %v5831_v62  ;;  %v5832_v3 = vmul.f32 %v12005_v22, %v8303_v40 }
 0x36b   : > { %6730 = vst.msk [vmem:[%s11620_s22 + $0x1a4] sm:$0xf] %vm6624_vm10, %v7571_v17  ;;  %v5964_v39 = vadd.f32 %v12012_v59, %v5829_v2  ;;  %v5830_v35 = vmul.f32 %v12005_v22, %v8304_v27 }
 0x36c   : > { %v6094_v5 = vmax.f32 %v5966_v6, 0.0  ;;  %v5967_v53 = vadd.f32 %v12012_v59, %v5832_v3 }
 0x36d   : > { %v6092_v63 = vmax.f32 %v5964_v39, 0.0  ;;  %v5965_v41 = vadd.f32 %v12012_v59, %v5830_v35  ;;  %v8043_v16 = vpop.f32.mrb[112].mxu1 }
 0x36e   : > { %v7576_v38 = vpack.c.bf16 %v6094_v5, %v6094_v5  ;;  %v6095_v57 = vmax.f32 %v5967_v53, 0.0  ;;  %v8305_v8 = vadd.f32 %v12210_v42, %v8043_v16  ;;  %v4860_v18 = vpop.f32.mrb[113].mxu1 }
 0x36f   : > { %v7574_v60 = vpack.c.bf16 %v6092_v63, %v6092_v63  ;;  %v6093_v4 = vmax.f32 %v5965_v41, 0.0  ;;  %v8306_v19 = vadd.f32 %v12213_v49, %v4860_v18  ;;  %v8044_v1 = vpop.f32.mrb[114].mxu1 }
 0x370   : > { %6735 = vst.msk [vmem:[%s11620_s22 + $0x1b8] sm:$0xf] %vm6624_vm10, %v7576_v38  ;;  %v7577_v12 = vpack.c.bf16 %v6095_v57, %v6095_v57  ;;  %v5835_v55 = vmul.f32 %v12005_v22, %v8305_v8  ;;  %v8307_v15 = vadd.f32 %v12216_v21, %v8044_v1  ;;  %v4863_v43 = vpop.f32.mrb[115].mxu1 }
 0x371   : > { %6733 = vst.msk [vmem:[%s11620_s22 + $0x1b0] sm:$0xf] %vm6624_vm10, %v7574_v60  ;;  %v7575_v36 = vpack.c.bf16 %v6093_v4, %v6093_v4  ;;  %v5833_v42 = vmul.f32 %v12005_v22, %v8306_v19  ;;  %v8308_v48 = vadd.f32 %v12219_v47, %v4863_v43 }
 0x372   : > { %6736 = vst.msk [vmem:[%s11620_s22 + $0x1bc] sm:$0xf] %vm6624_vm10, %v7577_v12  ;;  %v5970_v49 = vadd.f32 %v12012_v59, %v5835_v55  ;;  %v5836_v14 = vmul.f32 %v12005_v22, %v8307_v15 }
 0x373   : > { %6734 = vst.msk [vmem:[%s11620_s22 + $0x1b4] sm:$0xf] %vm6624_vm10, %v7575_v36  ;;  %v5968_v26 = vadd.f32 %v12012_v59, %v5833_v42  ;;  %v5834_v21 = vmul.f32 %v12005_v22, %v8308_v48 }
 0x374   : > { %v6098_v23 = vmax.f32 %v5970_v49, 0.0  ;;  %v5971_v9 = vadd.f32 %v12012_v59, %v5836_v14 }
 0x375   : > { %v6096_v31 = vmax.f32 %v5968_v26, 0.0  ;;  %v5969_v47 = vadd.f32 %v12012_v59, %v5834_v21  ;;  %v8047_v61 = vpop.f32.mrb[116].mxu1 }
 0x376   : > { %v7580_v51 = vpack.c.bf16 %v6098_v23, %v6098_v23  ;;  %v6099_v37 = vmax.f32 %v5971_v9, 0.0  ;;  %v8309_v54 = vadd.f32 %v12238_v32, %v8047_v61  ;;  %v4876_v33 = vpop.f32.mrb[117].mxu1 }
 0x377   : > { %v7578_v0 = vpack.c.bf16 %v6096_v31, %v6096_v31  ;;  %v6097_v30 = vmax.f32 %v5969_v47, 0.0  ;;  %v8310_v13 = vadd.f32 %v12241_v56, %v4876_v33  ;;  %v8048_v45 = vpop.f32.mrb[118].mxu1 }
 0x378   : > { %6739 = vst.msk [vmem:[%s11620_s22 + $0x1c8] sm:$0xf] %vm6624_vm10, %v7580_v51  ;;  %v7581_v20 = vpack.c.bf16 %v6099_v37, %v6099_v37  ;;  %v5839_v25 = vmul.f32 %v12005_v22, %v8309_v54  ;;  %v8311_v29 = vadd.f32 %v12244_v34, %v8048_v45  ;;  %v4879_v62 = vpop.f32.mrb[119].mxu1 }
 0x379   : > { %6737 = vst.msk [vmem:[%s11620_s22 + $0x1c0] sm:$0xf] %vm6624_vm10, %v7578_v0  ;;  %v7579_v40 = vpack.c.bf16 %v6097_v30, %v6097_v30  ;;  %v5837_v32 = vmul.f32 %v12005_v22, %v8310_v13  ;;  %v8312_v11 = vadd.f32 %v12247_v52, %v4879_v62 }
 0x37a   : > { %6740 = vst.msk [vmem:[%s11620_s22 + $0x1cc] sm:$0xf] %vm6624_vm10, %v7581_v20  ;;  %v5974_v56 = vadd.f32 %v12012_v59, %v5839_v25  ;;  %v5840_v17 = vmul.f32 %v12005_v22, %v8311_v29 }
 0x37b   : > { %6738 = vst.msk [vmem:[%s11620_s22 + $0x1c4] sm:$0xf] %vm6624_vm10, %v7579_v40  ;;  %v5972_v2 = vadd.f32 %v12012_v59, %v5837_v32  ;;  %v5838_v34 = vmul.f32 %v12005_v22, %v8312_v11 }
 0x37c   : > { %v6102_v27 = vmax.f32 %v5974_v56, 0.0  ;;  %v5975_v6 = vadd.f32 %v12012_v59, %v5840_v17 }
 0x37d   : > { %v6100_v3 = vmax.f32 %v5972_v2, 0.0  ;;  %v5973_v52 = vadd.f32 %v12012_v59, %v5838_v34  ;;  %v8051_v39 = vpop.f32.mrb[120].mxu1 }
 0x37e   : > { %v7584_v35 = vpack.c.bf16 %v6102_v27, %v6102_v27  ;;  %v6103_v5 = vmax.f32 %v5975_v6, 0.0  ;;  %v8313_v53 = vadd.f32 %v12266_v50, %v8051_v39  ;;  %v4892_v63 = vpop.f32.mrb[121].mxu1 }
 0x37f   : > { %v7582_v41 = vpack.c.bf16 %v6100_v3, %v6100_v3  ;;  %v6101_v16 = vmax.f32 %v5973_v52, 0.0  ;;  %v8314_v38 = vadd.f32 %v12269_v24, %v4892_v63  ;;  %v8052_v57 = vpop.f32.mrb[122].mxu1 }
 0x380   : > { %6743 = vst.msk [vmem:[%s11620_s22 + $0x1d8] sm:$0xf] %vm6624_vm10, %v7584_v35  ;;  %v7585_v8 = vpack.c.bf16 %v6103_v5, %v6103_v5  ;;  %v5843_v18 = vmul.f32 %v12005_v22, %v8313_v53  ;;  %v8315_v60 = vadd.f32 %v12272_v7, %v8052_v57  ;;  %v4895_v4 = vpop.f32.mrb[123].mxu1 }
 0x381   : > { %6741 = vst.msk [vmem:[%s11620_s22 + $0x1d0] sm:$0xf] %vm6624_vm10, %v7582_v41  ;;  %v7583_v19 = vpack.c.bf16 %v6101_v16, %v6101_v16  ;;  %v5841_v50 = vmul.f32 %v12005_v22, %v8314_v38  ;;  %v8316_v1 = vadd.f32 %v12275_v58, %v4895_v4 }
 0x382   : > { %6744 = vst.msk [vmem:[%s11620_s22 + $0x1dc] sm:$0xf] %vm6624_vm10, %v7585_v8  ;;  %v5978_v24 = vadd.f32 %v12012_v59, %v5843_v18  ;;  %v5844_v12 = vmul.f32 %v12005_v22, %v8315_v60 }
 0x383   : > { %6742 = vst.msk [vmem:[%s11620_s22 + $0x1d4] sm:$0xf] %vm6624_vm10, %v7583_v19  ;;  %v5976_v55 = vadd.f32 %v12012_v59, %v5841_v50  ;;  %v5842_v7 = vmul.f32 %v12005_v22, %v8316_v1 }
 0x384   : > { %v6106_v15 = vmax.f32 %v5978_v24, 0.0  ;;  %v5979_v43 = vadd.f32 %v12012_v59, %v5844_v12 }
 0x385   : > { %v6104_v36 = vmax.f32 %v5976_v55, 0.0  ;;  %v5977_v58 = vadd.f32 %v12012_v59, %v5842_v7  ;;  %v8055_v42 = vpop.f32.mrb[124].mxu1 }
 0x386   : > { %v7588_v48 = vpack.c.bf16 %v6106_v15, %v6106_v15  ;;  %v6107_v49 = vmax.f32 %v5979_v43, 0.0  ;;  %v8317_v14 = vadd.f32 %v12294_v44, %v8055_v42  ;;  %v4908_v26 = vpop.f32.mrb[125].mxu1 }
 0x387   : > { %v7586_v21 = vpack.c.bf16 %v6104_v36, %v6104_v36  ;;  %v6105_v23 = vmax.f32 %v5977_v58, 0.0  ;;  %v8318_v9 = vadd.f32 %v12297_v46, %v4908_v26  ;;  %v8056_v31 = vpop.f32.mrb[126].mxu1 }
 0x388   : > { %6747 = vst.msk [vmem:[%s11620_s22 + $0x1e8] sm:$0xf] %vm6624_vm10, %v7588_v48  ;;  %v7589_v47 = vpack.c.bf16 %v6107_v49, %v6107_v49  ;;  %v5847_v61 = vmul.f32 %v12005_v22, %v8317_v14  ;;  %v8319_v51 = vadd.f32 %v12300_v10, %v8056_v31  ;;  %v4911_v37 = vpop.f32.mrb[127].mxu1 }
 0x389   : > { %6745 = vst.msk [vmem:[%s11620_s22 + $0x1e0] sm:$0xf] %vm6624_vm10, %v7586_v21  ;;  %v7587_v44 = vpack.c.bf16 %v6105_v23, %v6105_v23  ;;  %v5845_v54 = vmul.f32 %v12005_v22, %v8318_v9  ;;  %v8320_v33 = vadd.f32 %v12303_v28, %v4911_v37 }
 0x38a   : > { %6748 = vst.msk [vmem:[%s11620_s22 + $0x1ec] sm:$0xf] %vm6624_vm10, %v7589_v47  ;;  %v5982_v46 = vadd.f32 %v12012_v59, %v5847_v61  ;;  %v5848_v0 = vmul.f32 %v12005_v22, %v8319_v51 }
 0x38b   : > { %6746 = vst.msk [vmem:[%s11620_s22 + $0x1e4] sm:$0xf] %vm6624_vm10, %v7587_v44  ;;  %v5980_v10 = vadd.f32 %v12012_v59, %v5845_v54  ;;  %v5846_v30 = vmul.f32 %v12005_v22, %v8320_v33 }
 0x38c   : > { %v6110_v13 = vmax.f32 %v5982_v46, 0.0  ;;  %v5983_v45 = vadd.f32 %v12012_v59, %v5848_v0 }
 0x38d   : > { %v6108_v28 = vmax.f32 %v5980_v10, 0.0  ;;  %v5981_v20 = vadd.f32 %v12012_v59, %v5846_v30 }
 0x38e   : > { %v7592_v25 = vpack.c.bf16 %v6110_v13, %v6110_v13  ;;  %v6111_v29 = vmax.f32 %v5983_v45, 0.0 }
 0x38f   : > { %v7590_v62 = vpack.c.bf16 %v6108_v28, %v6108_v28  ;;  %v6109_v40 = vmax.f32 %v5981_v20, 0.0 }
 0x390   : > { %6751 = vst.msk [vmem:[%s11620_s22 + $0x1f8] sm:$0xf] %vm6624_vm10, %v7592_v25  ;;  %v7593_v32 = vpack.c.bf16 %v6111_v29, %v6111_v29 }
 0x391   : > { %6749 = vst.msk [vmem:[%s11620_s22 + $0x1f0] sm:$0xf] %vm6624_vm10, %v7590_v62  ;;  %v7591_v22 = vpack.c.bf16 %v6109_v40, %v6109_v40 }
 0x392   : > { %6752 = vst.msk [vmem:[%s11620_s22 + $0x1fc] sm:$0xf] %vm6624_vm10, %v7593_v32 }
 0x393   : > { %6750 = vst.msk [vmem:[%s11620_s22 + $0x1f4] sm:$0xf] %vm6624_vm10, %v7591_v22 }
 0x394   : > { %8720 = shalt.err (!%p8717_p5)
}
 0x395   : > { %s8721_s9 = scalar_lea.hbm %s12411_s12, 8192  ;;  %s8725_s24 = scalar_lea.hbm %s12473_s4, 16384 }
 0x396   : > { %p8722_p6 = scmp.ne.s32.totalorder %s12411_s12, %s8721_s9  ;;  %p8726_p10 = scmp.lt.u32.totalorder %s12411_s12, %s12473_s4 }
 0x397   : > { %p8727_p11 = scmp.lt.u32.totalorder %s8725_s24, %s8721_s9  ;;  %p8729_p13 = scmp.lt.u32.totalorder %s8721_s9, %s12411_s12 }
 0x398   : > { %p8723_p7 = pnand %p8722_p6, %p8857_p4 }
 0x399   : > { %p8728_p12 = por %p8727_p11, %p8726_p10 }
 0x39a   : > { %p8724_p9 = pneg %p8723_p7 }
 0x39b   : > { %p8730_p0 = por %p8729_p13, %p8728_p12 }
 0x39d   : > { %p8731_p1 = pnand %p8730_p0, %p8724_p9 }
 0x39f   : > { %8734 = shalt.err (!%p8731_p1)
}
 0x3a0   : > { %s8790_s30 = smov 64   ;;  %s8791_s5 = smov 4  }
 0x3a1   : > { %8454 = dma.vmem_to_hbm [thread:$0]  (%p8857_p4), %s12413_s6, 8192, %s12411_s12, %s12423_s18, %s8790_s30, %s8790_s30, %s8791_s5  }
 0x3a2 PF: > { %p8460_p2 = scmp.ge.s32.totalorder %s8785_s20, 2  ;;  %s6783_s10 = sand.u32 1, %s8765_s15  }
 0x3a3   : > { %s6784_s11 = scalar_lea.sflag [#allocation3], %s6783_s10 }
 0x3a4   : > { %p8457_p3 = pnand %p8460_p2, %p8864_p8 }
 0x3a6   : > { %8760 = dma.done.wait (!%p8457_p3), %s6784_s11, 8192  }
 0x3a7   : > { %8762 = vsyncadd (!%p8457_p3), %s6784_s11, 4294959104  ;;  %s17_s20 = sadd.s32 1, %s8785_s20   ;;  %s12625_s15 = smov %s8769_s16 }
 0x3a8   : > { %p14_p5 = scmp.ge.s32.totalorder %s17_s20, 4   ;;  %s12626_s16 = smov %s8773_s17 }
 0x3a9   : > { %s12627_s17 = smov %s8870_s28  ;;  %s12628_s18 = smov %s8781_s19 }
 0x3aa   : > { %s12629_s19 = smov %s12631_s23  ;;  %16 = sbr.rel (!%p14_p5) target bundleno = 4 (0x4), region = 82 }
 0x3b1   :  { %6789 = vsyncpa [#allocation3], 1 }
 0x3b2   :  { %6791 = vsyncpa [#allocation3 + $0x1], 1 }

</bundles_post_ra>
